<compile_context>
chip_gen: v6e
topology: v6e:2x2x1
jax: 0.10.0
libtpu: 0.0.40
codegen_flags: <defaults>
</compile_context>

<pallas_src>
import functools

import numpy as np

import jax
import jax.numpy as jnp
from jax import lax
from jax.experimental import pallas as pl
from jax.experimental.pallas import tpu as pltpu


# ---------------------------------------------------------------------------
# Fused Pallas kernel: whole ResNet forward, whole batch, one invocation
# ---------------------------------------------------------------------------

def _resnet_fused_kernel(x_ref, w_ref, *rest, cfg, H0, W0, NC,
                         mask_keys, sel_keys):
    """All residual blocks + final 2x2 max-pool; batch packed on sublanes.

    x_ref:     (NC, H0*W0)            NC = N*C rows, flattened spatial on lanes
    w_ref:     (2*n_blocks, 2*NC, K)  stacked im2col matmul weights, K=9*NC+8;
                                      BN scale folded in, BN bias in col 9*NC
                                      (patch rows 9*NC.. are all-ones).
    rest:      tap-mask refs (9, NC, h*w) per resolution,
               subsample-selection refs (h*w, h*w//4) per resolution,
               then o_ref (NC, Ho*Wo) and the patch VMEM scratch (K, H0*W0).
    """
    nm, ns = len(mask_keys), len(sel_keys)
    mask_refs = dict(zip(mask_keys, rest[:nm]))
    sel_refs = dict(zip(sel_keys, rest[nm:nm + ns]))
    o_ref = rest[nm + ns]
    patch_ref = rest[nm + ns + 1]

    # Bias rows of the im2col patch: all-ones, written once, reused by every conv.
    patch_ref[9 * NC:9 * NC + 8, :] = jnp.ones((8, H0 * W0), jnp.float32)

    def im2col(v, h, w):
        """Write the 9 rolled + boundary-masked taps of v (NC, h*w) into the
        patch scratch at sublane offsets t*NC and return the (K, h*w) patch."""
        hw = h * w
        m_ref = mask_refs[(h, w)]
        for kh in range(3):
            for kw in range(3):
                t = kh * 3 + kw
                off = (kh - 1) * w + (kw - 1)        # flat offset of this tap
                if off == 0:
                    patch_ref[t * NC:(t + 1) * NC, :hw] = v
                else:
                    tap = pltpu.roll(v, shift=(-off) % hw, axis=1)
                    patch_ref[t * NC:(t + 1) * NC, :hw] = tap * m_ref[t]
        return patch_ref[:, :hw]

    def fused_conv(v, h, w, mm):
        """One MXU matmul = up to two 3x3 convs (+ folded BN) sharing input v:
        output rows [0:NC] -> first conv, [NC:2*NC] -> second conv (or zeros)."""
        return jnp.dot(w_ref[mm], im2col(v, h, w),
                       preferred_element_type=jnp.float32)

    def subsample(v, h, w):
        """Keep even (y, x) positions via a host-built 0/1 selection matmul."""
        return jnp.dot(v, sel_refs[(h, w)][...],
                       preferred_element_type=jnp.float32)

    a = x_ref[...]                                    # (NC, H0*W0)
    H, W = H0, W0
    for i, (stride, has_down) in enumerate(cfg):
        hin, win = H, W
        # conv1 (+ residual-downsample conv) in one stacked matmul.
        out2 = fused_conv(a, hin, win, 2 * i)         # (2*NC, hin*win)
        if stride == 2:                               # stride-2 == stride-1 conv
            out2 = subsample(out2, hin, win)          # subsampled (k=3, pad=1)
            H, W = hin // 2, win // 2
        h1 = jnp.maximum(out2[:NC], 0.0)              # conv1 -> BN -> ReLU
        if has_down:
            res = out2[NC:]                           # conv3x3 + BN downsample
        else:
            res = subsample(a, hin, win) if stride == 2 else a
        # conv2 -> BN -> (+residual) -> ReLU
        h2 = fused_conv(h1, H, W, 2 * i + 1)[:NC]
        a = jnp.maximum(h2 + res, 0.0)

    # Fused MaxPool2d(2): max over {p, p+1, p+W, p+W+1}, keep even (y, x).
    # Wrapped values from the rolls only land at discarded (odd) positions.
    hw = H * W
    m = jnp.maximum(a, pltpu.roll(a, shift=(-1) % hw, axis=1))
    m = jnp.maximum(m, pltpu.roll(a, shift=(-W) % hw, axis=1))
    m = jnp.maximum(m, pltpu.roll(a, shift=(-(W + 1)) % hw, axis=1))
    o_ref[...] = subsample(m, H, W)                   # (NC, Ho*Wo); tiny output


# ---------------------------------------------------------------------------
# Host-side constant builders (numpy -> compile-time constants)
# ---------------------------------------------------------------------------

def _make_tap_masks(h, w, nc):
    """(9, nc, h*w) float 0/1: 1 where tap (kh, kw) stays inside the image."""
    pos = np.arange(h * w)
    py, px = pos // w, pos % w
    masks = np.zeros((9, nc, h * w), np.float32)
    for kh in range(3):
        for kw in range(3):
            dy, dx = kh - 1, kw - 1
            ok = ((py + dy >= 0) & (py + dy < h) & (px + dx >= 0) & (px + dx < w))
            masks[kh * 3 + kw] = ok.astype(np.float32)[None, :]
    return masks


def _make_subsample_sel(h, w):
    """(h*w, (h//2)*(w//2)) 0/1 matrix keeping even rows / even columns."""
    ho, wo = h // 2, w // 2
    sel = np.zeros((h * w, ho * wo), np.float32)
    cols = np.arange(ho * wo)
    sel[2 * (cols // wo) * w + 2 * (cols % wo), cols] = 1.0
    return sel


def _conv_to_bigmat(w_hwio, scale, bias, n_batch):
    """(3,3,Cin,Cout) HWIO conv weight + eval-mode BN scale/bias ->
    (N*Cout, 9*N*Cin + 8) batch-block-diagonal im2col matmul weight.
    Patch row layout: r = t*(N*Cin) + n*Cin + ci, t = kh*3 + kw; patch rows
    9*N*Cin.. are all-ones, so the BN bias goes in column 9*N*Cin."""
    w = np.asarray(w_hwio, np.float32)
    scale = np.asarray(scale, np.float32)
    bias = np.asarray(bias, np.float32)
    cin, cout = w.shape[2], w.shape[3]
    wk = np.transpose(w, (3, 0, 1, 2)).reshape(cout, 9, cin) * scale[:, None, None]
    big = np.zeros((n_batch * cout, 9 * n_batch * cin + 8), np.float32)
    for n in range(n_batch):
        for t in range(9):
            c0 = t * n_batch * cin + n * cin
            big[n * cout:(n + 1) * cout, c0:c0 + cin] = wk[:, t, :]
        big[n * cout:(n + 1) * cout, 9 * n_batch * cin] = bias
    return big


def pack_params(params, n_batch):
    """Per residual block, two stacked matmul weights:
    slot 2i   : conv1 rows [0:NC] + downsample rows [NC:2NC] (or zeros),
    slot 2i+1 : conv2 rows [0:NC] + zeros."""
    w_list, cfg = [], []
    for layer in params:
        for p in layer:
            stride, has_down = p["stride"], ("wd" in p)
            assert stride in (1, 2)        # stride-2-as-subsampled-conv trick
            cfg.append((stride, has_down))
            top = _conv_to_bigmat(p["w1"], p["s1"], p["b1"], n_batch)
            bot = (_conv_to_bigmat(p["wd"], p["sd"], p["bd"], n_batch)
                   if has_down else np.zeros_like(top))
            w_list.append(np.concatenate([top, bot], axis=0))
            w2 = _conv_to_bigmat(p["w2"], p["s2"], p["b2"], n_batch)
            w_list.append(np.concatenate([w2, np.zeros_like(w2)], axis=0))
    return jnp.asarray(np.stack(w_list)), tuple(cfg)


# ---------------------------------------------------------------------------
# pallas_call wrapper
# ---------------------------------------------------------------------------

def resnet_forward(x_nchw, params):
    """x_nchw: (N, C, H, W) NCHW like nn.Conv2d. Returns (N, C, H//8, W//8).
    `params` must be concrete (closed over), not traced: packing uses numpy."""
    N, C, H, W = x_nchw.shape
    NC = N * C
    w_stack, cfg = pack_params(params, N)
    assert w_stack.shape == (2 * len(cfg), 2 * NC, 9 * NC + 8)

    # Resolutions needing 3x3 tap masks / stride-2 & pool selection matrices.
    mask_keys, sel_keys = [], []
    h, w = H, W
    for stride, _ in cfg:
        if (h, w) not in mask_keys:
            mask_keys.append((h, w))
        if stride == 2:
            if (h, w) not in sel_keys:
                sel_keys.append((h, w))
            h, w = h // 2, w // 2
            if (h, w) not in mask_keys:
                mask_keys.append((h, w))
    if (h, w) not in sel_keys:                        # final MaxPool2d(2)
        sel_keys.append((h, w))
    Ho, Wo = h // 2, w // 2
    assert Ho >= 1 and Wo >= 1

    masks = [jnp.asarray(_make_tap_masks(hh, ww, NC)) for hh, ww in mask_keys]
    sels = [jnp.asarray(_make_subsample_sel(hh, ww)) for hh, ww in sel_keys]

    x = x_nchw.reshape(NC, H * W).astype(jnp.float32)
    kernel = functools.partial(
        _resnet_fused_kernel, cfg=cfg, H0=H, W0=W, NC=NC,
        mask_keys=tuple(mask_keys), sel_keys=tuple(sel_keys))

    vmem = pl.BlockSpec(memory_space=pltpu.MemorySpace.VMEM)
    out = pl.pallas_call(
        kernel,
        out_shape=jax.ShapeDtypeStruct((NC, Ho * Wo), jnp.float32),
        in_specs=[vmem] * (2 + len(masks) + len(sels)),
        out_specs=vmem,
        scratch_shapes=[pltpu.VMEM((9 * NC + 8, H * W), jnp.float32)],
    )(x, w_stack, *masks, *sels)
    return out.reshape(N, C, Ho, Wo)


# ---------------------------------------------------------------------------
# Parameter init (mirrors ResNet.__init__ / make_layer; eval-mode BN)
# ---------------------------------------------------------------------------

def _init_conv(key, cin, cout):
    return (0.1 * jax.random.normal(key, (3, 3, cin, cout))).astype(jnp.float32)


def _init_bn(key, c, eps=1e-5):
    k1, k2, k3, k4 = jax.random.split(key, 4)
    gamma = 1.0 + 0.1 * jax.random.normal(k1, (c,))
    beta = 0.1 * jax.random.normal(k2, (c,))
    running_mean = 0.1 * jax.random.normal(k3, (c,))
    running_var = 1.0 + 0.1 * jax.random.uniform(k4, (c,))
    scale = gamma * jax.lax.rsqrt(running_var + eps)
    bias = beta - running_mean * scale
    return scale.astype(jnp.float32), bias.astype(jnp.float32)


def _init_block(key, cin, cout, stride):
    keys = jax.random.split(key, 6)
    p = {"stride": stride}
    p["w1"] = _init_conv(keys[0], cin, cout)
    p["s1"], p["b1"] = _init_bn(keys[1], cout)
    p["w2"] = _init_conv(keys[2], cout, cout)
    p["s2"], p["b2"] = _init_bn(keys[3], cout)
    if stride != 1 or cin != cout:
        p["wd"] = _init_conv(keys[4], cin, cout)      # conv3x3 downsample (per spec)
        p["sd"], p["bd"] = _init_bn(keys[5], cout)
    return p


def init_resnet_params(key, num_channels, layers):
    """layer1 stride 1, layer2/3 first block stride 2 (with downsample)."""
    params = []
    in_c = num_channels
    for n_blocks, first_stride in zip(layers, (1, 2, 2)):
        key, sub = jax.random.split(key)
        bkeys = jax.random.split(sub, n_blocks)
        blocks = [_init_block(bkeys[0], in_c, num_channels, first_stride)]
        in_c = num_channels
        for b in range(1, n_blocks):
            blocks.append(_init_block(bkeys[b], num_channels, num_channels, 1))
        params.append(blocks)
    return params


# ---------------------------------------------------------------------------
# Pure-JAX (XLA) reference of the same forward pass, for validation
# ---------------------------------------------------------------------------

def _reference_forward(x_nchw, params):
    def conv(x, w_hwio, stride):
        return lax.conv_general_dilated(
            x, w_hwio, window_strides=(stride, stride),
            padding=((1, 1), (1, 1)),
            dimension_numbers=("NCHW", "HWIO", "NCHW"),
            precision=lax.Precision.HIGHEST)

    def bn(x, s, b):
        return x * s[None, :, None, None] + b[None, :, None, None]

    out = x_nchw.astype(jnp.float32)
    for layer in params:
        for p in layer:
            stride = p["stride"]
            h = jax.nn.relu(bn(conv(out, p["w1"], stride), p["s1"], p["b1"]))
            res = (bn(conv(out, p["wd"], stride), p["sd"], p["bd"])
                   if "wd" in p else out)
            h = bn(conv(h, p["w2"], 1), p["s2"], p["b2"])
            out = jax.nn.relu(h + res)
    # NOTE: self.avg_pool is defined in __init__ but unused in forward().
    return lax.reduce_window(out, -jnp.inf, lax.max,
                             (1, 1, 2, 2), (1, 1, 2, 2), "VALID")


# ---------------------------------------------------------------------------
# Main
# ---------------------------------------------------------------------------

if __name__ == "__main__":
    key = jax.random.PRNGKey(0)
    kx, kp = jax.random.split(key)

    NUM_CHANNELS = 4                       # model_configs.num_channels
    LAYERS = [2, 2, 2]
    N, H, W = 2, 16, 16

    x = jax.random.normal(kx, (N, NUM_CHANNELS, H, W), jnp.float32)  # NCHW
    params = init_resnet_params(kp, NUM_CHANNELS, LAYERS)

    fwd = jax.jit(lambda a: resnet_forward(a, params))
    out = jax.block_until_ready(fwd(x))

    assert out.shape == (N, NUM_CHANNELS, H // 8, W // 8), out.shape  # (2,4,2,2)
    assert bool(jnp.all(jnp.isfinite(out)))

    ref = _reference_forward(x, params)
    max_err = float(jnp.max(jnp.abs(out - ref)))
    # Loose tolerance: default-precision MXU matmuls (incl. folded BN bias and
    # 0/1 selection matmuls) across 14 chained convs vs a Precision.HIGHEST
    # XLA reference.
    assert jnp.allclose(out, ref, atol=3e-2, rtol=3e-2), max_err

    print("KERNEL_OK")
</pallas_src>

<mosaic_0001>
module attributes {stable_mosaic.version = 11 : i64} {
  func.func @_resnet_fused_kernel(%arg0: memref<8x256xf32, #tpu.memory_space<vmem>>, %arg1: memref<12x16x80xf32, #tpu.memory_space<vmem>>, %arg2: memref<9x8x256xf32, #tpu.memory_space<vmem>>, %arg3: memref<9x8x64xf32, #tpu.memory_space<vmem>>, %arg4: memref<9x8x16xf32, #tpu.memory_space<vmem>>, %arg5: memref<256x64xf32, #tpu.memory_space<vmem>>, %arg6: memref<64x16xf32, #tpu.memory_space<vmem>>, %arg7: memref<16x4xf32, #tpu.memory_space<vmem>>, %arg8: memref<8x4xf32, #tpu.memory_space<vmem>>, %arg9: memref<80x256xf32, #tpu.memory_space<vmem>>) attributes {dimension_semantics = [], scalar_prefetch = 0 : i64, scratch_operands = 1 : i64, tpu.core_type = #tpu.core_type<tc>} {
    %cst = arith.constant 1.000000e+00 : f32
    %0 = vector.broadcast %cst : f32 to vector<8x256xf32>
    %c72 = arith.constant 72 : index
    %c0 = arith.constant 0 : index
    %1 = vector.load %arg9[%c72, %c0] : memref<80x256xf32, #tpu.memory_space<vmem>>, vector<8x256xf32>
    tpu.vector_store %arg9[%c72, %c0], %0 {strides = array<i32>} : memref<80x256xf32, #tpu.memory_space<vmem>>, vector<8x256xf32>,
    %c0_0 = arith.constant 0 : index
    %c0_1 = arith.constant 0 : index
    %2 = vector.load %arg0[%c0_0, %c0_1] : memref<8x256xf32, #tpu.memory_space<vmem>>, vector<8x256xf32>
    %c0_2 = arith.constant 0 : index
    %c0_3 = arith.constant 0 : index
    %c0_4 = arith.constant 0 : index
    %3 = vector.load %arg1[%c0_2, %c0_3, %c0_4] : memref<12x16x80xf32, #tpu.memory_space<vmem>>, vector<1x16x80xf32>
    %4 = vector.shape_cast %3 : vector<1x16x80xf32> to vector<16x80xf32>
    %c17_i32 = arith.constant 17 : i32
    %5 = tpu.dynamic_rotate %2 by %c17_i32 dim 1 : vector<8x256xf32>, i32 -> vector<8x256xf32>
    %c0_5 = arith.constant 0 : index
    %c0_6 = arith.constant 0 : index
    %c0_7 = arith.constant 0 : index
    %6 = vector.load %arg2[%c0_5, %c0_6, %c0_7] : memref<9x8x256xf32, #tpu.memory_space<vmem>>, vector<1x8x256xf32>
    %7 = vector.shape_cast %6 : vector<1x8x256xf32> to vector<8x256xf32>
    %8 = arith.mulf %5, %7 : vector<8x256xf32>
    %c0_8 = arith.constant 0 : index
    %c0_9 = arith.constant 0 : index
    %9 = vector.load %arg9[%c0_8, %c0_9] : memref<80x256xf32, #tpu.memory_space<vmem>>, vector<8x256xf32>
    tpu.vector_store %arg9[%c0_8, %c0_9], %8 {strides = array<i32>} : memref<80x256xf32, #tpu.memory_space<vmem>>, vector<8x256xf32>,
    %c16_i32 = arith.constant 16 : i32
    %10 = tpu.dynamic_rotate %2 by %c16_i32 dim 1 : vector<8x256xf32>, i32 -> vector<8x256xf32>
    %c1 = arith.constant 1 : index
    %c0_10 = arith.constant 0 : index
    %c0_11 = arith.constant 0 : index
    %11 = vector.load %arg2[%c1, %c0_10, %c0_11] : memref<9x8x256xf32, #tpu.memory_space<vmem>>, vector<1x8x256xf32>
    %12 = vector.shape_cast %11 : vector<1x8x256xf32> to vector<8x256xf32>
    %13 = arith.mulf %10, %12 : vector<8x256xf32>
    %c8 = arith.constant 8 : index
    %c0_12 = arith.constant 0 : index
    %14 = vector.load %arg9[%c8, %c0_12] : memref<80x256xf32, #tpu.memory_space<vmem>>, vector<8x256xf32>
    tpu.vector_store %arg9[%c8, %c0_12], %13 {strides = array<i32>} : memref<80x256xf32, #tpu.memory_space<vmem>>, vector<8x256xf32>,
    %c15_i32 = arith.constant 15 : i32
    %15 = tpu.dynamic_rotate %2 by %c15_i32 dim 1 : vector<8x256xf32>, i32 -> vector<8x256xf32>
    %c2 = arith.constant 2 : index
    %c0_13 = arith.constant 0 : index
    %c0_14 = arith.constant 0 : index
    %16 = vector.load %arg2[%c2, %c0_13, %c0_14] : memref<9x8x256xf32, #tpu.memory_space<vmem>>, vector<1x8x256xf32>
    %17 = vector.shape_cast %16 : vector<1x8x256xf32> to vector<8x256xf32>
    %18 = arith.mulf %15, %17 : vector<8x256xf32>
    %c16 = arith.constant 16 : index
    %c0_15 = arith.constant 0 : index
    %19 = vector.load %arg9[%c16, %c0_15] : memref<80x256xf32, #tpu.memory_space<vmem>>, vector<8x256xf32>
    tpu.vector_store %arg9[%c16, %c0_15], %18 {strides = array<i32>} : memref<80x256xf32, #tpu.memory_space<vmem>>, vector<8x256xf32>,
    %c1_i32 = arith.constant 1 : i32
    %20 = tpu.dynamic_rotate %2 by %c1_i32 dim 1 : vector<8x256xf32>, i32 -> vector<8x256xf32>
    %c3 = arith.constant 3 : index
    %c0_16 = arith.constant 0 : index
    %c0_17 = arith.constant 0 : index
    %21 = vector.load %arg2[%c3, %c0_16, %c0_17] : memref<9x8x256xf32, #tpu.memory_space<vmem>>, vector<1x8x256xf32>
    %22 = vector.shape_cast %21 : vector<1x8x256xf32> to vector<8x256xf32>
    %23 = arith.mulf %20, %22 : vector<8x256xf32>
    %c24 = arith.constant 24 : index
    %c0_18 = arith.constant 0 : index
    %24 = vector.load %arg9[%c24, %c0_18] : memref<80x256xf32, #tpu.memory_space<vmem>>, vector<8x256xf32>
    tpu.vector_store %arg9[%c24, %c0_18], %23 {strides = array<i32>} : memref<80x256xf32, #tpu.memory_space<vmem>>, vector<8x256xf32>,
    %c32 = arith.constant 32 : index
    %c0_19 = arith.constant 0 : index
    %25 = vector.load %arg9[%c32, %c0_19] : memref<80x256xf32, #tpu.memory_space<vmem>>, vector<8x256xf32>
    tpu.vector_store %arg9[%c32, %c0_19], %2 {strides = array<i32>} : memref<80x256xf32, #tpu.memory_space<vmem>>, vector<8x256xf32>,
    %c255_i32 = arith.constant 255 : i32
    %26 = tpu.dynamic_rotate %2 by %c255_i32 dim 1 : vector<8x256xf32>, i32 -> vector<8x256xf32>
    %c5 = arith.constant 5 : index
    %c0_20 = arith.constant 0 : index
    %c0_21 = arith.constant 0 : index
    %27 = vector.load %arg2[%c5, %c0_20, %c0_21] : memref<9x8x256xf32, #tpu.memory_space<vmem>>, vector<1x8x256xf32>
    %28 = vector.shape_cast %27 : vector<1x8x256xf32> to vector<8x256xf32>
    %29 = arith.mulf %26, %28 : vector<8x256xf32>
    %c40 = arith.constant 40 : index
    %c0_22 = arith.constant 0 : index
    %30 = vector.load %arg9[%c40, %c0_22] : memref<80x256xf32, #tpu.memory_space<vmem>>, vector<8x256xf32>
    tpu.vector_store %arg9[%c40, %c0_22], %29 {strides = array<i32>} : memref<80x256xf32, #tpu.memory_space<vmem>>, vector<8x256xf32>,
    %c241_i32 = arith.constant 241 : i32
    %31 = tpu.dynamic_rotate %2 by %c241_i32 dim 1 : vector<8x256xf32>, i32 -> vector<8x256xf32>
    %c6 = arith.constant 6 : index
    %c0_23 = arith.constant 0 : index
    %c0_24 = arith.constant 0 : index
    %32 = vector.load %arg2[%c6, %c0_23, %c0_24] : memref<9x8x256xf32, #tpu.memory_space<vmem>>, vector<1x8x256xf32>
    %33 = vector.shape_cast %32 : vector<1x8x256xf32> to vector<8x256xf32>
    %34 = arith.mulf %31, %33 : vector<8x256xf32>
    %c48 = arith.constant 48 : index
    %c0_25 = arith.constant 0 : index
    %35 = vector.load %arg9[%c48, %c0_25] : memref<80x256xf32, #tpu.memory_space<vmem>>, vector<8x256xf32>
    tpu.vector_store %arg9[%c48, %c0_25], %34 {strides = array<i32>} : memref<80x256xf32, #tpu.memory_space<vmem>>, vector<8x256xf32>,
    %c240_i32 = arith.constant 240 : i32
    %36 = tpu.dynamic_rotate %2 by %c240_i32 dim 1 : vector<8x256xf32>, i32 -> vector<8x256xf32>
    %c7 = arith.constant 7 : index
    %c0_26 = arith.constant 0 : index
    %c0_27 = arith.constant 0 : index
    %37 = vector.load %arg2[%c7, %c0_26, %c0_27] : memref<9x8x256xf32, #tpu.memory_space<vmem>>, vector<1x8x256xf32>
    %38 = vector.shape_cast %37 : vector<1x8x256xf32> to vector<8x256xf32>
    %39 = arith.mulf %36, %38 : vector<8x256xf32>
    %c56 = arith.constant 56 : index
    %c0_28 = arith.constant 0 : index
    %40 = vector.load %arg9[%c56, %c0_28] : memref<80x256xf32, #tpu.memory_space<vmem>>, vector<8x256xf32>
    tpu.vector_store %arg9[%c56, %c0_28], %39 {strides = array<i32>} : memref<80x256xf32, #tpu.memory_space<vmem>>, vector<8x256xf32>,
    %c239_i32 = arith.constant 239 : i32
    %41 = tpu.dynamic_rotate %2 by %c239_i32 dim 1 : vector<8x256xf32>, i32 -> vector<8x256xf32>
    %c8_29 = arith.constant 8 : index
    %c0_30 = arith.constant 0 : index
    %c0_31 = arith.constant 0 : index
    %42 = vector.load %arg2[%c8_29, %c0_30, %c0_31] : memref<9x8x256xf32, #tpu.memory_space<vmem>>, vector<1x8x256xf32>
    %43 = vector.shape_cast %42 : vector<1x8x256xf32> to vector<8x256xf32>
    %44 = arith.mulf %41, %43 : vector<8x256xf32>
    %c64 = arith.constant 64 : index
    %c0_32 = arith.constant 0 : index
    %45 = vector.load %arg9[%c64, %c0_32] : memref<80x256xf32, #tpu.memory_space<vmem>>, vector<8x256xf32>
    tpu.vector_store %arg9[%c64, %c0_32], %44 {strides = array<i32>} : memref<80x256xf32, #tpu.memory_space<vmem>>, vector<8x256xf32>,
    %c0_33 = arith.constant 0 : index
    %c0_34 = arith.constant 0 : index
    %46 = vector.load %arg9[%c0_33, %c0_34] : memref<80x256xf32, #tpu.memory_space<vmem>>, vector<80x256xf32>
    %cst_35 = arith.constant dense<0.000000e+00> : vector<16x256xf32>
    %47 = tpu.matmul %4, %46, %cst_35 {dimension_numbers = #tpu.dot_dimension_numbers<[1], [0], [0], [1], [0, 0, 1, 1], [], []>} : vector<16x80xf32>, vector<80x256xf32>, vector<16x256xf32> -> vector<16x256xf32>
    %48 = vector.extract_strided_slice %47 {offsets = [0, 0], sizes = [8, 256], strides = [1, 1]} : vector<16x256xf32> to vector<8x256xf32>
    %cst_36 = arith.constant 0.000000e+00 : f32
    %49 = vector.broadcast %cst_36 : f32 to vector<8x256xf32>
    %50 = arith.maximumf %48, %49 : vector<8x256xf32>
    %c1_37 = arith.constant 1 : index
    %c0_38 = arith.constant 0 : index
    %c0_39 = arith.constant 0 : index
    %51 = vector.load %arg1[%c1_37, %c0_38, %c0_39] : memref<12x16x80xf32, #tpu.memory_space<vmem>>, vector<1x16x80xf32>
    %52 = vector.shape_cast %51 : vector<1x16x80xf32> to vector<16x80xf32>
    %c17_i32_40 = arith.constant 17 : i32
    %53 = tpu.dynamic_rotate %50 by %c17_i32_40 dim 1 : vector<8x256xf32>, i32 -> vector<8x256xf32>
    %c0_41 = arith.constant 0 : index
    %c0_42 = arith.constant 0 : index
    %c0_43 = arith.constant 0 : index
    %54 = vector.load %arg2[%c0_41, %c0_42, %c0_43] : memref<9x8x256xf32, #tpu.memory_space<vmem>>, vector<1x8x256xf32>
    %55 = vector.shape_cast %54 : vector<1x8x256xf32> to vector<8x256xf32>
    %56 = arith.mulf %53, %55 : vector<8x256xf32>
    %c0_44 = arith.constant 0 : index
    %c0_45 = arith.constant 0 : index
    %57 = vector.load %arg9[%c0_44, %c0_45] : memref<80x256xf32, #tpu.memory_space<vmem>>, vector<8x256xf32>
    tpu.vector_store %arg9[%c0_44, %c0_45], %56 {strides = array<i32>} : memref<80x256xf32, #tpu.memory_space<vmem>>, vector<8x256xf32>,
    %c16_i32_46 = arith.constant 16 : i32
    %58 = tpu.dynamic_rotate %50 by %c16_i32_46 dim 1 : vector<8x256xf32>, i32 -> vector<8x256xf32>
    %c1_47 = arith.constant 1 : index
    %c0_48 = arith.constant 0 : index
    %c0_49 = arith.constant 0 : index
    %59 = vector.load %arg2[%c1_47, %c0_48, %c0_49] : memref<9x8x256xf32, #tpu.memory_space<vmem>>, vector<1x8x256xf32>
    %60 = vector.shape_cast %59 : vector<1x8x256xf32> to vector<8x256xf32>
    %61 = arith.mulf %58, %60 : vector<8x256xf32>
    %c8_50 = arith.constant 8 : index
    %c0_51 = arith.constant 0 : index
    %62 = vector.load %arg9[%c8_50, %c0_51] : memref<80x256xf32, #tpu.memory_space<vmem>>, vector<8x256xf32>
    tpu.vector_store %arg9[%c8_50, %c0_51], %61 {strides = array<i32>} : memref<80x256xf32, #tpu.memory_space<vmem>>, vector<8x256xf32>,
    %c15_i32_52 = arith.constant 15 : i32
    %63 = tpu.dynamic_rotate %50 by %c15_i32_52 dim 1 : vector<8x256xf32>, i32 -> vector<8x256xf32>
    %c2_53 = arith.constant 2 : index
    %c0_54 = arith.constant 0 : index
    %c0_55 = arith.constant 0 : index
    %64 = vector.load %arg2[%c2_53, %c0_54, %c0_55] : memref<9x8x256xf32, #tpu.memory_space<vmem>>, vector<1x8x256xf32>
    %65 = vector.shape_cast %64 : vector<1x8x256xf32> to vector<8x256xf32>
    %66 = arith.mulf %63, %65 : vector<8x256xf32>
    %c16_56 = arith.constant 16 : index
    %c0_57 = arith.constant 0 : index
    %67 = vector.load %arg9[%c16_56, %c0_57] : memref<80x256xf32, #tpu.memory_space<vmem>>, vector<8x256xf32>
    tpu.vector_store %arg9[%c16_56, %c0_57], %66 {strides = array<i32>} : memref<80x256xf32, #tpu.memory_space<vmem>>, vector<8x256xf32>,
    %c1_i32_58 = arith.constant 1 : i32
    %68 = tpu.dynamic_rotate %50 by %c1_i32_58 dim 1 : vector<8x256xf32>, i32 -> vector<8x256xf32>
    %c3_59 = arith.constant 3 : index
    %c0_60 = arith.constant 0 : index
    %c0_61 = arith.constant 0 : index
    %69 = vector.load %arg2[%c3_59, %c0_60, %c0_61] : memref<9x8x256xf32, #tpu.memory_space<vmem>>, vector<1x8x256xf32>
    %70 = vector.shape_cast %69 : vector<1x8x256xf32> to vector<8x256xf32>
    %71 = arith.mulf %68, %70 : vector<8x256xf32>
    %c24_62 = arith.constant 24 : index
    %c0_63 = arith.constant 0 : index
    %72 = vector.load %arg9[%c24_62, %c0_63] : memref<80x256xf32, #tpu.memory_space<vmem>>, vector<8x256xf32>
    tpu.vector_store %arg9[%c24_62, %c0_63], %71 {strides = array<i32>} : memref<80x256xf32, #tpu.memory_space<vmem>>, vector<8x256xf32>,
    %c32_64 = arith.constant 32 : index
    %c0_65 = arith.constant 0 : index
    %73 = vector.load %arg9[%c32_64, %c0_65] : memref<80x256xf32, #tpu.memory_space<vmem>>, vector<8x256xf32>
    tpu.vector_store %arg9[%c32_64, %c0_65], %50 {strides = array<i32>} : memref<80x256xf32, #tpu.memory_space<vmem>>, vector<8x256xf32>,
    %c255_i32_66 = arith.constant 255 : i32
    %74 = tpu.dynamic_rotate %50 by %c255_i32_66 dim 1 : vector<8x256xf32>, i32 -> vector<8x256xf32>
    %c5_67 = arith.constant 5 : index
    %c0_68 = arith.constant 0 : index
    %c0_69 = arith.constant 0 : index
    %75 = vector.load %arg2[%c5_67, %c0_68, %c0_69] : memref<9x8x256xf32, #tpu.memory_space<vmem>>, vector<1x8x256xf32>
    %76 = vector.shape_cast %75 : vector<1x8x256xf32> to vector<8x256xf32>
    %77 = arith.mulf %74, %76 : vector<8x256xf32>
    %c40_70 = arith.constant 40 : index
    %c0_71 = arith.constant 0 : index
    %78 = vector.load %arg9[%c40_70, %c0_71] : memref<80x256xf32, #tpu.memory_space<vmem>>, vector<8x256xf32>
    tpu.vector_store %arg9[%c40_70, %c0_71], %77 {strides = array<i32>} : memref<80x256xf32, #tpu.memory_space<vmem>>, vector<8x256xf32>,
    %c241_i32_72 = arith.constant 241 : i32
    %79 = tpu.dynamic_rotate %50 by %c241_i32_72 dim 1 : vector<8x256xf32>, i32 -> vector<8x256xf32>
    %c6_73 = arith.constant 6 : index
    %c0_74 = arith.constant 0 : index
    %c0_75 = arith.constant 0 : index
    %80 = vector.load %arg2[%c6_73, %c0_74, %c0_75] : memref<9x8x256xf32, #tpu.memory_space<vmem>>, vector<1x8x256xf32>
    %81 = vector.shape_cast %80 : vector<1x8x256xf32> to vector<8x256xf32>
    %82 = arith.mulf %79, %81 : vector<8x256xf32>
    %c48_76 = arith.constant 48 : index
    %c0_77 = arith.constant 0 : index
    %83 = vector.load %arg9[%c48_76, %c0_77] : memref<80x256xf32, #tpu.memory_space<vmem>>, vector<8x256xf32>
    tpu.vector_store %arg9[%c48_76, %c0_77], %82 {strides = array<i32>} : memref<80x256xf32, #tpu.memory_space<vmem>>, vector<8x256xf32>,
    %c240_i32_78 = arith.constant 240 : i32
    %84 = tpu.dynamic_rotate %50 by %c240_i32_78 dim 1 : vector<8x256xf32>, i32 -> vector<8x256xf32>
    %c7_79 = arith.constant 7 : index
    %c0_80 = arith.constant 0 : index
    %c0_81 = arith.constant 0 : index
    %85 = vector.load %arg2[%c7_79, %c0_80, %c0_81] : memref<9x8x256xf32, #tpu.memory_space<vmem>>, vector<1x8x256xf32>
    %86 = vector.shape_cast %85 : vector<1x8x256xf32> to vector<8x256xf32>
    %87 = arith.mulf %84, %86 : vector<8x256xf32>
    %c56_82 = arith.constant 56 : index
    %c0_83 = arith.constant 0 : index
    %88 = vector.load %arg9[%c56_82, %c0_83] : memref<80x256xf32, #tpu.memory_space<vmem>>, vector<8x256xf32>
    tpu.vector_store %arg9[%c56_82, %c0_83], %87 {strides = array<i32>} : memref<80x256xf32, #tpu.memory_space<vmem>>, vector<8x256xf32>,
    %c239_i32_84 = arith.constant 239 : i32
    %89 = tpu.dynamic_rotate %50 by %c239_i32_84 dim 1 : vector<8x256xf32>, i32 -> vector<8x256xf32>
    %c8_85 = arith.constant 8 : index
    %c0_86 = arith.constant 0 : index
    %c0_87 = arith.constant 0 : index
    %90 = vector.load %arg2[%c8_85, %c0_86, %c0_87] : memref<9x8x256xf32, #tpu.memory_space<vmem>>, vector<1x8x256xf32>
    %91 = vector.shape_cast %90 : vector<1x8x256xf32> to vector<8x256xf32>
    %92 = arith.mulf %89, %91 : vector<8x256xf32>
    %c64_88 = arith.constant 64 : index
    %c0_89 = arith.constant 0 : index
    %93 = vector.load %arg9[%c64_88, %c0_89] : memref<80x256xf32, #tpu.memory_space<vmem>>, vector<8x256xf32>
    tpu.vector_store %arg9[%c64_88, %c0_89], %92 {strides = array<i32>} : memref<80x256xf32, #tpu.memory_space<vmem>>, vector<8x256xf32>,
    %c0_90 = arith.constant 0 : index
    %c0_91 = arith.constant 0 : index
    %94 = vector.load %arg9[%c0_90, %c0_91] : memref<80x256xf32, #tpu.memory_space<vmem>>, vector<80x256xf32>
    %cst_92 = arith.constant dense<0.000000e+00> : vector<16x256xf32>
    %95 = tpu.matmul %52, %94, %cst_92 {dimension_numbers = #tpu.dot_dimension_numbers<[1], [0], [0], [1], [0, 0, 1, 1], [], []>} : vector<16x80xf32>, vector<80x256xf32>, vector<16x256xf32> -> vector<16x256xf32>
    %96 = vector.extract_strided_slice %95 {offsets = [0, 0], sizes = [8, 256], strides = [1, 1]} : vector<16x256xf32> to vector<8x256xf32>
    %97 = arith.addf %96, %2 : vector<8x256xf32>
    %cst_93 = arith.constant 0.000000e+00 : f32
    %98 = vector.broadcast %cst_93 : f32 to vector<8x256xf32>
    %99 = arith.maximumf %97, %98 : vector<8x256xf32>
    %c2_94 = arith.constant 2 : index
    %c0_95 = arith.constant 0 : index
    %c0_96 = arith.constant 0 : index
    %100 = vector.load %arg1[%c2_94, %c0_95, %c0_96] : memref<12x16x80xf32, #tpu.memory_space<vmem>>, vector<1x16x80xf32>
    %101 = vector.shape_cast %100 : vector<1x16x80xf32> to vector<16x80xf32>
    %c17_i32_97 = arith.constant 17 : i32
    %102 = tpu.dynamic_rotate %99 by %c17_i32_97 dim 1 : vector<8x256xf32>, i32 -> vector<8x256xf32>
    %c0_98 = arith.constant 0 : index
    %c0_99 = arith.constant 0 : index
    %c0_100 = arith.constant 0 : index
    %103 = vector.load %arg2[%c0_98, %c0_99, %c0_100] : memref<9x8x256xf32, #tpu.memory_space<vmem>>, vector<1x8x256xf32>
    %104 = vector.shape_cast %103 : vector<1x8x256xf32> to vector<8x256xf32>
    %105 = arith.mulf %102, %104 : vector<8x256xf32>
    %c0_101 = arith.constant 0 : index
    %c0_102 = arith.constant 0 : index
    %106 = vector.load %arg9[%c0_101, %c0_102] : memref<80x256xf32, #tpu.memory_space<vmem>>, vector<8x256xf32>
    tpu.vector_store %arg9[%c0_101, %c0_102], %105 {strides = array<i32>} : memref<80x256xf32, #tpu.memory_space<vmem>>, vector<8x256xf32>,
    %c16_i32_103 = arith.constant 16 : i32
    %107 = tpu.dynamic_rotate %99 by %c16_i32_103 dim 1 : vector<8x256xf32>, i32 -> vector<8x256xf32>
    %c1_104 = arith.constant 1 : index
    %c0_105 = arith.constant 0 : index
    %c0_106 = arith.constant 0 : index
    %108 = vector.load %arg2[%c1_104, %c0_105, %c0_106] : memref<9x8x256xf32, #tpu.memory_space<vmem>>, vector<1x8x256xf32>
    %109 = vector.shape_cast %108 : vector<1x8x256xf32> to vector<8x256xf32>
    %110 = arith.mulf %107, %109 : vector<8x256xf32>
    %c8_107 = arith.constant 8 : index
    %c0_108 = arith.constant 0 : index
    %111 = vector.load %arg9[%c8_107, %c0_108] : memref<80x256xf32, #tpu.memory_space<vmem>>, vector<8x256xf32>
    tpu.vector_store %arg9[%c8_107, %c0_108], %110 {strides = array<i32>} : memref<80x256xf32, #tpu.memory_space<vmem>>, vector<8x256xf32>,
    %c15_i32_109 = arith.constant 15 : i32
    %112 = tpu.dynamic_rotate %99 by %c15_i32_109 dim 1 : vector<8x256xf32>, i32 -> vector<8x256xf32>
    %c2_110 = arith.constant 2 : index
    %c0_111 = arith.constant 0 : index
    %c0_112 = arith.constant 0 : index
    %113 = vector.load %arg2[%c2_110, %c0_111, %c0_112] : memref<9x8x256xf32, #tpu.memory_space<vmem>>, vector<1x8x256xf32>
    %114 = vector.shape_cast %113 : vector<1x8x256xf32> to vector<8x256xf32>
    %115 = arith.mulf %112, %114 : vector<8x256xf32>
    %c16_113 = arith.constant 16 : index
    %c0_114 = arith.constant 0 : index
    %116 = vector.load %arg9[%c16_113, %c0_114] : memref<80x256xf32, #tpu.memory_space<vmem>>, vector<8x256xf32>
    tpu.vector_store %arg9[%c16_113, %c0_114], %115 {strides = array<i32>} : memref<80x256xf32, #tpu.memory_space<vmem>>, vector<8x256xf32>,
    %c1_i32_115 = arith.constant 1 : i32
    %117 = tpu.dynamic_rotate %99 by %c1_i32_115 dim 1 : vector<8x256xf32>, i32 -> vector<8x256xf32>
    %c3_116 = arith.constant 3 : index
    %c0_117 = arith.constant 0 : index
    %c0_118 = arith.constant 0 : index
    %118 = vector.load %arg2[%c3_116, %c0_117, %c0_118] : memref<9x8x256xf32, #tpu.memory_space<vmem>>, vector<1x8x256xf32>
    %119 = vector.shape_cast %118 : vector<1x8x256xf32> to vector<8x256xf32>
    %120 = arith.mulf %117, %119 : vector<8x256xf32>
    %c24_119 = arith.constant 24 : index
    %c0_120 = arith.constant 0 : index
    %121 = vector.load %arg9[%c24_119, %c0_120] : memref<80x256xf32, #tpu.memory_space<vmem>>, vector<8x256xf32>
    tpu.vector_store %arg9[%c24_119, %c0_120], %120 {strides = array<i32>} : memref<80x256xf32, #tpu.memory_space<vmem>>, vector<8x256xf32>,
    %c32_121 = arith.constant 32 : index
    %c0_122 = arith.constant 0 : index
    %122 = vector.load %arg9[%c32_121, %c0_122] : memref<80x256xf32, #tpu.memory_space<vmem>>, vector<8x256xf32>
    tpu.vector_store %arg9[%c32_121, %c0_122], %99 {strides = array<i32>} : memref<80x256xf32, #tpu.memory_space<vmem>>, vector<8x256xf32>,
    %c255_i32_123 = arith.constant 255 : i32
    %123 = tpu.dynamic_rotate %99 by %c255_i32_123 dim 1 : vector<8x256xf32>, i32 -> vector<8x256xf32>
    %c5_124 = arith.constant 5 : index
    %c0_125 = arith.constant 0 : index
    %c0_126 = arith.constant 0 : index
    %124 = vector.load %arg2[%c5_124, %c0_125, %c0_126] : memref<9x8x256xf32, #tpu.memory_space<vmem>>, vector<1x8x256xf32>
    %125 = vector.shape_cast %124 : vector<1x8x256xf32> to vector<8x256xf32>
    %126 = arith.mulf %123, %125 : vector<8x256xf32>
    %c40_127 = arith.constant 40 : index
    %c0_128 = arith.constant 0 : index
    %127 = vector.load %arg9[%c40_127, %c0_128] : memref<80x256xf32, #tpu.memory_space<vmem>>, vector<8x256xf32>
    tpu.vector_store %arg9[%c40_127, %c0_128], %126 {strides = array<i32>} : memref<80x256xf32, #tpu.memory_space<vmem>>, vector<8x256xf32>,
    %c241_i32_129 = arith.constant 241 : i32
    %128 = tpu.dynamic_rotate %99 by %c241_i32_129 dim 1 : vector<8x256xf32>, i32 -> vector<8x256xf32>
    %c6_130 = arith.constant 6 : index
    %c0_131 = arith.constant 0 : index
    %c0_132 = arith.constant 0 : index
    %129 = vector.load %arg2[%c6_130, %c0_131, %c0_132] : memref<9x8x256xf32, #tpu.memory_space<vmem>>, vector<1x8x256xf32>
    %130 = vector.shape_cast %129 : vector<1x8x256xf32> to vector<8x256xf32>
    %131 = arith.mulf %128, %130 : vector<8x256xf32>
    %c48_133 = arith.constant 48 : index
    %c0_134 = arith.constant 0 : index
    %132 = vector.load %arg9[%c48_133, %c0_134] : memref<80x256xf32, #tpu.memory_space<vmem>>, vector<8x256xf32>
    tpu.vector_store %arg9[%c48_133, %c0_134], %131 {strides = array<i32>} : memref<80x256xf32, #tpu.memory_space<vmem>>, vector<8x256xf32>,
    %c240_i32_135 = arith.constant 240 : i32
    %133 = tpu.dynamic_rotate %99 by %c240_i32_135 dim 1 : vector<8x256xf32>, i32 -> vector<8x256xf32>
    %c7_136 = arith.constant 7 : index
    %c0_137 = arith.constant 0 : index
    %c0_138 = arith.constant 0 : index
    %134 = vector.load %arg2[%c7_136, %c0_137, %c0_138] : memref<9x8x256xf32, #tpu.memory_space<vmem>>, vector<1x8x256xf32>
    %135 = vector.shape_cast %134 : vector<1x8x256xf32> to vector<8x256xf32>
    %136 = arith.mulf %133, %135 : vector<8x256xf32>
    %c56_139 = arith.constant 56 : index
    %c0_140 = arith.constant 0 : index
    %137 = vector.load %arg9[%c56_139, %c0_140] : memref<80x256xf32, #tpu.memory_space<vmem>>, vector<8x256xf32>
    tpu.vector_store %arg9[%c56_139, %c0_140], %136 {strides = array<i32>} : memref<80x256xf32, #tpu.memory_space<vmem>>, vector<8x256xf32>,
    %c239_i32_141 = arith.constant 239 : i32
    %138 = tpu.dynamic_rotate %99 by %c239_i32_141 dim 1 : vector<8x256xf32>, i32 -> vector<8x256xf32>
    %c8_142 = arith.constant 8 : index
    %c0_143 = arith.constant 0 : index
    %c0_144 = arith.constant 0 : index
    %139 = vector.load %arg2[%c8_142, %c0_143, %c0_144] : memref<9x8x256xf32, #tpu.memory_space<vmem>>, vector<1x8x256xf32>
    %140 = vector.shape_cast %139 : vector<1x8x256xf32> to vector<8x256xf32>
    %141 = arith.mulf %138, %140 : vector<8x256xf32>
    %c64_145 = arith.constant 64 : index
    %c0_146 = arith.constant 0 : index
    %142 = vector.load %arg9[%c64_145, %c0_146] : memref<80x256xf32, #tpu.memory_space<vmem>>, vector<8x256xf32>
    tpu.vector_store %arg9[%c64_145, %c0_146], %141 {strides = array<i32>} : memref<80x256xf32, #tpu.memory_space<vmem>>, vector<8x256xf32>,
    %c0_147 = arith.constant 0 : index
    %c0_148 = arith.constant 0 : index
    %143 = vector.load %arg9[%c0_147, %c0_148] : memref<80x256xf32, #tpu.memory_space<vmem>>, vector<80x256xf32>
    %cst_149 = arith.constant dense<0.000000e+00> : vector<16x256xf32>
    %144 = tpu.matmul %101, %143, %cst_149 {dimension_numbers = #tpu.dot_dimension_numbers<[1], [0], [0], [1], [0, 0, 1, 1], [], []>} : vector<16x80xf32>, vector<80x256xf32>, vector<16x256xf32> -> vector<16x256xf32>
    %145 = vector.extract_strided_slice %144 {offsets = [0, 0], sizes = [8, 256], strides = [1, 1]} : vector<16x256xf32> to vector<8x256xf32>
    %cst_150 = arith.constant 0.000000e+00 : f32
    %146 = vector.broadcast %cst_150 : f32 to vector<8x256xf32>
    %147 = arith.maximumf %145, %146 : vector<8x256xf32>
    %c3_151 = arith.constant 3 : index
    %c0_152 = arith.constant 0 : index
    %c0_153 = arith.constant 0 : index
    %148 = vector.load %arg1[%c3_151, %c0_152, %c0_153] : memref<12x16x80xf32, #tpu.memory_space<vmem>>, vector<1x16x80xf32>
    %149 = vector.shape_cast %148 : vector<1x16x80xf32> to vector<16x80xf32>
    %c17_i32_154 = arith.constant 17 : i32
    %150 = tpu.dynamic_rotate %147 by %c17_i32_154 dim 1 : vector<8x256xf32>, i32 -> vector<8x256xf32>
    %c0_155 = arith.constant 0 : index
    %c0_156 = arith.constant 0 : index
    %c0_157 = arith.constant 0 : index
    %151 = vector.load %arg2[%c0_155, %c0_156, %c0_157] : memref<9x8x256xf32, #tpu.memory_space<vmem>>, vector<1x8x256xf32>
    %152 = vector.shape_cast %151 : vector<1x8x256xf32> to vector<8x256xf32>
    %153 = arith.mulf %150, %152 : vector<8x256xf32>
    %c0_158 = arith.constant 0 : index
    %c0_159 = arith.constant 0 : index
    %154 = vector.load %arg9[%c0_158, %c0_159] : memref<80x256xf32, #tpu.memory_space<vmem>>, vector<8x256xf32>
    tpu.vector_store %arg9[%c0_158, %c0_159], %153 {strides = array<i32>} : memref<80x256xf32, #tpu.memory_space<vmem>>, vector<8x256xf32>,
    %c16_i32_160 = arith.constant 16 : i32
    %155 = tpu.dynamic_rotate %147 by %c16_i32_160 dim 1 : vector<8x256xf32>, i32 -> vector<8x256xf32>
    %c1_161 = arith.constant 1 : index
    %c0_162 = arith.constant 0 : index
    %c0_163 = arith.constant 0 : index
    %156 = vector.load %arg2[%c1_161, %c0_162, %c0_163] : memref<9x8x256xf32, #tpu.memory_space<vmem>>, vector<1x8x256xf32>
    %157 = vector.shape_cast %156 : vector<1x8x256xf32> to vector<8x256xf32>
    %158 = arith.mulf %155, %157 : vector<8x256xf32>
    %c8_164 = arith.constant 8 : index
    %c0_165 = arith.constant 0 : index
    %159 = vector.load %arg9[%c8_164, %c0_165] : memref<80x256xf32, #tpu.memory_space<vmem>>, vector<8x256xf32>
    tpu.vector_store %arg9[%c8_164, %c0_165], %158 {strides = array<i32>} : memref<80x256xf32, #tpu.memory_space<vmem>>, vector<8x256xf32>,
    %c15_i32_166 = arith.constant 15 : i32
    %160 = tpu.dynamic_rotate %147 by %c15_i32_166 dim 1 : vector<8x256xf32>, i32 -> vector<8x256xf32>
    %c2_167 = arith.constant 2 : index
    %c0_168 = arith.constant 0 : index
    %c0_169 = arith.constant 0 : index
    %161 = vector.load %arg2[%c2_167, %c0_168, %c0_169] : memref<9x8x256xf32, #tpu.memory_space<vmem>>, vector<1x8x256xf32>
    %162 = vector.shape_cast %161 : vector<1x8x256xf32> to vector<8x256xf32>
    %163 = arith.mulf %160, %162 : vector<8x256xf32>
    %c16_170 = arith.constant 16 : index
    %c0_171 = arith.constant 0 : index
    %164 = vector.load %arg9[%c16_170, %c0_171] : memref<80x256xf32, #tpu.memory_space<vmem>>, vector<8x256xf32>
    tpu.vector_store %arg9[%c16_170, %c0_171], %163 {strides = array<i32>} : memref<80x256xf32, #tpu.memory_space<vmem>>, vector<8x256xf32>,
    %c1_i32_172 = arith.constant 1 : i32
    %165 = tpu.dynamic_rotate %147 by %c1_i32_172 dim 1 : vector<8x256xf32>, i32 -> vector<8x256xf32>
    %c3_173 = arith.constant 3 : index
    %c0_174 = arith.constant 0 : index
    %c0_175 = arith.constant 0 : index
    %166 = vector.load %arg2[%c3_173, %c0_174, %c0_175] : memref<9x8x256xf32, #tpu.memory_space<vmem>>, vector<1x8x256xf32>
    %167 = vector.shape_cast %166 : vector<1x8x256xf32> to vector<8x256xf32>
    %168 = arith.mulf %165, %167 : vector<8x256xf32>
    %c24_176 = arith.constant 24 : index
    %c0_177 = arith.constant 0 : index
    %169 = vector.load %arg9[%c24_176, %c0_177] : memref<80x256xf32, #tpu.memory_space<vmem>>, vector<8x256xf32>
    tpu.vector_store %arg9[%c24_176, %c0_177], %168 {strides = array<i32>} : memref<80x256xf32, #tpu.memory_space<vmem>>, vector<8x256xf32>,
    %c32_178 = arith.constant 32 : index
    %c0_179 = arith.constant 0 : index
    %170 = vector.load %arg9[%c32_178, %c0_179] : memref<80x256xf32, #tpu.memory_space<vmem>>, vector<8x256xf32>
    tpu.vector_store %arg9[%c32_178, %c0_179], %147 {strides = array<i32>} : memref<80x256xf32, #tpu.memory_space<vmem>>, vector<8x256xf32>,
    %c255_i32_180 = arith.constant 255 : i32
    %171 = tpu.dynamic_rotate %147 by %c255_i32_180 dim 1 : vector<8x256xf32>, i32 -> vector<8x256xf32>
    %c5_181 = arith.constant 5 : index
    %c0_182 = arith.constant 0 : index
    %c0_183 = arith.constant 0 : index
    %172 = vector.load %arg2[%c5_181, %c0_182, %c0_183] : memref<9x8x256xf32, #tpu.memory_space<vmem>>, vector<1x8x256xf32>
    %173 = vector.shape_cast %172 : vector<1x8x256xf32> to vector<8x256xf32>
    %174 = arith.mulf %171, %173 : vector<8x256xf32>
    %c40_184 = arith.constant 40 : index
    %c0_185 = arith.constant 0 : index
    %175 = vector.load %arg9[%c40_184, %c0_185] : memref<80x256xf32, #tpu.memory_space<vmem>>, vector<8x256xf32>
    tpu.vector_store %arg9[%c40_184, %c0_185], %174 {strides = array<i32>} : memref<80x256xf32, #tpu.memory_space<vmem>>, vector<8x256xf32>,
    %c241_i32_186 = arith.constant 241 : i32
    %176 = tpu.dynamic_rotate %147 by %c241_i32_186 dim 1 : vector<8x256xf32>, i32 -> vector<8x256xf32>
    %c6_187 = arith.constant 6 : index
    %c0_188 = arith.constant 0 : index
    %c0_189 = arith.constant 0 : index
    %177 = vector.load %arg2[%c6_187, %c0_188, %c0_189] : memref<9x8x256xf32, #tpu.memory_space<vmem>>, vector<1x8x256xf32>
    %178 = vector.shape_cast %177 : vector<1x8x256xf32> to vector<8x256xf32>
    %179 = arith.mulf %176, %178 : vector<8x256xf32>
    %c48_190 = arith.constant 48 : index
    %c0_191 = arith.constant 0 : index
    %180 = vector.load %arg9[%c48_190, %c0_191] : memref<80x256xf32, #tpu.memory_space<vmem>>, vector<8x256xf32>
    tpu.vector_store %arg9[%c48_190, %c0_191], %179 {strides = array<i32>} : memref<80x256xf32, #tpu.memory_space<vmem>>, vector<8x256xf32>,
    %c240_i32_192 = arith.constant 240 : i32
    %181 = tpu.dynamic_rotate %147 by %c240_i32_192 dim 1 : vector<8x256xf32>, i32 -> vector<8x256xf32>
    %c7_193 = arith.constant 7 : index
    %c0_194 = arith.constant 0 : index
    %c0_195 = arith.constant 0 : index
    %182 = vector.load %arg2[%c7_193, %c0_194, %c0_195] : memref<9x8x256xf32, #tpu.memory_space<vmem>>, vector<1x8x256xf32>
    %183 = vector.shape_cast %182 : vector<1x8x256xf32> to vector<8x256xf32>
    %184 = arith.mulf %181, %183 : vector<8x256xf32>
    %c56_196 = arith.constant 56 : index
    %c0_197 = arith.constant 0 : index
    %185 = vector.load %arg9[%c56_196, %c0_197] : memref<80x256xf32, #tpu.memory_space<vmem>>, vector<8x256xf32>
    tpu.vector_store %arg9[%c56_196, %c0_197], %184 {strides = array<i32>} : memref<80x256xf32, #tpu.memory_space<vmem>>, vector<8x256xf32>,
    %c239_i32_198 = arith.constant 239 : i32
    %186 = tpu.dynamic_rotate %147 by %c239_i32_198 dim 1 : vector<8x256xf32>, i32 -> vector<8x256xf32>
    %c8_199 = arith.constant 8 : index
    %c0_200 = arith.constant 0 : index
    %c0_201 = arith.constant 0 : index
    %187 = vector.load %arg2[%c8_199, %c0_200, %c0_201] : memref<9x8x256xf32, #tpu.memory_space<vmem>>, vector<1x8x256xf32>
    %188 = vector.shape_cast %187 : vector<1x8x256xf32> to vector<8x256xf32>
    %189 = arith.mulf %186, %188 : vector<8x256xf32>
    %c64_202 = arith.constant 64 : index
    %c0_203 = arith.constant 0 : index
    %190 = vector.load %arg9[%c64_202, %c0_203] : memref<80x256xf32, #tpu.memory_space<vmem>>, vector<8x256xf32>
    tpu.vector_store %arg9[%c64_202, %c0_203], %189 {strides = array<i32>} : memref<80x256xf32, #tpu.memory_space<vmem>>, vector<8x256xf32>,
    %c0_204 = arith.constant 0 : index
    %c0_205 = arith.constant 0 : index
    %191 = vector.load %arg9[%c0_204, %c0_205] : memref<80x256xf32, #tpu.memory_space<vmem>>, vector<80x256xf32>
    %cst_206 = arith.constant dense<0.000000e+00> : vector<16x256xf32>
    %192 = tpu.matmul %149, %191, %cst_206 {dimension_numbers = #tpu.dot_dimension_numbers<[1], [0], [0], [1], [0, 0, 1, 1], [], []>} : vector<16x80xf32>, vector<80x256xf32>, vector<16x256xf32> -> vector<16x256xf32>
    %193 = vector.extract_strided_slice %192 {offsets = [0, 0], sizes = [8, 256], strides = [1, 1]} : vector<16x256xf32> to vector<8x256xf32>
    %194 = arith.addf %193, %99 : vector<8x256xf32>
    %cst_207 = arith.constant 0.000000e+00 : f32
    %195 = vector.broadcast %cst_207 : f32 to vector<8x256xf32>
    %196 = arith.maximumf %194, %195 : vector<8x256xf32>
    %c4 = arith.constant 4 : index
    %c0_208 = arith.constant 0 : index
    %c0_209 = arith.constant 0 : index
    %197 = vector.load %arg1[%c4, %c0_208, %c0_209] : memref<12x16x80xf32, #tpu.memory_space<vmem>>, vector<1x16x80xf32>
    %198 = vector.shape_cast %197 : vector<1x16x80xf32> to vector<16x80xf32>
    %c17_i32_210 = arith.constant 17 : i32
    %199 = tpu.dynamic_rotate %196 by %c17_i32_210 dim 1 : vector<8x256xf32>, i32 -> vector<8x256xf32>
    %c0_211 = arith.constant 0 : index
    %c0_212 = arith.constant 0 : index
    %c0_213 = arith.constant 0 : index
    %200 = vector.load %arg2[%c0_211, %c0_212, %c0_213] : memref<9x8x256xf32, #tpu.memory_space<vmem>>, vector<1x8x256xf32>
    %201 = vector.shape_cast %200 : vector<1x8x256xf32> to vector<8x256xf32>
    %202 = arith.mulf %199, %201 : vector<8x256xf32>
    %c0_214 = arith.constant 0 : index
    %c0_215 = arith.constant 0 : index
    %203 = vector.load %arg9[%c0_214, %c0_215] : memref<80x256xf32, #tpu.memory_space<vmem>>, vector<8x256xf32>
    tpu.vector_store %arg9[%c0_214, %c0_215], %202 {strides = array<i32>} : memref<80x256xf32, #tpu.memory_space<vmem>>, vector<8x256xf32>,
    %c16_i32_216 = arith.constant 16 : i32
    %204 = tpu.dynamic_rotate %196 by %c16_i32_216 dim 1 : vector<8x256xf32>, i32 -> vector<8x256xf32>
    %c1_217 = arith.constant 1 : index
    %c0_218 = arith.constant 0 : index
    %c0_219 = arith.constant 0 : index
    %205 = vector.load %arg2[%c1_217, %c0_218, %c0_219] : memref<9x8x256xf32, #tpu.memory_space<vmem>>, vector<1x8x256xf32>
    %206 = vector.shape_cast %205 : vector<1x8x256xf32> to vector<8x256xf32>
    %207 = arith.mulf %204, %206 : vector<8x256xf32>
    %c8_220 = arith.constant 8 : index
    %c0_221 = arith.constant 0 : index
    %208 = vector.load %arg9[%c8_220, %c0_221] : memref<80x256xf32, #tpu.memory_space<vmem>>, vector<8x256xf32>
    tpu.vector_store %arg9[%c8_220, %c0_221], %207 {strides = array<i32>} : memref<80x256xf32, #tpu.memory_space<vmem>>, vector<8x256xf32>,
    %c15_i32_222 = arith.constant 15 : i32
    %209 = tpu.dynamic_rotate %196 by %c15_i32_222 dim 1 : vector<8x256xf32>, i32 -> vector<8x256xf32>
    %c2_223 = arith.constant 2 : index
    %c0_224 = arith.constant 0 : index
    %c0_225 = arith.constant 0 : index
    %210 = vector.load %arg2[%c2_223, %c0_224, %c0_225] : memref<9x8x256xf32, #tpu.memory_space<vmem>>, vector<1x8x256xf32>
    %211 = vector.shape_cast %210 : vector<1x8x256xf32> to vector<8x256xf32>
    %212 = arith.mulf %209, %211 : vector<8x256xf32>
    %c16_226 = arith.constant 16 : index
    %c0_227 = arith.constant 0 : index
    %213 = vector.load %arg9[%c16_226, %c0_227] : memref<80x256xf32, #tpu.memory_space<vmem>>, vector<8x256xf32>
    tpu.vector_store %arg9[%c16_226, %c0_227], %212 {strides = array<i32>} : memref<80x256xf32, #tpu.memory_space<vmem>>, vector<8x256xf32>,
    %c1_i32_228 = arith.constant 1 : i32
    %214 = tpu.dynamic_rotate %196 by %c1_i32_228 dim 1 : vector<8x256xf32>, i32 -> vector<8x256xf32>
    %c3_229 = arith.constant 3 : index
    %c0_230 = arith.constant 0 : index
    %c0_231 = arith.constant 0 : index
    %215 = vector.load %arg2[%c3_229, %c0_230, %c0_231] : memref<9x8x256xf32, #tpu.memory_space<vmem>>, vector<1x8x256xf32>
    %216 = vector.shape_cast %215 : vector<1x8x256xf32> to vector<8x256xf32>
    %217 = arith.mulf %214, %216 : vector<8x256xf32>
    %c24_232 = arith.constant 24 : index
    %c0_233 = arith.constant 0 : index
    %218 = vector.load %arg9[%c24_232, %c0_233] : memref<80x256xf32, #tpu.memory_space<vmem>>, vector<8x256xf32>
    tpu.vector_store %arg9[%c24_232, %c0_233], %217 {strides = array<i32>} : memref<80x256xf32, #tpu.memory_space<vmem>>, vector<8x256xf32>,
    %c32_234 = arith.constant 32 : index
    %c0_235 = arith.constant 0 : index
    %219 = vector.load %arg9[%c32_234, %c0_235] : memref<80x256xf32, #tpu.memory_space<vmem>>, vector<8x256xf32>
    tpu.vector_store %arg9[%c32_234, %c0_235], %196 {strides = array<i32>} : memref<80x256xf32, #tpu.memory_space<vmem>>, vector<8x256xf32>,
    %c255_i32_236 = arith.constant 255 : i32
    %220 = tpu.dynamic_rotate %196 by %c255_i32_236 dim 1 : vector<8x256xf32>, i32 -> vector<8x256xf32>
    %c5_237 = arith.constant 5 : index
    %c0_238 = arith.constant 0 : index
    %c0_239 = arith.constant 0 : index
    %221 = vector.load %arg2[%c5_237, %c0_238, %c0_239] : memref<9x8x256xf32, #tpu.memory_space<vmem>>, vector<1x8x256xf32>
    %222 = vector.shape_cast %221 : vector<1x8x256xf32> to vector<8x256xf32>
    %223 = arith.mulf %220, %222 : vector<8x256xf32>
    %c40_240 = arith.constant 40 : index
    %c0_241 = arith.constant 0 : index
    %224 = vector.load %arg9[%c40_240, %c0_241] : memref<80x256xf32, #tpu.memory_space<vmem>>, vector<8x256xf32>
    tpu.vector_store %arg9[%c40_240, %c0_241], %223 {strides = array<i32>} : memref<80x256xf32, #tpu.memory_space<vmem>>, vector<8x256xf32>,
    %c241_i32_242 = arith.constant 241 : i32
    %225 = tpu.dynamic_rotate %196 by %c241_i32_242 dim 1 : vector<8x256xf32>, i32 -> vector<8x256xf32>
    %c6_243 = arith.constant 6 : index
    %c0_244 = arith.constant 0 : index
    %c0_245 = arith.constant 0 : index
    %226 = vector.load %arg2[%c6_243, %c0_244, %c0_245] : memref<9x8x256xf32, #tpu.memory_space<vmem>>, vector<1x8x256xf32>
    %227 = vector.shape_cast %226 : vector<1x8x256xf32> to vector<8x256xf32>
    %228 = arith.mulf %225, %227 : vector<8x256xf32>
    %c48_246 = arith.constant 48 : index
    %c0_247 = arith.constant 0 : index
    %229 = vector.load %arg9[%c48_246, %c0_247] : memref<80x256xf32, #tpu.memory_space<vmem>>, vector<8x256xf32>
    tpu.vector_store %arg9[%c48_246, %c0_247], %228 {strides = array<i32>} : memref<80x256xf32, #tpu.memory_space<vmem>>, vector<8x256xf32>,
    %c240_i32_248 = arith.constant 240 : i32
    %230 = tpu.dynamic_rotate %196 by %c240_i32_248 dim 1 : vector<8x256xf32>, i32 -> vector<8x256xf32>
    %c7_249 = arith.constant 7 : index
    %c0_250 = arith.constant 0 : index
    %c0_251 = arith.constant 0 : index
    %231 = vector.load %arg2[%c7_249, %c0_250, %c0_251] : memref<9x8x256xf32, #tpu.memory_space<vmem>>, vector<1x8x256xf32>
    %232 = vector.shape_cast %231 : vector<1x8x256xf32> to vector<8x256xf32>
    %233 = arith.mulf %230, %232 : vector<8x256xf32>
    %c56_252 = arith.constant 56 : index
    %c0_253 = arith.constant 0 : index
    %234 = vector.load %arg9[%c56_252, %c0_253] : memref<80x256xf32, #tpu.memory_space<vmem>>, vector<8x256xf32>
    tpu.vector_store %arg9[%c56_252, %c0_253], %233 {strides = array<i32>} : memref<80x256xf32, #tpu.memory_space<vmem>>, vector<8x256xf32>,
    %c239_i32_254 = arith.constant 239 : i32
    %235 = tpu.dynamic_rotate %196 by %c239_i32_254 dim 1 : vector<8x256xf32>, i32 -> vector<8x256xf32>
    %c8_255 = arith.constant 8 : index
    %c0_256 = arith.constant 0 : index
    %c0_257 = arith.constant 0 : index
    %236 = vector.load %arg2[%c8_255, %c0_256, %c0_257] : memref<9x8x256xf32, #tpu.memory_space<vmem>>, vector<1x8x256xf32>
    %237 = vector.shape_cast %236 : vector<1x8x256xf32> to vector<8x256xf32>
    %238 = arith.mulf %235, %237 : vector<8x256xf32>
    %c64_258 = arith.constant 64 : index
    %c0_259 = arith.constant 0 : index
    %239 = vector.load %arg9[%c64_258, %c0_259] : memref<80x256xf32, #tpu.memory_space<vmem>>, vector<8x256xf32>
    tpu.vector_store %arg9[%c64_258, %c0_259], %238 {strides = array<i32>} : memref<80x256xf32, #tpu.memory_space<vmem>>, vector<8x256xf32>,
    %c0_260 = arith.constant 0 : index
    %c0_261 = arith.constant 0 : index
    %240 = vector.load %arg9[%c0_260, %c0_261] : memref<80x256xf32, #tpu.memory_space<vmem>>, vector<80x256xf32>
    %cst_262 = arith.constant dense<0.000000e+00> : vector<16x256xf32>
    %241 = tpu.matmul %198, %240, %cst_262 {dimension_numbers = #tpu.dot_dimension_numbers<[1], [0], [0], [1], [0, 0, 1, 1], [], []>} : vector<16x80xf32>, vector<80x256xf32>, vector<16x256xf32> -> vector<16x256xf32>
    %c0_263 = arith.constant 0 : index
    %c0_264 = arith.constant 0 : index
    %242 = vector.load %arg5[%c0_263, %c0_264] : memref<256x64xf32, #tpu.memory_space<vmem>>, vector<256x64xf32>
    %cst_265 = arith.constant dense<0.000000e+00> : vector<16x64xf32>
    %243 = tpu.matmul %241, %242, %cst_265 {dimension_numbers = #tpu.dot_dimension_numbers<[1], [0], [0], [1], [0, 0, 1, 1], [], []>} : vector<16x256xf32>, vector<256x64xf32>, vector<16x64xf32> -> vector<16x64xf32>
    %244 = vector.extract_strided_slice %243 {offsets = [0, 0], sizes = [8, 64], strides = [1, 1]} : vector<16x64xf32> to vector<8x64xf32>
    %cst_266 = arith.constant 0.000000e+00 : f32
    %245 = vector.broadcast %cst_266 : f32 to vector<8x64xf32>
    %246 = arith.maximumf %244, %245 : vector<8x64xf32>
    %247 = vector.extract_strided_slice %243 {offsets = [8, 0], sizes = [8, 64], strides = [1, 1]} : vector<16x64xf32> to vector<8x64xf32>
    %c5_267 = arith.constant 5 : index
    %c0_268 = arith.constant 0 : index
    %c0_269 = arith.constant 0 : index
    %248 = vector.load %arg1[%c5_267, %c0_268, %c0_269] : memref<12x16x80xf32, #tpu.memory_space<vmem>>, vector<1x16x80xf32>
    %249 = vector.shape_cast %248 : vector<1x16x80xf32> to vector<16x80xf32>
    %c9_i32 = arith.constant 9 : i32
    %250 = tpu.dynamic_rotate %246 by %c9_i32 dim 1 : vector<8x64xf32>, i32 -> vector<8x64xf32>
    %c0_270 = arith.constant 0 : index
    %c0_271 = arith.constant 0 : index
    %c0_272 = arith.constant 0 : index
    %251 = vector.load %arg3[%c0_270, %c0_271, %c0_272] : memref<9x8x64xf32, #tpu.memory_space<vmem>>, vector<1x8x64xf32>
    %252 = vector.shape_cast %251 : vector<1x8x64xf32> to vector<8x64xf32>
    %253 = arith.mulf %250, %252 : vector<8x64xf32>
    %c0_273 = arith.constant 0 : index
    %c0_274 = arith.constant 0 : index
    %254 = vector.load %arg9[%c0_273, %c0_274] : memref<80x256xf32, #tpu.memory_space<vmem>>, vector<8x64xf32>
    tpu.vector_store %arg9[%c0_273, %c0_274], %253 {strides = array<i32>} : memref<80x256xf32, #tpu.memory_space<vmem>>, vector<8x64xf32>,
    %c8_i32 = arith.constant 8 : i32
    %255 = tpu.dynamic_rotate %246 by %c8_i32 dim 1 : vector<8x64xf32>, i32 -> vector<8x64xf32>
    %c1_275 = arith.constant 1 : index
    %c0_276 = arith.constant 0 : index
    %c0_277 = arith.constant 0 : index
    %256 = vector.load %arg3[%c1_275, %c0_276, %c0_277] : memref<9x8x64xf32, #tpu.memory_space<vmem>>, vector<1x8x64xf32>
    %257 = vector.shape_cast %256 : vector<1x8x64xf32> to vector<8x64xf32>
    %258 = arith.mulf %255, %257 : vector<8x64xf32>
    %c8_278 = arith.constant 8 : index
    %c0_279 = arith.constant 0 : index
    %259 = vector.load %arg9[%c8_278, %c0_279] : memref<80x256xf32, #tpu.memory_space<vmem>>, vector<8x64xf32>
    tpu.vector_store %arg9[%c8_278, %c0_279], %258 {strides = array<i32>} : memref<80x256xf32, #tpu.memory_space<vmem>>, vector<8x64xf32>,
    %c7_i32 = arith.constant 7 : i32
    %260 = tpu.dynamic_rotate %246 by %c7_i32 dim 1 : vector<8x64xf32>, i32 -> vector<8x64xf32>
    %c2_280 = arith.constant 2 : index
    %c0_281 = arith.constant 0 : index
    %c0_282 = arith.constant 0 : index
    %261 = vector.load %arg3[%c2_280, %c0_281, %c0_282] : memref<9x8x64xf32, #tpu.memory_space<vmem>>, vector<1x8x64xf32>
    %262 = vector.shape_cast %261 : vector<1x8x64xf32> to vector<8x64xf32>
    %263 = arith.mulf %260, %262 : vector<8x64xf32>
    %c16_283 = arith.constant 16 : index
    %c0_284 = arith.constant 0 : index
    %264 = vector.load %arg9[%c16_283, %c0_284] : memref<80x256xf32, #tpu.memory_space<vmem>>, vector<8x64xf32>
    tpu.vector_store %arg9[%c16_283, %c0_284], %263 {strides = array<i32>} : memref<80x256xf32, #tpu.memory_space<vmem>>, vector<8x64xf32>,
    %c1_i32_285 = arith.constant 1 : i32
    %265 = tpu.dynamic_rotate %246 by %c1_i32_285 dim 1 : vector<8x64xf32>, i32 -> vector<8x64xf32>
    %c3_286 = arith.constant 3 : index
    %c0_287 = arith.constant 0 : index
    %c0_288 = arith.constant 0 : index
    %266 = vector.load %arg3[%c3_286, %c0_287, %c0_288] : memref<9x8x64xf32, #tpu.memory_space<vmem>>, vector<1x8x64xf32>
    %267 = vector.shape_cast %266 : vector<1x8x64xf32> to vector<8x64xf32>
    %268 = arith.mulf %265, %267 : vector<8x64xf32>
    %c24_289 = arith.constant 24 : index
    %c0_290 = arith.constant 0 : index
    %269 = vector.load %arg9[%c24_289, %c0_290] : memref<80x256xf32, #tpu.memory_space<vmem>>, vector<8x64xf32>
    tpu.vector_store %arg9[%c24_289, %c0_290], %268 {strides = array<i32>} : memref<80x256xf32, #tpu.memory_space<vmem>>, vector<8x64xf32>,
    %c32_291 = arith.constant 32 : index
    %c0_292 = arith.constant 0 : index
    %270 = vector.load %arg9[%c32_291, %c0_292] : memref<80x256xf32, #tpu.memory_space<vmem>>, vector<8x64xf32>
    tpu.vector_store %arg9[%c32_291, %c0_292], %246 {strides = array<i32>} : memref<80x256xf32, #tpu.memory_space<vmem>>, vector<8x64xf32>,
    %c63_i32 = arith.constant 63 : i32
    %271 = tpu.dynamic_rotate %246 by %c63_i32 dim 1 : vector<8x64xf32>, i32 -> vector<8x64xf32>
    %c5_293 = arith.constant 5 : index
    %c0_294 = arith.constant 0 : index
    %c0_295 = arith.constant 0 : index
    %272 = vector.load %arg3[%c5_293, %c0_294, %c0_295] : memref<9x8x64xf32, #tpu.memory_space<vmem>>, vector<1x8x64xf32>
    %273 = vector.shape_cast %272 : vector<1x8x64xf32> to vector<8x64xf32>
    %274 = arith.mulf %271, %273 : vector<8x64xf32>
    %c40_296 = arith.constant 40 : index
    %c0_297 = arith.constant 0 : index
    %275 = vector.load %arg9[%c40_296, %c0_297] : memref<80x256xf32, #tpu.memory_space<vmem>>, vector<8x64xf32>
    tpu.vector_store %arg9[%c40_296, %c0_297], %274 {strides = array<i32>} : memref<80x256xf32, #tpu.memory_space<vmem>>, vector<8x64xf32>,
    %c57_i32 = arith.constant 57 : i32
    %276 = tpu.dynamic_rotate %246 by %c57_i32 dim 1 : vector<8x64xf32>, i32 -> vector<8x64xf32>
    %c6_298 = arith.constant 6 : index
    %c0_299 = arith.constant 0 : index
    %c0_300 = arith.constant 0 : index
    %277 = vector.load %arg3[%c6_298, %c0_299, %c0_300] : memref<9x8x64xf32, #tpu.memory_space<vmem>>, vector<1x8x64xf32>
    %278 = vector.shape_cast %277 : vector<1x8x64xf32> to vector<8x64xf32>
    %279 = arith.mulf %276, %278 : vector<8x64xf32>
    %c48_301 = arith.constant 48 : index
    %c0_302 = arith.constant 0 : index
    %280 = vector.load %arg9[%c48_301, %c0_302] : memref<80x256xf32, #tpu.memory_space<vmem>>, vector<8x64xf32>
    tpu.vector_store %arg9[%c48_301, %c0_302], %279 {strides = array<i32>} : memref<80x256xf32, #tpu.memory_space<vmem>>, vector<8x64xf32>,
    %c56_i32 = arith.constant 56 : i32
    %281 = tpu.dynamic_rotate %246 by %c56_i32 dim 1 : vector<8x64xf32>, i32 -> vector<8x64xf32>
    %c7_303 = arith.constant 7 : index
    %c0_304 = arith.constant 0 : index
    %c0_305 = arith.constant 0 : index
    %282 = vector.load %arg3[%c7_303, %c0_304, %c0_305] : memref<9x8x64xf32, #tpu.memory_space<vmem>>, vector<1x8x64xf32>
    %283 = vector.shape_cast %282 : vector<1x8x64xf32> to vector<8x64xf32>
    %284 = arith.mulf %281, %283 : vector<8x64xf32>
    %c56_306 = arith.constant 56 : index
    %c0_307 = arith.constant 0 : index
    %285 = vector.load %arg9[%c56_306, %c0_307] : memref<80x256xf32, #tpu.memory_space<vmem>>, vector<8x64xf32>
    tpu.vector_store %arg9[%c56_306, %c0_307], %284 {strides = array<i32>} : memref<80x256xf32, #tpu.memory_space<vmem>>, vector<8x64xf32>,
    %c55_i32 = arith.constant 55 : i32
    %286 = tpu.dynamic_rotate %246 by %c55_i32 dim 1 : vector<8x64xf32>, i32 -> vector<8x64xf32>
    %c8_308 = arith.constant 8 : index
    %c0_309 = arith.constant 0 : index
    %c0_310 = arith.constant 0 : index
    %287 = vector.load %arg3[%c8_308, %c0_309, %c0_310] : memref<9x8x64xf32, #tpu.memory_space<vmem>>, vector<1x8x64xf32>
    %288 = vector.shape_cast %287 : vector<1x8x64xf32> to vector<8x64xf32>
    %289 = arith.mulf %286, %288 : vector<8x64xf32>
    %c64_311 = arith.constant 64 : index
    %c0_312 = arith.constant 0 : index
    %290 = vector.load %arg9[%c64_311, %c0_312] : memref<80x256xf32, #tpu.memory_space<vmem>>, vector<8x64xf32>
    tpu.vector_store %arg9[%c64_311, %c0_312], %289 {strides = array<i32>} : memref<80x256xf32, #tpu.memory_space<vmem>>, vector<8x64xf32>,
    %c0_313 = arith.constant 0 : index
    %c0_314 = arith.constant 0 : index
    %291 = vector.load %arg9[%c0_313, %c0_314] : memref<80x256xf32, #tpu.memory_space<vmem>>, vector<80x64xf32>
    %cst_315 = arith.constant dense<0.000000e+00> : vector<16x64xf32>
    %292 = tpu.matmul %249, %291, %cst_315 {dimension_numbers = #tpu.dot_dimension_numbers<[1], [0], [0], [1], [0, 0, 1, 1], [], []>} : vector<16x80xf32>, vector<80x64xf32>, vector<16x64xf32> -> vector<16x64xf32>
    %293 = vector.extract_strided_slice %292 {offsets = [0, 0], sizes = [8, 64], strides = [1, 1]} : vector<16x64xf32> to vector<8x64xf32>
    %294 = arith.addf %293, %247 : vector<8x64xf32>
    %cst_316 = arith.constant 0.000000e+00 : f32
    %295 = vector.broadcast %cst_316 : f32 to vector<8x64xf32>
    %296 = arith.maximumf %294, %295 : vector<8x64xf32>
    %c6_317 = arith.constant 6 : index
    %c0_318 = arith.constant 0 : index
    %c0_319 = arith.constant 0 : index
    %297 = vector.load %arg1[%c6_317, %c0_318, %c0_319] : memref<12x16x80xf32, #tpu.memory_space<vmem>>, vector<1x16x80xf32>
    %298 = vector.shape_cast %297 : vector<1x16x80xf32> to vector<16x80xf32>
    %c9_i32_320 = arith.constant 9 : i32
    %299 = tpu.dynamic_rotate %296 by %c9_i32_320 dim 1 : vector<8x64xf32>, i32 -> vector<8x64xf32>
    %c0_321 = arith.constant 0 : index
    %c0_322 = arith.constant 0 : index
    %c0_323 = arith.constant 0 : index
    %300 = vector.load %arg3[%c0_321, %c0_322, %c0_323] : memref<9x8x64xf32, #tpu.memory_space<vmem>>, vector<1x8x64xf32>
    %301 = vector.shape_cast %300 : vector<1x8x64xf32> to vector<8x64xf32>
    %302 = arith.mulf %299, %301 : vector<8x64xf32>
    %c0_324 = arith.constant 0 : index
    %c0_325 = arith.constant 0 : index
    %303 = vector.load %arg9[%c0_324, %c0_325] : memref<80x256xf32, #tpu.memory_space<vmem>>, vector<8x64xf32>
    tpu.vector_store %arg9[%c0_324, %c0_325], %302 {strides = array<i32>} : memref<80x256xf32, #tpu.memory_space<vmem>>, vector<8x64xf32>,
    %c8_i32_326 = arith.constant 8 : i32
    %304 = tpu.dynamic_rotate %296 by %c8_i32_326 dim 1 : vector<8x64xf32>, i32 -> vector<8x64xf32>
    %c1_327 = arith.constant 1 : index
    %c0_328 = arith.constant 0 : index
    %c0_329 = arith.constant 0 : index
    %305 = vector.load %arg3[%c1_327, %c0_328, %c0_329] : memref<9x8x64xf32, #tpu.memory_space<vmem>>, vector<1x8x64xf32>
    %306 = vector.shape_cast %305 : vector<1x8x64xf32> to vector<8x64xf32>
    %307 = arith.mulf %304, %306 : vector<8x64xf32>
    %c8_330 = arith.constant 8 : index
    %c0_331 = arith.constant 0 : index
    %308 = vector.load %arg9[%c8_330, %c0_331] : memref<80x256xf32, #tpu.memory_space<vmem>>, vector<8x64xf32>
    tpu.vector_store %arg9[%c8_330, %c0_331], %307 {strides = array<i32>} : memref<80x256xf32, #tpu.memory_space<vmem>>, vector<8x64xf32>,
    %c7_i32_332 = arith.constant 7 : i32
    %309 = tpu.dynamic_rotate %296 by %c7_i32_332 dim 1 : vector<8x64xf32>, i32 -> vector<8x64xf32>
    %c2_333 = arith.constant 2 : index
    %c0_334 = arith.constant 0 : index
    %c0_335 = arith.constant 0 : index
    %310 = vector.load %arg3[%c2_333, %c0_334, %c0_335] : memref<9x8x64xf32, #tpu.memory_space<vmem>>, vector<1x8x64xf32>
    %311 = vector.shape_cast %310 : vector<1x8x64xf32> to vector<8x64xf32>
    %312 = arith.mulf %309, %311 : vector<8x64xf32>
    %c16_336 = arith.constant 16 : index
    %c0_337 = arith.constant 0 : index
    %313 = vector.load %arg9[%c16_336, %c0_337] : memref<80x256xf32, #tpu.memory_space<vmem>>, vector<8x64xf32>
    tpu.vector_store %arg9[%c16_336, %c0_337], %312 {strides = array<i32>} : memref<80x256xf32, #tpu.memory_space<vmem>>, vector<8x64xf32>,
    %c1_i32_338 = arith.constant 1 : i32
    %314 = tpu.dynamic_rotate %296 by %c1_i32_338 dim 1 : vector<8x64xf32>, i32 -> vector<8x64xf32>
    %c3_339 = arith.constant 3 : index
    %c0_340 = arith.constant 0 : index
    %c0_341 = arith.constant 0 : index
    %315 = vector.load %arg3[%c3_339, %c0_340, %c0_341] : memref<9x8x64xf32, #tpu.memory_space<vmem>>, vector<1x8x64xf32>
    %316 = vector.shape_cast %315 : vector<1x8x64xf32> to vector<8x64xf32>
    %317 = arith.mulf %314, %316 : vector<8x64xf32>
    %c24_342 = arith.constant 24 : index
    %c0_343 = arith.constant 0 : index
    %318 = vector.load %arg9[%c24_342, %c0_343] : memref<80x256xf32, #tpu.memory_space<vmem>>, vector<8x64xf32>
    tpu.vector_store %arg9[%c24_342, %c0_343], %317 {strides = array<i32>} : memref<80x256xf32, #tpu.memory_space<vmem>>, vector<8x64xf32>,
    %c32_344 = arith.constant 32 : index
    %c0_345 = arith.constant 0 : index
    %319 = vector.load %arg9[%c32_344, %c0_345] : memref<80x256xf32, #tpu.memory_space<vmem>>, vector<8x64xf32>
    tpu.vector_store %arg9[%c32_344, %c0_345], %296 {strides = array<i32>} : memref<80x256xf32, #tpu.memory_space<vmem>>, vector<8x64xf32>,
    %c63_i32_346 = arith.constant 63 : i32
    %320 = tpu.dynamic_rotate %296 by %c63_i32_346 dim 1 : vector<8x64xf32>, i32 -> vector<8x64xf32>
    %c5_347 = arith.constant 5 : index
    %c0_348 = arith.constant 0 : index
    %c0_349 = arith.constant 0 : index
    %321 = vector.load %arg3[%c5_347, %c0_348, %c0_349] : memref<9x8x64xf32, #tpu.memory_space<vmem>>, vector<1x8x64xf32>
    %322 = vector.shape_cast %321 : vector<1x8x64xf32> to vector<8x64xf32>
    %323 = arith.mulf %320, %322 : vector<8x64xf32>
    %c40_350 = arith.constant 40 : index
    %c0_351 = arith.constant 0 : index
    %324 = vector.load %arg9[%c40_350, %c0_351] : memref<80x256xf32, #tpu.memory_space<vmem>>, vector<8x64xf32>
    tpu.vector_store %arg9[%c40_350, %c0_351], %323 {strides = array<i32>} : memref<80x256xf32, #tpu.memory_space<vmem>>, vector<8x64xf32>,
    %c57_i32_352 = arith.constant 57 : i32
    %325 = tpu.dynamic_rotate %296 by %c57_i32_352 dim 1 : vector<8x64xf32>, i32 -> vector<8x64xf32>
    %c6_353 = arith.constant 6 : index
    %c0_354 = arith.constant 0 : index
    %c0_355 = arith.constant 0 : index
    %326 = vector.load %arg3[%c6_353, %c0_354, %c0_355] : memref<9x8x64xf32, #tpu.memory_space<vmem>>, vector<1x8x64xf32>
    %327 = vector.shape_cast %326 : vector<1x8x64xf32> to vector<8x64xf32>
    %328 = arith.mulf %325, %327 : vector<8x64xf32>
    %c48_356 = arith.constant 48 : index
    %c0_357 = arith.constant 0 : index
    %329 = vector.load %arg9[%c48_356, %c0_357] : memref<80x256xf32, #tpu.memory_space<vmem>>, vector<8x64xf32>
    tpu.vector_store %arg9[%c48_356, %c0_357], %328 {strides = array<i32>} : memref<80x256xf32, #tpu.memory_space<vmem>>, vector<8x64xf32>,
    %c56_i32_358 = arith.constant 56 : i32
    %330 = tpu.dynamic_rotate %296 by %c56_i32_358 dim 1 : vector<8x64xf32>, i32 -> vector<8x64xf32>
    %c7_359 = arith.constant 7 : index
    %c0_360 = arith.constant 0 : index
    %c0_361 = arith.constant 0 : index
    %331 = vector.load %arg3[%c7_359, %c0_360, %c0_361] : memref<9x8x64xf32, #tpu.memory_space<vmem>>, vector<1x8x64xf32>
    %332 = vector.shape_cast %331 : vector<1x8x64xf32> to vector<8x64xf32>
    %333 = arith.mulf %330, %332 : vector<8x64xf32>
    %c56_362 = arith.constant 56 : index
    %c0_363 = arith.constant 0 : index
    %334 = vector.load %arg9[%c56_362, %c0_363] : memref<80x256xf32, #tpu.memory_space<vmem>>, vector<8x64xf32>
    tpu.vector_store %arg9[%c56_362, %c0_363], %333 {strides = array<i32>} : memref<80x256xf32, #tpu.memory_space<vmem>>, vector<8x64xf32>,
    %c55_i32_364 = arith.constant 55 : i32
    %335 = tpu.dynamic_rotate %296 by %c55_i32_364 dim 1 : vector<8x64xf32>, i32 -> vector<8x64xf32>
    %c8_365 = arith.constant 8 : index
    %c0_366 = arith.constant 0 : index
    %c0_367 = arith.constant 0 : index
    %336 = vector.load %arg3[%c8_365, %c0_366, %c0_367] : memref<9x8x64xf32, #tpu.memory_space<vmem>>, vector<1x8x64xf32>
    %337 = vector.shape_cast %336 : vector<1x8x64xf32> to vector<8x64xf32>
    %338 = arith.mulf %335, %337 : vector<8x64xf32>
    %c64_368 = arith.constant 64 : index
    %c0_369 = arith.constant 0 : index
    %339 = vector.load %arg9[%c64_368, %c0_369] : memref<80x256xf32, #tpu.memory_space<vmem>>, vector<8x64xf32>
    tpu.vector_store %arg9[%c64_368, %c0_369], %338 {strides = array<i32>} : memref<80x256xf32, #tpu.memory_space<vmem>>, vector<8x64xf32>,
    %c0_370 = arith.constant 0 : index
    %c0_371 = arith.constant 0 : index
    %340 = vector.load %arg9[%c0_370, %c0_371] : memref<80x256xf32, #tpu.memory_space<vmem>>, vector<80x64xf32>
    %cst_372 = arith.constant dense<0.000000e+00> : vector<16x64xf32>
    %341 = tpu.matmul %298, %340, %cst_372 {dimension_numbers = #tpu.dot_dimension_numbers<[1], [0], [0], [1], [0, 0, 1, 1], [], []>} : vector<16x80xf32>, vector<80x64xf32>, vector<16x64xf32> -> vector<16x64xf32>
    %342 = vector.extract_strided_slice %341 {offsets = [0, 0], sizes = [8, 64], strides = [1, 1]} : vector<16x64xf32> to vector<8x64xf32>
    %cst_373 = arith.constant 0.000000e+00 : f32
    %343 = vector.broadcast %cst_373 : f32 to vector<8x64xf32>
    %344 = arith.maximumf %342, %343 : vector<8x64xf32>
    %c7_374 = arith.constant 7 : index
    %c0_375 = arith.constant 0 : index
    %c0_376 = arith.constant 0 : index
    %345 = vector.load %arg1[%c7_374, %c0_375, %c0_376] : memref<12x16x80xf32, #tpu.memory_space<vmem>>, vector<1x16x80xf32>
    %346 = vector.shape_cast %345 : vector<1x16x80xf32> to vector<16x80xf32>
    %c9_i32_377 = arith.constant 9 : i32
    %347 = tpu.dynamic_rotate %344 by %c9_i32_377 dim 1 : vector<8x64xf32>, i32 -> vector<8x64xf32>
    %c0_378 = arith.constant 0 : index
    %c0_379 = arith.constant 0 : index
    %c0_380 = arith.constant 0 : index
    %348 = vector.load %arg3[%c0_378, %c0_379, %c0_380] : memref<9x8x64xf32, #tpu.memory_space<vmem>>, vector<1x8x64xf32>
    %349 = vector.shape_cast %348 : vector<1x8x64xf32> to vector<8x64xf32>
    %350 = arith.mulf %347, %349 : vector<8x64xf32>
    %c0_381 = arith.constant 0 : index
    %c0_382 = arith.constant 0 : index
    %351 = vector.load %arg9[%c0_381, %c0_382] : memref<80x256xf32, #tpu.memory_space<vmem>>, vector<8x64xf32>
    tpu.vector_store %arg9[%c0_381, %c0_382], %350 {strides = array<i32>} : memref<80x256xf32, #tpu.memory_space<vmem>>, vector<8x64xf32>,
    %c8_i32_383 = arith.constant 8 : i32
    %352 = tpu.dynamic_rotate %344 by %c8_i32_383 dim 1 : vector<8x64xf32>, i32 -> vector<8x64xf32>
    %c1_384 = arith.constant 1 : index
    %c0_385 = arith.constant 0 : index
    %c0_386 = arith.constant 0 : index
    %353 = vector.load %arg3[%c1_384, %c0_385, %c0_386] : memref<9x8x64xf32, #tpu.memory_space<vmem>>, vector<1x8x64xf32>
    %354 = vector.shape_cast %353 : vector<1x8x64xf32> to vector<8x64xf32>
    %355 = arith.mulf %352, %354 : vector<8x64xf32>
    %c8_387 = arith.constant 8 : index
    %c0_388 = arith.constant 0 : index
    %356 = vector.load %arg9[%c8_387, %c0_388] : memref<80x256xf32, #tpu.memory_space<vmem>>, vector<8x64xf32>
    tpu.vector_store %arg9[%c8_387, %c0_388], %355 {strides = array<i32>} : memref<80x256xf32, #tpu.memory_space<vmem>>, vector<8x64xf32>,
    %c7_i32_389 = arith.constant 7 : i32
    %357 = tpu.dynamic_rotate %344 by %c7_i32_389 dim 1 : vector<8x64xf32>, i32 -> vector<8x64xf32>
    %c2_390 = arith.constant 2 : index
    %c0_391 = arith.constant 0 : index
    %c0_392 = arith.constant 0 : index
    %358 = vector.load %arg3[%c2_390, %c0_391, %c0_392] : memref<9x8x64xf32, #tpu.memory_space<vmem>>, vector<1x8x64xf32>
    %359 = vector.shape_cast %358 : vector<1x8x64xf32> to vector<8x64xf32>
    %360 = arith.mulf %357, %359 : vector<8x64xf32>
    %c16_393 = arith.constant 16 : index
    %c0_394 = arith.constant 0 : index
    %361 = vector.load %arg9[%c16_393, %c0_394] : memref<80x256xf32, #tpu.memory_space<vmem>>, vector<8x64xf32>
    tpu.vector_store %arg9[%c16_393, %c0_394], %360 {strides = array<i32>} : memref<80x256xf32, #tpu.memory_space<vmem>>, vector<8x64xf32>,
    %c1_i32_395 = arith.constant 1 : i32
    %362 = tpu.dynamic_rotate %344 by %c1_i32_395 dim 1 : vector<8x64xf32>, i32 -> vector<8x64xf32>
    %c3_396 = arith.constant 3 : index
    %c0_397 = arith.constant 0 : index
    %c0_398 = arith.constant 0 : index
    %363 = vector.load %arg3[%c3_396, %c0_397, %c0_398] : memref<9x8x64xf32, #tpu.memory_space<vmem>>, vector<1x8x64xf32>
    %364 = vector.shape_cast %363 : vector<1x8x64xf32> to vector<8x64xf32>
    %365 = arith.mulf %362, %364 : vector<8x64xf32>
    %c24_399 = arith.constant 24 : index
    %c0_400 = arith.constant 0 : index
    %366 = vector.load %arg9[%c24_399, %c0_400] : memref<80x256xf32, #tpu.memory_space<vmem>>, vector<8x64xf32>
    tpu.vector_store %arg9[%c24_399, %c0_400], %365 {strides = array<i32>} : memref<80x256xf32, #tpu.memory_space<vmem>>, vector<8x64xf32>,
    %c32_401 = arith.constant 32 : index
    %c0_402 = arith.constant 0 : index
    %367 = vector.load %arg9[%c32_401, %c0_402] : memref<80x256xf32, #tpu.memory_space<vmem>>, vector<8x64xf32>
    tpu.vector_store %arg9[%c32_401, %c0_402], %344 {strides = array<i32>} : memref<80x256xf32, #tpu.memory_space<vmem>>, vector<8x64xf32>,
    %c63_i32_403 = arith.constant 63 : i32
    %368 = tpu.dynamic_rotate %344 by %c63_i32_403 dim 1 : vector<8x64xf32>, i32 -> vector<8x64xf32>
    %c5_404 = arith.constant 5 : index
    %c0_405 = arith.constant 0 : index
    %c0_406 = arith.constant 0 : index
    %369 = vector.load %arg3[%c5_404, %c0_405, %c0_406] : memref<9x8x64xf32, #tpu.memory_space<vmem>>, vector<1x8x64xf32>
    %370 = vector.shape_cast %369 : vector<1x8x64xf32> to vector<8x64xf32>
    %371 = arith.mulf %368, %370 : vector<8x64xf32>
    %c40_407 = arith.constant 40 : index
    %c0_408 = arith.constant 0 : index
    %372 = vector.load %arg9[%c40_407, %c0_408] : memref<80x256xf32, #tpu.memory_space<vmem>>, vector<8x64xf32>
    tpu.vector_store %arg9[%c40_407, %c0_408], %371 {strides = array<i32>} : memref<80x256xf32, #tpu.memory_space<vmem>>, vector<8x64xf32>,
    %c57_i32_409 = arith.constant 57 : i32
    %373 = tpu.dynamic_rotate %344 by %c57_i32_409 dim 1 : vector<8x64xf32>, i32 -> vector<8x64xf32>
    %c6_410 = arith.constant 6 : index
    %c0_411 = arith.constant 0 : index
    %c0_412 = arith.constant 0 : index
    %374 = vector.load %arg3[%c6_410, %c0_411, %c0_412] : memref<9x8x64xf32, #tpu.memory_space<vmem>>, vector<1x8x64xf32>
    %375 = vector.shape_cast %374 : vector<1x8x64xf32> to vector<8x64xf32>
    %376 = arith.mulf %373, %375 : vector<8x64xf32>
    %c48_413 = arith.constant 48 : index
    %c0_414 = arith.constant 0 : index
    %377 = vector.load %arg9[%c48_413, %c0_414] : memref<80x256xf32, #tpu.memory_space<vmem>>, vector<8x64xf32>
    tpu.vector_store %arg9[%c48_413, %c0_414], %376 {strides = array<i32>} : memref<80x256xf32, #tpu.memory_space<vmem>>, vector<8x64xf32>,
    %c56_i32_415 = arith.constant 56 : i32
    %378 = tpu.dynamic_rotate %344 by %c56_i32_415 dim 1 : vector<8x64xf32>, i32 -> vector<8x64xf32>
    %c7_416 = arith.constant 7 : index
    %c0_417 = arith.constant 0 : index
    %c0_418 = arith.constant 0 : index
    %379 = vector.load %arg3[%c7_416, %c0_417, %c0_418] : memref<9x8x64xf32, #tpu.memory_space<vmem>>, vector<1x8x64xf32>
    %380 = vector.shape_cast %379 : vector<1x8x64xf32> to vector<8x64xf32>
    %381 = arith.mulf %378, %380 : vector<8x64xf32>
    %c56_419 = arith.constant 56 : index
    %c0_420 = arith.constant 0 : index
    %382 = vector.load %arg9[%c56_419, %c0_420] : memref<80x256xf32, #tpu.memory_space<vmem>>, vector<8x64xf32>
    tpu.vector_store %arg9[%c56_419, %c0_420], %381 {strides = array<i32>} : memref<80x256xf32, #tpu.memory_space<vmem>>, vector<8x64xf32>,
    %c55_i32_421 = arith.constant 55 : i32
    %383 = tpu.dynamic_rotate %344 by %c55_i32_421 dim 1 : vector<8x64xf32>, i32 -> vector<8x64xf32>
    %c8_422 = arith.constant 8 : index
    %c0_423 = arith.constant 0 : index
    %c0_424 = arith.constant 0 : index
    %384 = vector.load %arg3[%c8_422, %c0_423, %c0_424] : memref<9x8x64xf32, #tpu.memory_space<vmem>>, vector<1x8x64xf32>
    %385 = vector.shape_cast %384 : vector<1x8x64xf32> to vector<8x64xf32>
    %386 = arith.mulf %383, %385 : vector<8x64xf32>
    %c64_425 = arith.constant 64 : index
    %c0_426 = arith.constant 0 : index
    %387 = vector.load %arg9[%c64_425, %c0_426] : memref<80x256xf32, #tpu.memory_space<vmem>>, vector<8x64xf32>
    tpu.vector_store %arg9[%c64_425, %c0_426], %386 {strides = array<i32>} : memref<80x256xf32, #tpu.memory_space<vmem>>, vector<8x64xf32>,
    %c0_427 = arith.constant 0 : index
    %c0_428 = arith.constant 0 : index
    %388 = vector.load %arg9[%c0_427, %c0_428] : memref<80x256xf32, #tpu.memory_space<vmem>>, vector<80x64xf32>
    %cst_429 = arith.constant dense<0.000000e+00> : vector<16x64xf32>
    %389 = tpu.matmul %346, %388, %cst_429 {dimension_numbers = #tpu.dot_dimension_numbers<[1], [0], [0], [1], [0, 0, 1, 1], [], []>} : vector<16x80xf32>, vector<80x64xf32>, vector<16x64xf32> -> vector<16x64xf32>
    %390 = vector.extract_strided_slice %389 {offsets = [0, 0], sizes = [8, 64], strides = [1, 1]} : vector<16x64xf32> to vector<8x64xf32>
    %391 = arith.addf %390, %296 : vector<8x64xf32>
    %cst_430 = arith.constant 0.000000e+00 : f32
    %392 = vector.broadcast %cst_430 : f32 to vector<8x64xf32>
    %393 = arith.maximumf %391, %392 : vector<8x64xf32>
    %c8_431 = arith.constant 8 : index
    %c0_432 = arith.constant 0 : index
    %c0_433 = arith.constant 0 : index
    %394 = vector.load %arg1[%c8_431, %c0_432, %c0_433] : memref<12x16x80xf32, #tpu.memory_space<vmem>>, vector<1x16x80xf32>
    %395 = vector.shape_cast %394 : vector<1x16x80xf32> to vector<16x80xf32>
    %c9_i32_434 = arith.constant 9 : i32
    %396 = tpu.dynamic_rotate %393 by %c9_i32_434 dim 1 : vector<8x64xf32>, i32 -> vector<8x64xf32>
    %c0_435 = arith.constant 0 : index
    %c0_436 = arith.constant 0 : index
    %c0_437 = arith.constant 0 : index
    %397 = vector.load %arg3[%c0_435, %c0_436, %c0_437] : memref<9x8x64xf32, #tpu.memory_space<vmem>>, vector<1x8x64xf32>
    %398 = vector.shape_cast %397 : vector<1x8x64xf32> to vector<8x64xf32>
    %399 = arith.mulf %396, %398 : vector<8x64xf32>
    %c0_438 = arith.constant 0 : index
    %c0_439 = arith.constant 0 : index
    %400 = vector.load %arg9[%c0_438, %c0_439] : memref<80x256xf32, #tpu.memory_space<vmem>>, vector<8x64xf32>
    tpu.vector_store %arg9[%c0_438, %c0_439], %399 {strides = array<i32>} : memref<80x256xf32, #tpu.memory_space<vmem>>, vector<8x64xf32>,
    %c8_i32_440 = arith.constant 8 : i32
    %401 = tpu.dynamic_rotate %393 by %c8_i32_440 dim 1 : vector<8x64xf32>, i32 -> vector<8x64xf32>
    %c1_441 = arith.constant 1 : index
    %c0_442 = arith.constant 0 : index
    %c0_443 = arith.constant 0 : index
    %402 = vector.load %arg3[%c1_441, %c0_442, %c0_443] : memref<9x8x64xf32, #tpu.memory_space<vmem>>, vector<1x8x64xf32>
    %403 = vector.shape_cast %402 : vector<1x8x64xf32> to vector<8x64xf32>
    %404 = arith.mulf %401, %403 : vector<8x64xf32>
    %c8_444 = arith.constant 8 : index
    %c0_445 = arith.constant 0 : index
    %405 = vector.load %arg9[%c8_444, %c0_445] : memref<80x256xf32, #tpu.memory_space<vmem>>, vector<8x64xf32>
    tpu.vector_store %arg9[%c8_444, %c0_445], %404 {strides = array<i32>} : memref<80x256xf32, #tpu.memory_space<vmem>>, vector<8x64xf32>,
    %c7_i32_446 = arith.constant 7 : i32
    %406 = tpu.dynamic_rotate %393 by %c7_i32_446 dim 1 : vector<8x64xf32>, i32 -> vector<8x64xf32>
    %c2_447 = arith.constant 2 : index
    %c0_448 = arith.constant 0 : index
    %c0_449 = arith.constant 0 : index
    %407 = vector.load %arg3[%c2_447, %c0_448, %c0_449] : memref<9x8x64xf32, #tpu.memory_space<vmem>>, vector<1x8x64xf32>
    %408 = vector.shape_cast %407 : vector<1x8x64xf32> to vector<8x64xf32>
    %409 = arith.mulf %406, %408 : vector<8x64xf32>
    %c16_450 = arith.constant 16 : index
    %c0_451 = arith.constant 0 : index
    %410 = vector.load %arg9[%c16_450, %c0_451] : memref<80x256xf32, #tpu.memory_space<vmem>>, vector<8x64xf32>
    tpu.vector_store %arg9[%c16_450, %c0_451], %409 {strides = array<i32>} : memref<80x256xf32, #tpu.memory_space<vmem>>, vector<8x64xf32>,
    %c1_i32_452 = arith.constant 1 : i32
    %411 = tpu.dynamic_rotate %393 by %c1_i32_452 dim 1 : vector<8x64xf32>, i32 -> vector<8x64xf32>
    %c3_453 = arith.constant 3 : index
    %c0_454 = arith.constant 0 : index
    %c0_455 = arith.constant 0 : index
    %412 = vector.load %arg3[%c3_453, %c0_454, %c0_455] : memref<9x8x64xf32, #tpu.memory_space<vmem>>, vector<1x8x64xf32>
    %413 = vector.shape_cast %412 : vector<1x8x64xf32> to vector<8x64xf32>
    %414 = arith.mulf %411, %413 : vector<8x64xf32>
    %c24_456 = arith.constant 24 : index
    %c0_457 = arith.constant 0 : index
    %415 = vector.load %arg9[%c24_456, %c0_457] : memref<80x256xf32, #tpu.memory_space<vmem>>, vector<8x64xf32>
    tpu.vector_store %arg9[%c24_456, %c0_457], %414 {strides = array<i32>} : memref<80x256xf32, #tpu.memory_space<vmem>>, vector<8x64xf32>,
    %c32_458 = arith.constant 32 : index
    %c0_459 = arith.constant 0 : index
    %416 = vector.load %arg9[%c32_458, %c0_459] : memref<80x256xf32, #tpu.memory_space<vmem>>, vector<8x64xf32>
    tpu.vector_store %arg9[%c32_458, %c0_459], %393 {strides = array<i32>} : memref<80x256xf32, #tpu.memory_space<vmem>>, vector<8x64xf32>,
    %c63_i32_460 = arith.constant 63 : i32
    %417 = tpu.dynamic_rotate %393 by %c63_i32_460 dim 1 : vector<8x64xf32>, i32 -> vector<8x64xf32>
    %c5_461 = arith.constant 5 : index
    %c0_462 = arith.constant 0 : index
    %c0_463 = arith.constant 0 : index
    %418 = vector.load %arg3[%c5_461, %c0_462, %c0_463] : memref<9x8x64xf32, #tpu.memory_space<vmem>>, vector<1x8x64xf32>
    %419 = vector.shape_cast %418 : vector<1x8x64xf32> to vector<8x64xf32>
    %420 = arith.mulf %417, %419 : vector<8x64xf32>
    %c40_464 = arith.constant 40 : index
    %c0_465 = arith.constant 0 : index
    %421 = vector.load %arg9[%c40_464, %c0_465] : memref<80x256xf32, #tpu.memory_space<vmem>>, vector<8x64xf32>
    tpu.vector_store %arg9[%c40_464, %c0_465], %420 {strides = array<i32>} : memref<80x256xf32, #tpu.memory_space<vmem>>, vector<8x64xf32>,
    %c57_i32_466 = arith.constant 57 : i32
    %422 = tpu.dynamic_rotate %393 by %c57_i32_466 dim 1 : vector<8x64xf32>, i32 -> vector<8x64xf32>
    %c6_467 = arith.constant 6 : index
    %c0_468 = arith.constant 0 : index
    %c0_469 = arith.constant 0 : index
    %423 = vector.load %arg3[%c6_467, %c0_468, %c0_469] : memref<9x8x64xf32, #tpu.memory_space<vmem>>, vector<1x8x64xf32>
    %424 = vector.shape_cast %423 : vector<1x8x64xf32> to vector<8x64xf32>
    %425 = arith.mulf %422, %424 : vector<8x64xf32>
    %c48_470 = arith.constant 48 : index
    %c0_471 = arith.constant 0 : index
    %426 = vector.load %arg9[%c48_470, %c0_471] : memref<80x256xf32, #tpu.memory_space<vmem>>, vector<8x64xf32>
    tpu.vector_store %arg9[%c48_470, %c0_471], %425 {strides = array<i32>} : memref<80x256xf32, #tpu.memory_space<vmem>>, vector<8x64xf32>,
    %c56_i32_472 = arith.constant 56 : i32
    %427 = tpu.dynamic_rotate %393 by %c56_i32_472 dim 1 : vector<8x64xf32>, i32 -> vector<8x64xf32>
    %c7_473 = arith.constant 7 : index
    %c0_474 = arith.constant 0 : index
    %c0_475 = arith.constant 0 : index
    %428 = vector.load %arg3[%c7_473, %c0_474, %c0_475] : memref<9x8x64xf32, #tpu.memory_space<vmem>>, vector<1x8x64xf32>
    %429 = vector.shape_cast %428 : vector<1x8x64xf32> to vector<8x64xf32>
    %430 = arith.mulf %427, %429 : vector<8x64xf32>
    %c56_476 = arith.constant 56 : index
    %c0_477 = arith.constant 0 : index
    %431 = vector.load %arg9[%c56_476, %c0_477] : memref<80x256xf32, #tpu.memory_space<vmem>>, vector<8x64xf32>
    tpu.vector_store %arg9[%c56_476, %c0_477], %430 {strides = array<i32>} : memref<80x256xf32, #tpu.memory_space<vmem>>, vector<8x64xf32>,
    %c55_i32_478 = arith.constant 55 : i32
    %432 = tpu.dynamic_rotate %393 by %c55_i32_478 dim 1 : vector<8x64xf32>, i32 -> vector<8x64xf32>
    %c8_479 = arith.constant 8 : index
    %c0_480 = arith.constant 0 : index
    %c0_481 = arith.constant 0 : index
    %433 = vector.load %arg3[%c8_479, %c0_480, %c0_481] : memref<9x8x64xf32, #tpu.memory_space<vmem>>, vector<1x8x64xf32>
    %434 = vector.shape_cast %433 : vector<1x8x64xf32> to vector<8x64xf32>
    %435 = arith.mulf %432, %434 : vector<8x64xf32>
    %c64_482 = arith.constant 64 : index
    %c0_483 = arith.constant 0 : index
    %436 = vector.load %arg9[%c64_482, %c0_483] : memref<80x256xf32, #tpu.memory_space<vmem>>, vector<8x64xf32>
    tpu.vector_store %arg9[%c64_482, %c0_483], %435 {strides = array<i32>} : memref<80x256xf32, #tpu.memory_space<vmem>>, vector<8x64xf32>,
    %c0_484 = arith.constant 0 : index
    %c0_485 = arith.constant 0 : index
    %437 = vector.load %arg9[%c0_484, %c0_485] : memref<80x256xf32, #tpu.memory_space<vmem>>, vector<80x64xf32>
    %cst_486 = arith.constant dense<0.000000e+00> : vector<16x64xf32>
    %438 = tpu.matmul %395, %437, %cst_486 {dimension_numbers = #tpu.dot_dimension_numbers<[1], [0], [0], [1], [0, 0, 1, 1], [], []>} : vector<16x80xf32>, vector<80x64xf32>, vector<16x64xf32> -> vector<16x64xf32>
    %c0_487 = arith.constant 0 : index
    %c0_488 = arith.constant 0 : index
    %439 = vector.load %arg6[%c0_487, %c0_488] : memref<64x16xf32, #tpu.memory_space<vmem>>, vector<64x16xf32>
    %cst_489 = arith.constant dense<0.000000e+00> : vector<16x16xf32>
    %440 = tpu.matmul %438, %439, %cst_489 {dimension_numbers = #tpu.dot_dimension_numbers<[1], [0], [0], [1], [0, 0, 1, 1], [], []>} : vector<16x64xf32>, vector<64x16xf32>, vector<16x16xf32> -> vector<16x16xf32>
    %441 = vector.extract_strided_slice %440 {offsets = [0, 0], sizes = [8, 16], strides = [1, 1]} : vector<16x16xf32> to vector<8x16xf32>
    %cst_490 = arith.constant 0.000000e+00 : f32
    %442 = vector.broadcast %cst_490 : f32 to vector<8x16xf32>
    %443 = arith.maximumf %441, %442 : vector<8x16xf32>
    %444 = vector.extract_strided_slice %440 {offsets = [8, 0], sizes = [8, 16], strides = [1, 1]} : vector<16x16xf32> to vector<8x16xf32>
    %c9 = arith.constant 9 : index
    %c0_491 = arith.constant 0 : index
    %c0_492 = arith.constant 0 : index
    %445 = vector.load %arg1[%c9, %c0_491, %c0_492] : memref<12x16x80xf32, #tpu.memory_space<vmem>>, vector<1x16x80xf32>
    %446 = vector.shape_cast %445 : vector<1x16x80xf32> to vector<16x80xf32>
    %c5_i32 = arith.constant 5 : i32
    %447 = tpu.dynamic_rotate %443 by %c5_i32 dim 1 : vector<8x16xf32>, i32 -> vector<8x16xf32>
    %c0_493 = arith.constant 0 : index
    %c0_494 = arith.constant 0 : index
    %c0_495 = arith.constant 0 : index
    %448 = vector.load %arg4[%c0_493, %c0_494, %c0_495] : memref<9x8x16xf32, #tpu.memory_space<vmem>>, vector<1x8x16xf32>
    %449 = vector.shape_cast %448 : vector<1x8x16xf32> to vector<8x16xf32>
    %450 = arith.mulf %447, %449 : vector<8x16xf32>
    %c0_496 = arith.constant 0 : index
    %c0_497 = arith.constant 0 : index
    %451 = vector.load %arg9[%c0_496, %c0_497] : memref<80x256xf32, #tpu.memory_space<vmem>>, vector<8x16xf32>
    tpu.vector_store %arg9[%c0_496, %c0_497], %450 {strides = array<i32>} : memref<80x256xf32, #tpu.memory_space<vmem>>, vector<8x16xf32>,
    %c4_i32 = arith.constant 4 : i32
    %452 = tpu.dynamic_rotate %443 by %c4_i32 dim 1 : vector<8x16xf32>, i32 -> vector<8x16xf32>
    %c1_498 = arith.constant 1 : index
    %c0_499 = arith.constant 0 : index
    %c0_500 = arith.constant 0 : index
    %453 = vector.load %arg4[%c1_498, %c0_499, %c0_500] : memref<9x8x16xf32, #tpu.memory_space<vmem>>, vector<1x8x16xf32>
    %454 = vector.shape_cast %453 : vector<1x8x16xf32> to vector<8x16xf32>
    %455 = arith.mulf %452, %454 : vector<8x16xf32>
    %c8_501 = arith.constant 8 : index
    %c0_502 = arith.constant 0 : index
    %456 = vector.load %arg9[%c8_501, %c0_502] : memref<80x256xf32, #tpu.memory_space<vmem>>, vector<8x16xf32>
    tpu.vector_store %arg9[%c8_501, %c0_502], %455 {strides = array<i32>} : memref<80x256xf32, #tpu.memory_space<vmem>>, vector<8x16xf32>,
    %c3_i32 = arith.constant 3 : i32
    %457 = tpu.dynamic_rotate %443 by %c3_i32 dim 1 : vector<8x16xf32>, i32 -> vector<8x16xf32>
    %c2_503 = arith.constant 2 : index
    %c0_504 = arith.constant 0 : index
    %c0_505 = arith.constant 0 : index
    %458 = vector.load %arg4[%c2_503, %c0_504, %c0_505] : memref<9x8x16xf32, #tpu.memory_space<vmem>>, vector<1x8x16xf32>
    %459 = vector.shape_cast %458 : vector<1x8x16xf32> to vector<8x16xf32>
    %460 = arith.mulf %457, %459 : vector<8x16xf32>
    %c16_506 = arith.constant 16 : index
    %c0_507 = arith.constant 0 : index
    %461 = vector.load %arg9[%c16_506, %c0_507] : memref<80x256xf32, #tpu.memory_space<vmem>>, vector<8x16xf32>
    tpu.vector_store %arg9[%c16_506, %c0_507], %460 {strides = array<i32>} : memref<80x256xf32, #tpu.memory_space<vmem>>, vector<8x16xf32>,
    %c1_i32_508 = arith.constant 1 : i32
    %462 = tpu.dynamic_rotate %443 by %c1_i32_508 dim 1 : vector<8x16xf32>, i32 -> vector<8x16xf32>
    %c3_509 = arith.constant 3 : index
    %c0_510 = arith.constant 0 : index
    %c0_511 = arith.constant 0 : index
    %463 = vector.load %arg4[%c3_509, %c0_510, %c0_511] : memref<9x8x16xf32, #tpu.memory_space<vmem>>, vector<1x8x16xf32>
    %464 = vector.shape_cast %463 : vector<1x8x16xf32> to vector<8x16xf32>
    %465 = arith.mulf %462, %464 : vector<8x16xf32>
    %c24_512 = arith.constant 24 : index
    %c0_513 = arith.constant 0 : index
    %466 = vector.load %arg9[%c24_512, %c0_513] : memref<80x256xf32, #tpu.memory_space<vmem>>, vector<8x16xf32>
    tpu.vector_store %arg9[%c24_512, %c0_513], %465 {strides = array<i32>} : memref<80x256xf32, #tpu.memory_space<vmem>>, vector<8x16xf32>,
    %c32_514 = arith.constant 32 : index
    %c0_515 = arith.constant 0 : index
    %467 = vector.load %arg9[%c32_514, %c0_515] : memref<80x256xf32, #tpu.memory_space<vmem>>, vector<8x16xf32>
    tpu.vector_store %arg9[%c32_514, %c0_515], %443 {strides = array<i32>} : memref<80x256xf32, #tpu.memory_space<vmem>>, vector<8x16xf32>,
    %c15_i32_516 = arith.constant 15 : i32
    %468 = tpu.dynamic_rotate %443 by %c15_i32_516 dim 1 : vector<8x16xf32>, i32 -> vector<8x16xf32>
    %c5_517 = arith.constant 5 : index
    %c0_518 = arith.constant 0 : index
    %c0_519 = arith.constant 0 : index
    %469 = vector.load %arg4[%c5_517, %c0_518, %c0_519] : memref<9x8x16xf32, #tpu.memory_space<vmem>>, vector<1x8x16xf32>
    %470 = vector.shape_cast %469 : vector<1x8x16xf32> to vector<8x16xf32>
    %471 = arith.mulf %468, %470 : vector<8x16xf32>
    %c40_520 = arith.constant 40 : index
    %c0_521 = arith.constant 0 : index
    %472 = vector.load %arg9[%c40_520, %c0_521] : memref<80x256xf32, #tpu.memory_space<vmem>>, vector<8x16xf32>
    tpu.vector_store %arg9[%c40_520, %c0_521], %471 {strides = array<i32>} : memref<80x256xf32, #tpu.memory_space<vmem>>, vector<8x16xf32>,
    %c13_i32 = arith.constant 13 : i32
    %473 = tpu.dynamic_rotate %443 by %c13_i32 dim 1 : vector<8x16xf32>, i32 -> vector<8x16xf32>
    %c6_522 = arith.constant 6 : index
    %c0_523 = arith.constant 0 : index
    %c0_524 = arith.constant 0 : index
    %474 = vector.load %arg4[%c6_522, %c0_523, %c0_524] : memref<9x8x16xf32, #tpu.memory_space<vmem>>, vector<1x8x16xf32>
    %475 = vector.shape_cast %474 : vector<1x8x16xf32> to vector<8x16xf32>
    %476 = arith.mulf %473, %475 : vector<8x16xf32>
    %c48_525 = arith.constant 48 : index
    %c0_526 = arith.constant 0 : index
    %477 = vector.load %arg9[%c48_525, %c0_526] : memref<80x256xf32, #tpu.memory_space<vmem>>, vector<8x16xf32>
    tpu.vector_store %arg9[%c48_525, %c0_526], %476 {strides = array<i32>} : memref<80x256xf32, #tpu.memory_space<vmem>>, vector<8x16xf32>,
    %c12_i32 = arith.constant 12 : i32
    %478 = tpu.dynamic_rotate %443 by %c12_i32 dim 1 : vector<8x16xf32>, i32 -> vector<8x16xf32>
    %c7_527 = arith.constant 7 : index
    %c0_528 = arith.constant 0 : index
    %c0_529 = arith.constant 0 : index
    %479 = vector.load %arg4[%c7_527, %c0_528, %c0_529] : memref<9x8x16xf32, #tpu.memory_space<vmem>>, vector<1x8x16xf32>
    %480 = vector.shape_cast %479 : vector<1x8x16xf32> to vector<8x16xf32>
    %481 = arith.mulf %478, %480 : vector<8x16xf32>
    %c56_530 = arith.constant 56 : index
    %c0_531 = arith.constant 0 : index
    %482 = vector.load %arg9[%c56_530, %c0_531] : memref<80x256xf32, #tpu.memory_space<vmem>>, vector<8x16xf32>
    tpu.vector_store %arg9[%c56_530, %c0_531], %481 {strides = array<i32>} : memref<80x256xf32, #tpu.memory_space<vmem>>, vector<8x16xf32>,
    %c11_i32 = arith.constant 11 : i32
    %483 = tpu.dynamic_rotate %443 by %c11_i32 dim 1 : vector<8x16xf32>, i32 -> vector<8x16xf32>
    %c8_532 = arith.constant 8 : index
    %c0_533 = arith.constant 0 : index
    %c0_534 = arith.constant 0 : index
    %484 = vector.load %arg4[%c8_532, %c0_533, %c0_534] : memref<9x8x16xf32, #tpu.memory_space<vmem>>, vector<1x8x16xf32>
    %485 = vector.shape_cast %484 : vector<1x8x16xf32> to vector<8x16xf32>
    %486 = arith.mulf %483, %485 : vector<8x16xf32>
    %c64_535 = arith.constant 64 : index
    %c0_536 = arith.constant 0 : index
    %487 = vector.load %arg9[%c64_535, %c0_536] : memref<80x256xf32, #tpu.memory_space<vmem>>, vector<8x16xf32>
    tpu.vector_store %arg9[%c64_535, %c0_536], %486 {strides = array<i32>} : memref<80x256xf32, #tpu.memory_space<vmem>>, vector<8x16xf32>,
    %c0_537 = arith.constant 0 : index
    %c0_538 = arith.constant 0 : index
    %488 = vector.load %arg9[%c0_537, %c0_538] : memref<80x256xf32, #tpu.memory_space<vmem>>, vector<80x16xf32>
    %cst_539 = arith.constant dense<0.000000e+00> : vector<16x16xf32>
    %489 = tpu.matmul %446, %488, %cst_539 {dimension_numbers = #tpu.dot_dimension_numbers<[1], [0], [0], [1], [0, 0, 1, 1], [], []>} : vector<16x80xf32>, vector<80x16xf32>, vector<16x16xf32> -> vector<16x16xf32>
    %490 = vector.extract_strided_slice %489 {offsets = [0, 0], sizes = [8, 16], strides = [1, 1]} : vector<16x16xf32> to vector<8x16xf32>
    %491 = arith.addf %490, %444 : vector<8x16xf32>
    %cst_540 = arith.constant 0.000000e+00 : f32
    %492 = vector.broadcast %cst_540 : f32 to vector<8x16xf32>
    %493 = arith.maximumf %491, %492 : vector<8x16xf32>
    %c10 = arith.constant 10 : index
    %c0_541 = arith.constant 0 : index
    %c0_542 = arith.constant 0 : index
    %494 = vector.load %arg1[%c10, %c0_541, %c0_542] : memref<12x16x80xf32, #tpu.memory_space<vmem>>, vector<1x16x80xf32>
    %495 = vector.shape_cast %494 : vector<1x16x80xf32> to vector<16x80xf32>
    %c5_i32_543 = arith.constant 5 : i32
    %496 = tpu.dynamic_rotate %493 by %c5_i32_543 dim 1 : vector<8x16xf32>, i32 -> vector<8x16xf32>
    %c0_544 = arith.constant 0 : index
    %c0_545 = arith.constant 0 : index
    %c0_546 = arith.constant 0 : index
    %497 = vector.load %arg4[%c0_544, %c0_545, %c0_546] : memref<9x8x16xf32, #tpu.memory_space<vmem>>, vector<1x8x16xf32>
    %498 = vector.shape_cast %497 : vector<1x8x16xf32> to vector<8x16xf32>
    %499 = arith.mulf %496, %498 : vector<8x16xf32>
    %c0_547 = arith.constant 0 : index
    %c0_548 = arith.constant 0 : index
    %500 = vector.load %arg9[%c0_547, %c0_548] : memref<80x256xf32, #tpu.memory_space<vmem>>, vector<8x16xf32>
    tpu.vector_store %arg9[%c0_547, %c0_548], %499 {strides = array<i32>} : memref<80x256xf32, #tpu.memory_space<vmem>>, vector<8x16xf32>,
    %c4_i32_549 = arith.constant 4 : i32
    %501 = tpu.dynamic_rotate %493 by %c4_i32_549 dim 1 : vector<8x16xf32>, i32 -> vector<8x16xf32>
    %c1_550 = arith.constant 1 : index
    %c0_551 = arith.constant 0 : index
    %c0_552 = arith.constant 0 : index
    %502 = vector.load %arg4[%c1_550, %c0_551, %c0_552] : memref<9x8x16xf32, #tpu.memory_space<vmem>>, vector<1x8x16xf32>
    %503 = vector.shape_cast %502 : vector<1x8x16xf32> to vector<8x16xf32>
    %504 = arith.mulf %501, %503 : vector<8x16xf32>
    %c8_553 = arith.constant 8 : index
    %c0_554 = arith.constant 0 : index
    %505 = vector.load %arg9[%c8_553, %c0_554] : memref<80x256xf32, #tpu.memory_space<vmem>>, vector<8x16xf32>
    tpu.vector_store %arg9[%c8_553, %c0_554], %504 {strides = array<i32>} : memref<80x256xf32, #tpu.memory_space<vmem>>, vector<8x16xf32>,
    %c3_i32_555 = arith.constant 3 : i32
    %506 = tpu.dynamic_rotate %493 by %c3_i32_555 dim 1 : vector<8x16xf32>, i32 -> vector<8x16xf32>
    %c2_556 = arith.constant 2 : index
    %c0_557 = arith.constant 0 : index
    %c0_558 = arith.constant 0 : index
    %507 = vector.load %arg4[%c2_556, %c0_557, %c0_558] : memref<9x8x16xf32, #tpu.memory_space<vmem>>, vector<1x8x16xf32>
    %508 = vector.shape_cast %507 : vector<1x8x16xf32> to vector<8x16xf32>
    %509 = arith.mulf %506, %508 : vector<8x16xf32>
    %c16_559 = arith.constant 16 : index
    %c0_560 = arith.constant 0 : index
    %510 = vector.load %arg9[%c16_559, %c0_560] : memref<80x256xf32, #tpu.memory_space<vmem>>, vector<8x16xf32>
    tpu.vector_store %arg9[%c16_559, %c0_560], %509 {strides = array<i32>} : memref<80x256xf32, #tpu.memory_space<vmem>>, vector<8x16xf32>,
    %c1_i32_561 = arith.constant 1 : i32
    %511 = tpu.dynamic_rotate %493 by %c1_i32_561 dim 1 : vector<8x16xf32>, i32 -> vector<8x16xf32>
    %c3_562 = arith.constant 3 : index
    %c0_563 = arith.constant 0 : index
    %c0_564 = arith.constant 0 : index
    %512 = vector.load %arg4[%c3_562, %c0_563, %c0_564] : memref<9x8x16xf32, #tpu.memory_space<vmem>>, vector<1x8x16xf32>
    %513 = vector.shape_cast %512 : vector<1x8x16xf32> to vector<8x16xf32>
    %514 = arith.mulf %511, %513 : vector<8x16xf32>
    %c24_565 = arith.constant 24 : index
    %c0_566 = arith.constant 0 : index
    %515 = vector.load %arg9[%c24_565, %c0_566] : memref<80x256xf32, #tpu.memory_space<vmem>>, vector<8x16xf32>
    tpu.vector_store %arg9[%c24_565, %c0_566], %514 {strides = array<i32>} : memref<80x256xf32, #tpu.memory_space<vmem>>, vector<8x16xf32>,
    %c32_567 = arith.constant 32 : index
    %c0_568 = arith.constant 0 : index
    %516 = vector.load %arg9[%c32_567, %c0_568] : memref<80x256xf32, #tpu.memory_space<vmem>>, vector<8x16xf32>
    tpu.vector_store %arg9[%c32_567, %c0_568], %493 {strides = array<i32>} : memref<80x256xf32, #tpu.memory_space<vmem>>, vector<8x16xf32>,
    %c15_i32_569 = arith.constant 15 : i32
    %517 = tpu.dynamic_rotate %493 by %c15_i32_569 dim 1 : vector<8x16xf32>, i32 -> vector<8x16xf32>
    %c5_570 = arith.constant 5 : index
    %c0_571 = arith.constant 0 : index
    %c0_572 = arith.constant 0 : index
    %518 = vector.load %arg4[%c5_570, %c0_571, %c0_572] : memref<9x8x16xf32, #tpu.memory_space<vmem>>, vector<1x8x16xf32>
    %519 = vector.shape_cast %518 : vector<1x8x16xf32> to vector<8x16xf32>
    %520 = arith.mulf %517, %519 : vector<8x16xf32>
    %c40_573 = arith.constant 40 : index
    %c0_574 = arith.constant 0 : index
    %521 = vector.load %arg9[%c40_573, %c0_574] : memref<80x256xf32, #tpu.memory_space<vmem>>, vector<8x16xf32>
    tpu.vector_store %arg9[%c40_573, %c0_574], %520 {strides = array<i32>} : memref<80x256xf32, #tpu.memory_space<vmem>>, vector<8x16xf32>,
    %c13_i32_575 = arith.constant 13 : i32
    %522 = tpu.dynamic_rotate %493 by %c13_i32_575 dim 1 : vector<8x16xf32>, i32 -> vector<8x16xf32>
    %c6_576 = arith.constant 6 : index
    %c0_577 = arith.constant 0 : index
    %c0_578 = arith.constant 0 : index
    %523 = vector.load %arg4[%c6_576, %c0_577, %c0_578] : memref<9x8x16xf32, #tpu.memory_space<vmem>>, vector<1x8x16xf32>
    %524 = vector.shape_cast %523 : vector<1x8x16xf32> to vector<8x16xf32>
    %525 = arith.mulf %522, %524 : vector<8x16xf32>
    %c48_579 = arith.constant 48 : index
    %c0_580 = arith.constant 0 : index
    %526 = vector.load %arg9[%c48_579, %c0_580] : memref<80x256xf32, #tpu.memory_space<vmem>>, vector<8x16xf32>
    tpu.vector_store %arg9[%c48_579, %c0_580], %525 {strides = array<i32>} : memref<80x256xf32, #tpu.memory_space<vmem>>, vector<8x16xf32>,
    %c12_i32_581 = arith.constant 12 : i32
    %527 = tpu.dynamic_rotate %493 by %c12_i32_581 dim 1 : vector<8x16xf32>, i32 -> vector<8x16xf32>
    %c7_582 = arith.constant 7 : index
    %c0_583 = arith.constant 0 : index
    %c0_584 = arith.constant 0 : index
    %528 = vector.load %arg4[%c7_582, %c0_583, %c0_584] : memref<9x8x16xf32, #tpu.memory_space<vmem>>, vector<1x8x16xf32>
    %529 = vector.shape_cast %528 : vector<1x8x16xf32> to vector<8x16xf32>
    %530 = arith.mulf %527, %529 : vector<8x16xf32>
    %c56_585 = arith.constant 56 : index
    %c0_586 = arith.constant 0 : index
    %531 = vector.load %arg9[%c56_585, %c0_586] : memref<80x256xf32, #tpu.memory_space<vmem>>, vector<8x16xf32>
    tpu.vector_store %arg9[%c56_585, %c0_586], %530 {strides = array<i32>} : memref<80x256xf32, #tpu.memory_space<vmem>>, vector<8x16xf32>,
    %c11_i32_587 = arith.constant 11 : i32
    %532 = tpu.dynamic_rotate %493 by %c11_i32_587 dim 1 : vector<8x16xf32>, i32 -> vector<8x16xf32>
    %c8_588 = arith.constant 8 : index
    %c0_589 = arith.constant 0 : index
    %c0_590 = arith.constant 0 : index
    %533 = vector.load %arg4[%c8_588, %c0_589, %c0_590] : memref<9x8x16xf32, #tpu.memory_space<vmem>>, vector<1x8x16xf32>
    %534 = vector.shape_cast %533 : vector<1x8x16xf32> to vector<8x16xf32>
    %535 = arith.mulf %532, %534 : vector<8x16xf32>
    %c64_591 = arith.constant 64 : index
    %c0_592 = arith.constant 0 : index
    %536 = vector.load %arg9[%c64_591, %c0_592] : memref<80x256xf32, #tpu.memory_space<vmem>>, vector<8x16xf32>
    tpu.vector_store %arg9[%c64_591, %c0_592], %535 {strides = array<i32>} : memref<80x256xf32, #tpu.memory_space<vmem>>, vector<8x16xf32>,
    %c0_593 = arith.constant 0 : index
    %c0_594 = arith.constant 0 : index
    %537 = vector.load %arg9[%c0_593, %c0_594] : memref<80x256xf32, #tpu.memory_space<vmem>>, vector<80x16xf32>
    %cst_595 = arith.constant dense<0.000000e+00> : vector<16x16xf32>
    %538 = tpu.matmul %495, %537, %cst_595 {dimension_numbers = #tpu.dot_dimension_numbers<[1], [0], [0], [1], [0, 0, 1, 1], [], []>} : vector<16x80xf32>, vector<80x16xf32>, vector<16x16xf32> -> vector<16x16xf32>
    %539 = vector.extract_strided_slice %538 {offsets = [0, 0], sizes = [8, 16], strides = [1, 1]} : vector<16x16xf32> to vector<8x16xf32>
    %cst_596 = arith.constant 0.000000e+00 : f32
    %540 = vector.broadcast %cst_596 : f32 to vector<8x16xf32>
    %541 = arith.maximumf %539, %540 : vector<8x16xf32>
    %c11 = arith.constant 11 : index
    %c0_597 = arith.constant 0 : index
    %c0_598 = arith.constant 0 : index
    %542 = vector.load %arg1[%c11, %c0_597, %c0_598] : memref<12x16x80xf32, #tpu.memory_space<vmem>>, vector<1x16x80xf32>
    %543 = vector.shape_cast %542 : vector<1x16x80xf32> to vector<16x80xf32>
    %c5_i32_599 = arith.constant 5 : i32
    %544 = tpu.dynamic_rotate %541 by %c5_i32_599 dim 1 : vector<8x16xf32>, i32 -> vector<8x16xf32>
    %c0_600 = arith.constant 0 : index
    %c0_601 = arith.constant 0 : index
    %c0_602 = arith.constant 0 : index
    %545 = vector.load %arg4[%c0_600, %c0_601, %c0_602] : memref<9x8x16xf32, #tpu.memory_space<vmem>>, vector<1x8x16xf32>
    %546 = vector.shape_cast %545 : vector<1x8x16xf32> to vector<8x16xf32>
    %547 = arith.mulf %544, %546 : vector<8x16xf32>
    %c0_603 = arith.constant 0 : index
    %c0_604 = arith.constant 0 : index
    %548 = vector.load %arg9[%c0_603, %c0_604] : memref<80x256xf32, #tpu.memory_space<vmem>>, vector<8x16xf32>
    tpu.vector_store %arg9[%c0_603, %c0_604], %547 {strides = array<i32>} : memref<80x256xf32, #tpu.memory_space<vmem>>, vector<8x16xf32>,
    %c4_i32_605 = arith.constant 4 : i32
    %549 = tpu.dynamic_rotate %541 by %c4_i32_605 dim 1 : vector<8x16xf32>, i32 -> vector<8x16xf32>
    %c1_606 = arith.constant 1 : index
    %c0_607 = arith.constant 0 : index
    %c0_608 = arith.constant 0 : index
    %550 = vector.load %arg4[%c1_606, %c0_607, %c0_608] : memref<9x8x16xf32, #tpu.memory_space<vmem>>, vector<1x8x16xf32>
    %551 = vector.shape_cast %550 : vector<1x8x16xf32> to vector<8x16xf32>
    %552 = arith.mulf %549, %551 : vector<8x16xf32>
    %c8_609 = arith.constant 8 : index
    %c0_610 = arith.constant 0 : index
    %553 = vector.load %arg9[%c8_609, %c0_610] : memref<80x256xf32, #tpu.memory_space<vmem>>, vector<8x16xf32>
    tpu.vector_store %arg9[%c8_609, %c0_610], %552 {strides = array<i32>} : memref<80x256xf32, #tpu.memory_space<vmem>>, vector<8x16xf32>,
    %c3_i32_611 = arith.constant 3 : i32
    %554 = tpu.dynamic_rotate %541 by %c3_i32_611 dim 1 : vector<8x16xf32>, i32 -> vector<8x16xf32>
    %c2_612 = arith.constant 2 : index
    %c0_613 = arith.constant 0 : index
    %c0_614 = arith.constant 0 : index
    %555 = vector.load %arg4[%c2_612, %c0_613, %c0_614] : memref<9x8x16xf32, #tpu.memory_space<vmem>>, vector<1x8x16xf32>
    %556 = vector.shape_cast %555 : vector<1x8x16xf32> to vector<8x16xf32>
    %557 = arith.mulf %554, %556 : vector<8x16xf32>
    %c16_615 = arith.constant 16 : index
    %c0_616 = arith.constant 0 : index
    %558 = vector.load %arg9[%c16_615, %c0_616] : memref<80x256xf32, #tpu.memory_space<vmem>>, vector<8x16xf32>
    tpu.vector_store %arg9[%c16_615, %c0_616], %557 {strides = array<i32>} : memref<80x256xf32, #tpu.memory_space<vmem>>, vector<8x16xf32>,
    %c1_i32_617 = arith.constant 1 : i32
    %559 = tpu.dynamic_rotate %541 by %c1_i32_617 dim 1 : vector<8x16xf32>, i32 -> vector<8x16xf32>
    %c3_618 = arith.constant 3 : index
    %c0_619 = arith.constant 0 : index
    %c0_620 = arith.constant 0 : index
    %560 = vector.load %arg4[%c3_618, %c0_619, %c0_620] : memref<9x8x16xf32, #tpu.memory_space<vmem>>, vector<1x8x16xf32>
    %561 = vector.shape_cast %560 : vector<1x8x16xf32> to vector<8x16xf32>
    %562 = arith.mulf %559, %561 : vector<8x16xf32>
    %c24_621 = arith.constant 24 : index
    %c0_622 = arith.constant 0 : index
    %563 = vector.load %arg9[%c24_621, %c0_622] : memref<80x256xf32, #tpu.memory_space<vmem>>, vector<8x16xf32>
    tpu.vector_store %arg9[%c24_621, %c0_622], %562 {strides = array<i32>} : memref<80x256xf32, #tpu.memory_space<vmem>>, vector<8x16xf32>,
    %c32_623 = arith.constant 32 : index
    %c0_624 = arith.constant 0 : index
    %564 = vector.load %arg9[%c32_623, %c0_624] : memref<80x256xf32, #tpu.memory_space<vmem>>, vector<8x16xf32>
    tpu.vector_store %arg9[%c32_623, %c0_624], %541 {strides = array<i32>} : memref<80x256xf32, #tpu.memory_space<vmem>>, vector<8x16xf32>,
    %c15_i32_625 = arith.constant 15 : i32
    %565 = tpu.dynamic_rotate %541 by %c15_i32_625 dim 1 : vector<8x16xf32>, i32 -> vector<8x16xf32>
    %c5_626 = arith.constant 5 : index
    %c0_627 = arith.constant 0 : index
    %c0_628 = arith.constant 0 : index
    %566 = vector.load %arg4[%c5_626, %c0_627, %c0_628] : memref<9x8x16xf32, #tpu.memory_space<vmem>>, vector<1x8x16xf32>
    %567 = vector.shape_cast %566 : vector<1x8x16xf32> to vector<8x16xf32>
    %568 = arith.mulf %565, %567 : vector<8x16xf32>
    %c40_629 = arith.constant 40 : index
    %c0_630 = arith.constant 0 : index
    %569 = vector.load %arg9[%c40_629, %c0_630] : memref<80x256xf32, #tpu.memory_space<vmem>>, vector<8x16xf32>
    tpu.vector_store %arg9[%c40_629, %c0_630], %568 {strides = array<i32>} : memref<80x256xf32, #tpu.memory_space<vmem>>, vector<8x16xf32>,
    %c13_i32_631 = arith.constant 13 : i32
    %570 = tpu.dynamic_rotate %541 by %c13_i32_631 dim 1 : vector<8x16xf32>, i32 -> vector<8x16xf32>
    %c6_632 = arith.constant 6 : index
    %c0_633 = arith.constant 0 : index
    %c0_634 = arith.constant 0 : index
    %571 = vector.load %arg4[%c6_632, %c0_633, %c0_634] : memref<9x8x16xf32, #tpu.memory_space<vmem>>, vector<1x8x16xf32>
    %572 = vector.shape_cast %571 : vector<1x8x16xf32> to vector<8x16xf32>
    %573 = arith.mulf %570, %572 : vector<8x16xf32>
    %c48_635 = arith.constant 48 : index
    %c0_636 = arith.constant 0 : index
    %574 = vector.load %arg9[%c48_635, %c0_636] : memref<80x256xf32, #tpu.memory_space<vmem>>, vector<8x16xf32>
    tpu.vector_store %arg9[%c48_635, %c0_636], %573 {strides = array<i32>} : memref<80x256xf32, #tpu.memory_space<vmem>>, vector<8x16xf32>,
    %c12_i32_637 = arith.constant 12 : i32
    %575 = tpu.dynamic_rotate %541 by %c12_i32_637 dim 1 : vector<8x16xf32>, i32 -> vector<8x16xf32>
    %c7_638 = arith.constant 7 : index
    %c0_639 = arith.constant 0 : index
    %c0_640 = arith.constant 0 : index
    %576 = vector.load %arg4[%c7_638, %c0_639, %c0_640] : memref<9x8x16xf32, #tpu.memory_space<vmem>>, vector<1x8x16xf32>
    %577 = vector.shape_cast %576 : vector<1x8x16xf32> to vector<8x16xf32>
    %578 = arith.mulf %575, %577 : vector<8x16xf32>
    %c56_641 = arith.constant 56 : index
    %c0_642 = arith.constant 0 : index
    %579 = vector.load %arg9[%c56_641, %c0_642] : memref<80x256xf32, #tpu.memory_space<vmem>>, vector<8x16xf32>
    tpu.vector_store %arg9[%c56_641, %c0_642], %578 {strides = array<i32>} : memref<80x256xf32, #tpu.memory_space<vmem>>, vector<8x16xf32>,
    %c11_i32_643 = arith.constant 11 : i32
    %580 = tpu.dynamic_rotate %541 by %c11_i32_643 dim 1 : vector<8x16xf32>, i32 -> vector<8x16xf32>
    %c8_644 = arith.constant 8 : index
    %c0_645 = arith.constant 0 : index
    %c0_646 = arith.constant 0 : index
    %581 = vector.load %arg4[%c8_644, %c0_645, %c0_646] : memref<9x8x16xf32, #tpu.memory_space<vmem>>, vector<1x8x16xf32>
    %582 = vector.shape_cast %581 : vector<1x8x16xf32> to vector<8x16xf32>
    %583 = arith.mulf %580, %582 : vector<8x16xf32>
    %c64_647 = arith.constant 64 : index
    %c0_648 = arith.constant 0 : index
    %584 = vector.load %arg9[%c64_647, %c0_648] : memref<80x256xf32, #tpu.memory_space<vmem>>, vector<8x16xf32>
    tpu.vector_store %arg9[%c64_647, %c0_648], %583 {strides = array<i32>} : memref<80x256xf32, #tpu.memory_space<vmem>>, vector<8x16xf32>,
    %c0_649 = arith.constant 0 : index
    %c0_650 = arith.constant 0 : index
    %585 = vector.load %arg9[%c0_649, %c0_650] : memref<80x256xf32, #tpu.memory_space<vmem>>, vector<80x16xf32>
    %cst_651 = arith.constant dense<0.000000e+00> : vector<16x16xf32>
    %586 = tpu.matmul %543, %585, %cst_651 {dimension_numbers = #tpu.dot_dimension_numbers<[1], [0], [0], [1], [0, 0, 1, 1], [], []>} : vector<16x80xf32>, vector<80x16xf32>, vector<16x16xf32> -> vector<16x16xf32>
    %587 = vector.extract_strided_slice %586 {offsets = [0, 0], sizes = [8, 16], strides = [1, 1]} : vector<16x16xf32> to vector<8x16xf32>
    %588 = arith.addf %587, %493 : vector<8x16xf32>
    %cst_652 = arith.constant 0.000000e+00 : f32
    %589 = vector.broadcast %cst_652 : f32 to vector<8x16xf32>
    %590 = arith.maximumf %588, %589 : vector<8x16xf32>
    %c15_i32_653 = arith.constant 15 : i32
    %591 = tpu.dynamic_rotate %590 by %c15_i32_653 dim 1 : vector<8x16xf32>, i32 -> vector<8x16xf32>
    %592 = arith.maximumf %590, %591 : vector<8x16xf32>
    %c12_i32_654 = arith.constant 12 : i32
    %593 = tpu.dynamic_rotate %590 by %c12_i32_654 dim 1 : vector<8x16xf32>, i32 -> vector<8x16xf32>
    %594 = arith.maximumf %592, %593 : vector<8x16xf32>
    %c11_i32_655 = arith.constant 11 : i32
    %595 = tpu.dynamic_rotate %590 by %c11_i32_655 dim 1 : vector<8x16xf32>, i32 -> vector<8x16xf32>
    %596 = arith.maximumf %594, %595 : vector<8x16xf32>
    %c0_656 = arith.constant 0 : index
    %c0_657 = arith.constant 0 : index
    %597 = vector.load %arg7[%c0_656, %c0_657] : memref<16x4xf32, #tpu.memory_space<vmem>>, vector<16x4xf32>
    %cst_658 = arith.constant dense<0.000000e+00> : vector<8x4xf32>
    %598 = tpu.matmul %596, %597, %cst_658 {dimension_numbers = #tpu.dot_dimension_numbers<[1], [0], [0], [1], [0, 0, 1, 1], [], []>} : vector<8x16xf32>, vector<16x4xf32>, vector<8x4xf32> -> vector<8x4xf32>
    %c0_659 = arith.constant 0 : index
    %c0_660 = arith.constant 0 : index
    %599 = vector.load %arg8[%c0_659, %c0_660] : memref<8x4xf32, #tpu.memory_space<vmem>>, vector<8x4xf32>
    tpu.vector_store %arg8[%c0_659, %c0_660], %598 {strides = array<i32>} : memref<8x4xf32, #tpu.memory_space<vmem>>, vector<8x4xf32>,
    return
  }
}

</mosaic_0001>

<bundles_post_ra>
// kernel: _lambda_.1
= control target key start
LH: loop header
LB: loop body
LE: loop exit
PB: predicated region body
PF: predicated region fallthrough
CT: control target
= control target key end

     0   :  { %13 = vsyncpa [#allocation4], 0  ;;  %s4425_s0 = inlined_call_operand.vmem [shape: f32[8,256], index: 0, kind: input, shape index: {}]   ;;  %s4426_s1 = inlined_call_operand.hbm [shape: f32[12,16,80], index: 1, kind: input, shape index: {}]   ;;  %s4427_s2 = inlined_call_operand.vmem [shape: f32[9,8,256], index: 2, kind: input, shape index: {}]   ;;  %s4428_s3 = inlined_call_operand.hbm [shape: f32[9,8,64], index: 3, kind: input, shape index: {}]   ;;  %s4429_s4 = inlined_call_operand.hbm [shape: f32[9,8,16], index: 4, kind: input, shape index: {}]   ;;  %s4430_s5 = inlined_call_operand.hbm [shape: f32[256,64], index: 5, kind: input, shape index: {}]   ;;  %s4431_s6 = inlined_call_operand.hbm [shape: f32[64,16], index: 6, kind: input, shape index: {}]   ;;  %s4432_s7 = inlined_call_operand.hbm [shape: f32[16,4], index: 7, kind: input, shape index: {}]   ;;  %s4433_s8 = inlined_call_operand.vmem [shape: f32[8,4], index: 8, kind: output, shape index: {}]  }
   0x1   :  { %14 = vsyncpa [#allocation6], 0 }
   0x2   :  { %15 = vsyncpa [#allocation9], 0 }
   0x3   :  { %16 = vsyncpa [#allocation12], 0  ;;  %s3397_s27 = smov [#allocation5]   ;;  %s3398_s29 = smov [#allocation8]  }
   0x4   :  { %s38_s28 = sshll.u32 %s3397_s27, 4  ;;  %s62_s30 = sshll.u32 %s3398_s29, 4  ;;  %s39_s28 = int_to_ptr.vmem [resolvable:$true] %s38_s28  ;;  %s63_s30 = int_to_ptr.vmem [resolvable:$true] %s62_s30 }
   0x5   :  { %s3277_s9 = scalar_lea.vmem %s39_s28, 1152  ;;  %p3282_p1 = scmp.lt.s32.totalorder %s39_s28, %s39_s28 }
   0x6   :  { %p3278_p0 = scmp.ne.s32.totalorder %s39_s28, %s3277_s9  ;;  %p3283_p2 = scmp.lt.s32.totalorder %s3277_s9, %s3277_s9 }
   0x8   :  { %p3284_p3 = por %p3283_p2, %p3282_p1 }
   0xa   :  { %p3285_p4 = pnand %p3284_p3, %p3278_p0 }
   0xc   :  { %3288 = shalt.err (!%p3285_p4)
}
   0xd   :  { %s3399_s10 = smov 128   ;;  %s3400_s11 = smov 8  }
   0xe   :  { %44 = dma.hbm_to_vmem [thread:$0]  %s4428_s3, 1152, %s39_s28, [#allocation6], %s3399_s10, %s3399_s10, %s3400_s11  }
   0xf   :  { %s3297_s14 = scalar_lea.vmem %s63_s30, 4096  ;;  %p3302_p6 = scmp.lt.s32.totalorder %s63_s30, %s63_s30 }
  0x10   :  { %p3298_p5 = scmp.ne.s32.totalorder %s63_s30, %s3297_s14  ;;  %p3303_p7 = scmp.lt.s32.totalorder %s3297_s14, %s3297_s14 }
  0x12   :  { %p3304_p8 = por %p3303_p7, %p3302_p6 }
  0x14   :  { %p3305_p9 = pnand %p3304_p8, %p3298_p5 }
  0x16   :  { %3308 = shalt.err (!%p3305_p9)
}
  0x17   :  { %68 = dma.hbm_to_vmem [thread:$0]  %s4430_s5, 4096, %s63_s30, [#allocation9], %s3399_s10, %s3399_s10, %s3400_s11  }
  0x18   :  { %s3401_s17 = smov [#allocation3]   ;;  %s3402_s19 = smov [#allocation7]  }
  0x19   :  { %s24_s18 = sshll.u32 %s3401_s17, 4  ;;  %s50_s20 = sshll.u32 %s3402_s19, 4  ;;  %s25_s18 = int_to_ptr.vmem [resolvable:$true] %s24_s18  ;;  %s51_s20 = int_to_ptr.vmem [resolvable:$true] %s50_s20 }
  0x1a   :  { %s3317_s3 = scalar_lea.vmem %s25_s18, 3072  ;;  %p3322_p11 = scmp.lt.s32.totalorder %s25_s18, %s25_s18 }
  0x1b   :  { %p3318_p10 = scmp.ne.s32.totalorder %s25_s18, %s3317_s3  ;;  %p3323_p12 = scmp.lt.s32.totalorder %s3317_s3, %s3317_s3 }
  0x1d   :  { %p3324_p13 = por %p3323_p12, %p3322_p11 }
  0x1f   :  { %p3325_p0 = pnand %p3324_p13, %p3318_p10 }
  0x21   :  { %3328 = shalt.err (!%p3325_p0)
}
  0x22   :  { %30 = dma.hbm_to_vmem [thread:$0]  %s4426_s1, 3072, %s25_s18, [#allocation4], %s3399_s10, %s3399_s10, %s3400_s11  }
  0x23   :  { %s3337_s5 = scalar_lea.vmem %s51_s20, 1152  ;;  %p3342_p2 = scmp.lt.s32.totalorder %s51_s20, %s51_s20 }
  0x24   :  { %p3338_p1 = scmp.ne.s32.totalorder %s51_s20, %s3337_s5  ;;  %p3343_p3 = scmp.lt.s32.totalorder %s3337_s5, %s3337_s5 }
  0x26   :  { %p3344_p4 = por %p3343_p3, %p3342_p2 }
  0x28   :  { %p3345_p5 = pnand %p3344_p4, %p3338_p1 }
  0x2a   :  { %3348 = shalt.err (!%p3345_p5)
}
  0x2b   :  { %56 = dma.hbm_to_vmem [thread:$0]  %s4429_s4, 1152, %s51_s20, [#allocation6], %s3399_s10, %s3399_s10, %s3400_s11  }
  0x2c   :  { %s3403_s25 = smov [#allocation10]   ;;  %s3404_s27 = smov [#allocation11]  }
  0x2d   :  { %s74_s26 = sshll.u32 %s3403_s25, 4  ;;  %s86_s28 = sshll.u32 %s3404_s27, 4  ;;  %s75_s26 = int_to_ptr.vmem [resolvable:$true] %s74_s26  ;;  %s87_s28 = int_to_ptr.vmem [resolvable:$true] %s86_s28 }
  0x2e   :  { %s3357_s1 = scalar_lea.vmem %s75_s26, 1024  ;;  %p3362_p7 = scmp.lt.s32.totalorder %s75_s26, %s75_s26 }
  0x2f   :  { %p3358_p6 = scmp.ne.s32.totalorder %s75_s26, %s3357_s1  ;;  %p3363_p8 = scmp.lt.s32.totalorder %s3357_s1, %s3357_s1 }
  0x31   :  { %p3364_p9 = por %p3363_p8, %p3362_p7 }
  0x33   :  { %p3365_p10 = pnand %p3364_p9, %p3358_p6 }
  0x35   :  { %3368 = shalt.err (!%p3365_p10)
}
  0x36   :  { %80 = dma.hbm_to_vmem [thread:$0]  %s4431_s6, 1024, %s75_s26, [#allocation9], %s3399_s10, %s3399_s10, %s3400_s11  }
  0x37   :  { %s3377_s4 = scalar_lea.vmem %s87_s28, 256  ;;  %p3382_p12 = scmp.lt.s32.totalorder %s87_s28, %s87_s28 }
  0x38   :  { %p3378_p11 = scmp.ne.s32.totalorder %s87_s28, %s3377_s4  ;;  %p3383_p13 = scmp.lt.s32.totalorder %s3377_s4, %s3377_s4 }
  0x3a   :  { %p3384_p0 = por %p3383_p13, %p3382_p12 }
  0x3c   :  { %p3385_p1 = pnand %p3384_p0, %p3378_p11 }
  0x3e   :  { %3388 = shalt.err (!%p3385_p1)
}
  0x3f   :  { %92 = dma.hbm_to_vmem [thread:$0]  %s4432_s7, 256, %s87_s28, [#allocation12], %s3399_s10, %s3399_s10, %s3400_s11  }
  0x40   :  { %3389 = dma.done.wait [#allocation4], 3072  }
  0x41   :  { %3390 = vsyncadd [#allocation4], 4294964224 }
  0x42   :  { %3391 = dma.done.wait [#allocation6], 2304  }
  0x43   :  { %3392 = vsyncadd [#allocation6], 4294964992 }
  0x44   :  { %3393 = dma.done.wait [#allocation9], 5120  }
  0x45   :  { %3394 = vsyncadd [#allocation9], 4294962176 }
  0x46   :  { %3395 = dma.done.wait [#allocation12], 256  }
  0x47   :  { %3396 = vsyncadd [#allocation12], 4294967040  ;;  %v3405_v0 = vmov 1.0   ;;  %v3531_v1 = vld [vmem:[%s4425_s0] sm:$0xff]  ;;  %s3406_s10 = smov 112   ;;  %s3407_s13 = smov 111   ;;  %v121_v4 = vlaneseq }
  0x48   :  { %112 = vst [vmem:[#allocation2 + $0x98] sm:$0xff] %v3405_v0  ;;  %271 = vmatprep.subr.mxu0 %v3405_v0  ;;  %475 = vmatprep.subr.mxu1 %v3405_v0  ;;  %v3540_v2 = vld [vmem:[%s4425_s0 + $0x8] sm:$0xff]  ;;  %s3408_s16 = smov 113   ;;  %s3409_s17 = smov 127   ;;  %v3411_v3 = vmov 0.0   ;;  %v3579_v8 = vld [vmem:[%s4427_s2 + $0x80] sm:$0xff] }
  0x49   :  { %272 = vmatpush1.msra.mxu0 %v3405_v0  ;;  %476 = vmatpush1.msra.mxu1 %v3405_v0  ;;  %s3410_s0 = smov 1   ;;  %s3412_s18 = smov 15   ;;  %v3572_v5 = vand.u32 127, %v121_v4  ;;  %v3584_v9 = vld [vmem:[%s4427_s2 + $0x88] sm:$0xff]  ;;  %v3589_v12 = vld [vmem:[%s4427_s2 + $0x78] sm:$0xff]  ;;  %v3600_v16 = vld [vmem:[%s4427_s2 + $0x70] sm:$0xff] }
  0x4a   :  { %204 = vrot.lane.b32.xlu1 %v3531_v1, %s3406_s10  ;;  %218 = vrot.lane.b32.xlu0 %v3531_v1, %s3407_s13  ;;  %s3413_s19 = smov 16   ;;  %s3414_s20 = smov 17   ;;  %v3610_v20 = vld [vmem:[%s4427_s2 + $0x60] sm:$0xff]  ;;  %v3615_v21 = vld [vmem:[%s4427_s2 + $0x68] sm:$0xff]  ;;  %vm252_vm8 = vcmask 654336   ;;  %vm1284_vm9 = vcmask 523264  }
  0x4b   :  { %323 = vmatprep.mubr.f32.mxu0 %v3411_v3  ;;  %527 = vmatprep.mubr.f32.mxu1 %v3411_v3  ;;  %vm208_vm0 = vcmp.lt.s32.totalorder %v3572_v5, 112  ;;  %vm222_vm1 = vcmp.lt.s32.totalorder %v3572_v5, 111  ;;  %vm194_vm2 = vcmp.lt.s32.totalorder %v3572_v5, 113  ;;  %vm180_vm3 = vcmp.lt.s32.totalorder %v3572_v5, 127  ;;  %v3629_v30 = vld [vmem:[%s4427_s2 + $0x50] sm:$0xff]  ;;  %v3634_v31 = vld [vmem:[%s4427_s2 + $0x58] sm:$0xff] }
  0x4c   :  { %vm164_vm4 = vcmp.lt.s32.totalorder %v3572_v5, 1  ;;  %v3646_v38 = vld [vmem:[%s4427_s2 + $0x30] sm:$0xff]  ;;  %v3651_v39 = vld [vmem:[%s4427_s2 + $0x38] sm:$0xff]  ;;  %vm150_vm5 = vcmp.lt.s32.totalorder %v3572_v5, 15  ;;  %v3664_v46 = vld [vmem:[%s4427_s2 + $0x20] sm:$0xff]  ;;  %vm136_vm6 = vcmp.lt.s32.totalorder %v3572_v5, 16 }
  0x4d   :  { %v3669_v47 = vld [vmem:[%s4427_s2 + $0x28] sm:$0xff]  ;;  %v3682_v54 = vld [vmem:[%s4427_s2 + $0x10] sm:$0xff]  ;;  %v3687_v55 = vld [vmem:[%s4427_s2 + $0x18] sm:$0xff]  ;;  %vm123_vm7 = vcmp.lt.s32.totalorder %v3572_v5, 17  ;;  %s3416_s14 = smov 9   ;;  %s3417_s15 = smov 7  }
  0x4e   :  { %206 = vrot.lane.b32.xlu1 %v3540_v2, %s3406_s10  ;;  %220 = vrot.lane.b32.xlu0 %v3540_v2, %s3407_s13  ;;  %v3699_v62 = vld [vmem:[%s4427_s2] sm:$0xff]  ;;  %v3704_v63 = vld [vmem:[%s4427_s2 + $0x8] sm:$0xff]  ;;  %s3418_s3 = smov 63   ;;  %s3419_s21 = smov 56   ;;  %vm1267_vm10 = vcmask 1048064   ;;  %vm2141_vm11 = vcmask 130048  }
  0x4f   :  { %s3420_s22 = smov 57   ;;  %s3421_s5 = smov 55   ;;  %vm2124_vm12 = vcmask 1047680   ;;  %vm3441_vm13 = vmmov 0   ;;  %vm2793_vm14 = vcmask 31744  }
  0x50   :  { %s3422_s23 = smov 119   ;;  %s3423_s24 = smov 120  }
  0x51   :  { %s3424_s25 = smov 121   ;;  %s3425_s26 = smov 65  }
  0x52   :  { %192 = vrot.lane.b32.xlu1 %v3540_v2, %s3408_s16  ;;  %190 = vrot.lane.b32.xlu0 %v3531_v1, %s3408_s16  ;;  %s3426_s27 = smov 71   ;;  %s3427_s28 = smov 72  }
  0x53   :  { %s3428_s1 = smov 73   ;;  %s3430_s29 = smov 3  }
  0x54   :  { %s3434_s30 = smov 11   ;;  %s3435_s4 = smov 123  }
  0x55   :  { %s3436_s9 = smov 124   ;;  %s3437_s12 = smov 125  }
  0x56   :  { %178 = vrot.lane.b32.xlu1 %v3540_v2, %s3409_s17  ;;  %176 = vrot.lane.b32.xlu0 %v3531_v1, %s3409_s17  ;;  %s3438_s6 = smov 115   ;;  %s3439_s7 = smov 116  }
  0x5a   :  { %162 = vrot.lane.b32.xlu1 %v3540_v2, %s3410_s0  ;;  %160 = vrot.lane.b32.xlu0 %v3531_v1, %s3410_s0 }
  0x5e   :  { %148 = vrot.lane.b32.xlu1 %v3540_v2, %s3412_s18  ;;  %146 = vrot.lane.b32.xlu0 %v3531_v1, %s3412_s18 }
  0x62   :  { %134 = vrot.lane.b32.xlu1 %v3540_v2, %s3413_s19  ;;  %132 = vrot.lane.b32.xlu0 %v3531_v1, %s3413_s19 }
  0x66   :  { %119 = vrot.lane.b32.xlu1 %v3540_v2, %s3414_s20  ;;  %117 = vrot.lane.b32.xlu0 %v3531_v1, %s3414_s20 }
  0xbc   :  { %v205_v6 = vpop.permute.xlu1 %204  ;;  %v219_v7 = vpop.permute.xlu0 %218 }
  0xc0   :  { %v207_v10 = vpop.permute.xlu1 %206  ;;  %v221_v11 = vpop.permute.xlu0 %220 }
  0xc1   :  { %v210_v13 = vsel %vm208_vm0, %v207_v10, %v205_v6  ;;  %v223_v14 = vsel %vm222_vm1, %v219_v7, %v221_v11  ;;  %v224_v15 = vsel %vm222_vm1, %v221_v11, %v219_v7  ;;  %v209_v17 = vsel %vm208_vm0, %v205_v6, %v207_v10 }
  0xc2   :  { %v228_v18 = vmul.f32 %v3579_v8, %v223_v14  ;;  %v229_v19 = vmul.f32 %v3584_v9, %v224_v15  ;;  %v215_v22 = vmul.f32 %v3589_v12, %v210_v13  ;;  %v214_v25 = vmul.f32 %v3600_v16, %v209_v17  ;;  %v115_v14 = vld [vmem:[#allocation3] sm:$0xff] }
  0xc4   :  { %v193_v23 = vpop.permute.xlu1 %192  ;;  %v191_v24 = vpop.permute.xlu0 %190  ;;  %273 = vmatprep.subr.mxu0 %v229_v19 }
  0xc5   :  { %v195_v26 = vsel %vm194_vm2, %v191_v24, %v193_v23  ;;  %v196_v27 = vsel %vm194_vm2, %v193_v23, %v191_v24  ;;  %274 = vmatpush1.msra.mxu0 %v228_v18 }
  0xc6   :  { %v200_v28 = vmul.f32 %v3610_v20, %v195_v26  ;;  %v201_v29 = vmul.f32 %v3615_v21, %v196_v27  ;;  %275 = vmatprep.subr.mxu0 %v215_v22 }
  0xc7   :  { %276 = vmatpush1.msra.mxu0 %v214_v25 }
  0xc8   :  { %v179_v32 = vpop.permute.xlu1 %178  ;;  %v177_v33 = vpop.permute.xlu0 %176  ;;  %277 = vmatprep.subr.mxu0 %v201_v29 }
  0xc9   :  { %v181_v34 = vsel %vm180_vm3, %v177_v33, %v179_v32  ;;  %v182_v35 = vsel %vm180_vm3, %v179_v32, %v177_v33  ;;  %278 = vmatpush1.msra.mxu0 %v200_v28 }
  0xca   :  { %v186_v36 = vmul.f32 %v3629_v30, %v181_v34  ;;  %v187_v37 = vmul.f32 %v3634_v31, %v182_v35 }
  0xcc   :  { %v163_v40 = vpop.permute.xlu1 %162  ;;  %v161_v41 = vpop.permute.xlu0 %160  ;;  %279 = vmatprep.subr.mxu0 %v187_v37 }
  0xcd   :  { %v165_v42 = vsel %vm164_vm4, %v161_v41, %v163_v40  ;;  %v166_v43 = vsel %vm164_vm4, %v163_v40, %v161_v41  ;;  %280 = vmatpush1.msra.mxu0 %v186_v36 }
  0xce   :  { %v170_v44 = vmul.f32 %v3646_v38, %v166_v43  ;;  %v171_v45 = vmul.f32 %v3651_v39, %v165_v42  ;;  %281 = vmatprep.subr.mxu0 %v3540_v2 }
  0xcf   :  { %282 = vmatpush1.msra.mxu0 %v3531_v1 }
  0xd0   :  { %v149_v48 = vpop.permute.xlu1 %148  ;;  %v147_v49 = vpop.permute.xlu0 %146  ;;  %283 = vmatprep.subr.mxu0 %v171_v45 }
  0xd1   :  { %v151_v50 = vsel %vm150_vm5, %v147_v49, %v149_v48  ;;  %v152_v51 = vsel %vm150_vm5, %v149_v48, %v147_v49  ;;  %284 = vmatpush1.msra.mxu0 %v170_v44 }
  0xd2   :  { %v156_v52 = vmul.f32 %v3664_v46, %v152_v51  ;;  %v157_v53 = vmul.f32 %v3669_v47, %v151_v50 }
  0xd4   :  { %v135_v56 = vpop.permute.xlu1 %134  ;;  %v133_v57 = vpop.permute.xlu0 %132  ;;  %285 = vmatprep.subr.mxu0 %v157_v53 }
  0xd5   :  { %v137_v58 = vsel %vm136_vm6, %v133_v57, %v135_v56  ;;  %v138_v59 = vsel %vm136_vm6, %v135_v56, %v133_v57  ;;  %286 = vmatpush1.msra.mxu0 %v156_v52 }
  0xd6   :  { %v142_v60 = vmul.f32 %v3682_v54, %v138_v59  ;;  %v143_v61 = vmul.f32 %v3687_v55, %v137_v58 }
  0xd8   :  { %v120_v4 = vpop.permute.xlu1 %119  ;;  %v118_v6 = vpop.permute.xlu0 %117  ;;  %287 = vmatprep.subr.mxu0 %v143_v61 }
  0xd9   :  { %v124_v7 = vsel %vm123_vm7, %v118_v6, %v120_v4  ;;  %v125_v10 = vsel %vm123_vm7, %v120_v4, %v118_v6  ;;  %288 = vmatpush1.msra.mxu0 %v142_v60 }
  0xda   :  { %v128_v11 = vmul.f32 %v3699_v62, %v125_v10  ;;  %v129_v13 = vmul.f32 %v3704_v63, %v124_v7 }
  0xdc   :  { %289 = vmatprep.subr.mxu0 %v129_v13 }
  0xdd   :  { %290 = vmatpush1.msra.mxu0 %v128_v11 }
  0xde   :  { %2817 = vmatmul.mubr.msk.f32.vlgmr.msra.gmra.mxu0 %vm252_vm8, %v115_v14  ;;  %681 = vmatprep.subr.mxu0 %v3405_v0 }
  0xdf   :  { %682 = vmatpush1.msra.mxu0 %v3405_v0  ;;  %329 = vmatprep.mubr.f32.mxu0 %v3411_v3 }
 0x19e   :  { %v325_v15 = vpop.f32.mrf.mxu0 }
 0x19f   :  { %v334_v17 = vmax.f32 %v325_v15, 0.0 }
 0x1a0   :  { %v327_v18 = vpop.f32.mrf.mxu0 }
 0x1a1   :  { %v335_v19 = vmax.f32 %v327_v18, 0.0  ;;  %425 = vrot.lane.b32.xlu0 %v334_v17, %s3407_s13 }
 0x1a3   :  { %427 = vrot.lane.b32.xlu1 %v335_v19, %s3407_s13 }
 0x1a5   :  { %413 = vrot.lane.b32.xlu0 %v334_v17, %s3406_s10 }
 0x1a7   :  { %415 = vrot.lane.b32.xlu1 %v335_v19, %s3406_s10 }
 0x1a9   :  { %401 = vrot.lane.b32.xlu0 %v334_v17, %s3408_s16 }
 0x1ab   :  { %403 = vrot.lane.b32.xlu1 %v335_v19, %s3408_s16 }
 0x1ad   :  { %389 = vrot.lane.b32.xlu0 %v334_v17, %s3409_s17 }
 0x1af   :  { %391 = vrot.lane.b32.xlu1 %v335_v19, %s3409_s17 }
 0x1b1   :  { %375 = vrot.lane.b32.xlu0 %v334_v17, %s3410_s0 }
 0x1b3   :  { %377 = vrot.lane.b32.xlu1 %v335_v19, %s3410_s0 }
 0x1b5   :  { %363 = vrot.lane.b32.xlu0 %v334_v17, %s3412_s18 }
 0x1b7   :  { %365 = vrot.lane.b32.xlu1 %v335_v19, %s3412_s18 }
 0x1b9   :  { %351 = vrot.lane.b32.xlu0 %v334_v17, %s3413_s19 }
 0x1bb   :  { %353 = vrot.lane.b32.xlu1 %v335_v19, %s3413_s19 }
 0x1bd   :  { %339 = vrot.lane.b32.xlu0 %v334_v17, %s3414_s20 }
 0x1bf   :  { %341 = vrot.lane.b32.xlu1 %v335_v19, %s3414_s20 }
 0x213   :  { %v426_v22 = vpop.permute.xlu0 %425 }
 0x215   :  { %v428_v23 = vpop.permute.xlu1 %427 }
 0x216   :  { %v429_v24 = vsel %vm222_vm1, %v426_v22, %v428_v23  ;;  %v430_v25 = vsel %vm222_vm1, %v428_v23, %v426_v22 }
 0x217   :  { %v433_v26 = vmul.f32 %v3579_v8, %v429_v24  ;;  %v434_v27 = vmul.f32 %v3584_v9, %v430_v25  ;;  %v414_v28 = vpop.permute.xlu0 %413 }
 0x219   :  { %v416_v29 = vpop.permute.xlu1 %415  ;;  %477 = vmatprep.subr.mxu1 %v434_v27  ;;  %v337_v27 = vld [vmem:[#allocation3 + $0x10] sm:$0xff] }
 0x21a   :  { %v417_v32 = vsel %vm208_vm0, %v414_v28, %v416_v29  ;;  %v418_v33 = vsel %vm208_vm0, %v416_v29, %v414_v28  ;;  %478 = vmatpush1.msra.mxu1 %v433_v26 }
 0x21b   :  { %v421_v34 = vmul.f32 %v3600_v16, %v417_v32  ;;  %v422_v35 = vmul.f32 %v3589_v12, %v418_v33  ;;  %v402_v36 = vpop.permute.xlu0 %401 }
 0x21d   :  { %v404_v37 = vpop.permute.xlu1 %403  ;;  %479 = vmatprep.subr.mxu1 %v422_v35 }
 0x21e   :  { %v405_v40 = vsel %vm194_vm2, %v402_v36, %v404_v37  ;;  %v406_v41 = vsel %vm194_vm2, %v404_v37, %v402_v36  ;;  %480 = vmatpush1.msra.mxu1 %v421_v34 }
 0x21f   :  { %v409_v42 = vmul.f32 %v3610_v20, %v405_v40  ;;  %v410_v43 = vmul.f32 %v3615_v21, %v406_v41  ;;  %v390_v44 = vpop.permute.xlu0 %389 }
 0x221   :  { %v392_v45 = vpop.permute.xlu1 %391  ;;  %481 = vmatprep.subr.mxu1 %v410_v43 }
 0x222   :  { %v393_v48 = vsel %vm180_vm3, %v390_v44, %v392_v45  ;;  %v394_v49 = vsel %vm180_vm3, %v392_v45, %v390_v44  ;;  %482 = vmatpush1.msra.mxu1 %v409_v42 }
 0x223   :  { %v397_v50 = vmul.f32 %v3629_v30, %v393_v48  ;;  %v398_v51 = vmul.f32 %v3634_v31, %v394_v49  ;;  %v376_v52 = vpop.permute.xlu0 %375 }
 0x225   :  { %v378_v53 = vpop.permute.xlu1 %377  ;;  %483 = vmatprep.subr.mxu1 %v398_v51 }
 0x226   :  { %v379_v56 = vsel %vm164_vm4, %v376_v52, %v378_v53  ;;  %v380_v57 = vsel %vm164_vm4, %v378_v53, %v376_v52  ;;  %484 = vmatpush1.msra.mxu1 %v397_v50 }
 0x227   :  { %v383_v58 = vmul.f32 %v3646_v38, %v380_v57  ;;  %v384_v59 = vmul.f32 %v3651_v39, %v379_v56  ;;  %v364_v60 = vpop.permute.xlu0 %363  ;;  %485 = vmatprep.subr.mxu1 %v335_v19 }
 0x228   :  { %486 = vmatpush1.msra.mxu1 %v334_v17 }
 0x229   :  { %v366_v61 = vpop.permute.xlu1 %365  ;;  %487 = vmatprep.subr.mxu1 %v384_v59 }
 0x22a   :  { %v367_v4 = vsel %vm150_vm5, %v364_v60, %v366_v61  ;;  %v368_v6 = vsel %vm150_vm5, %v366_v61, %v364_v60  ;;  %488 = vmatpush1.msra.mxu1 %v383_v58 }
 0x22b   :  { %v371_v7 = vmul.f32 %v3664_v46, %v368_v6  ;;  %v372_v10 = vmul.f32 %v3669_v47, %v367_v4  ;;  %v352_v11 = vpop.permute.xlu0 %351 }
 0x22d   :  { %v354_v13 = vpop.permute.xlu1 %353  ;;  %489 = vmatprep.subr.mxu1 %v372_v10 }
 0x22e   :  { %v355_v14 = vsel %vm136_vm6, %v352_v11, %v354_v13  ;;  %v356_v15 = vsel %vm136_vm6, %v354_v13, %v352_v11  ;;  %490 = vmatpush1.msra.mxu1 %v371_v7 }
 0x22f   :  { %v359_v17 = vmul.f32 %v3682_v54, %v356_v15  ;;  %v360_v18 = vmul.f32 %v3687_v55, %v355_v14  ;;  %v340_v19 = vpop.permute.xlu0 %339 }
 0x231   :  { %v342_v22 = vpop.permute.xlu1 %341  ;;  %491 = vmatprep.subr.mxu1 %v360_v18 }
 0x232   :  { %v343_v23 = vsel %vm123_vm7, %v340_v19, %v342_v22  ;;  %v344_v24 = vsel %vm123_vm7, %v342_v22, %v340_v19  ;;  %492 = vmatpush1.msra.mxu1 %v359_v17 }
 0x233   :  { %v347_v25 = vmul.f32 %v344_v24, %v3699_v62  ;;  %v348_v26 = vmul.f32 %v343_v23, %v3704_v63 }
 0x235   :  { %493 = vmatprep.subr.mxu1 %v348_v26 }
 0x236   :  { %494 = vmatpush1.msra.mxu1 %v347_v25 }
 0x237   :  { %2833 = vmatmul.mubr.msk.f32.vlgmr.msra.gmra.mxu1 %vm252_vm8, %v337_v27  ;;  %885 = vmatprep.subr.mxu1 %v3405_v0 }
 0x238   :  { %886 = vmatpush1.msra.mxu1 %v3405_v0  ;;  %533 = vmatprep.mubr.f32.mxu1 %v3411_v3 }
 0x2f7   :  { %v529_v28 = vpop.f32.mrf.mxu1 }
 0x2f8   :  { %v538_v29 = vadd.f32 %v529_v28, %v3531_v1  ;;  %v116_v1 = vld [vmem:[#allocation3 + $0x8] sm:$0xff] }
 0x2f9   :  { %v531_v32 = vpop.f32.mrf.mxu1  ;;  %2818 = vmatmul.mubr.msk.f32.gmra.mxu0 %vm252_vm8, %v116_v1 }
 0x2fa   :  { %v3785_v33 = vmax.f32 %v538_v29, 0.0  ;;  %v539_v34 = vadd.f32 %v531_v32, %v3540_v2  ;;  %733 = vmatprep.mubr.f32.mxu0 %v3411_v3 }
 0x2fc   :  { %v3788_v35 = vmax.f32 %v539_v34, 0.0  ;;  %631 = vrot.lane.b32.xlu0 %v3785_v33, %s3407_s13 }
 0x2fe   :  { %633 = vrot.lane.b32.xlu1 %v3788_v35, %s3407_s13 }
 0x300   :  { %619 = vrot.lane.b32.xlu0 %v3785_v33, %s3406_s10 }
 0x302   :  { %621 = vrot.lane.b32.xlu1 %v3788_v35, %s3406_s10 }
 0x304   :  { %607 = vrot.lane.b32.xlu0 %v3785_v33, %s3408_s16 }
 0x306   :  { %609 = vrot.lane.b32.xlu1 %v3788_v35, %s3408_s16 }
 0x308   :  { %595 = vrot.lane.b32.xlu0 %v3785_v33, %s3409_s17 }
 0x30a   :  { %597 = vrot.lane.b32.xlu1 %v3788_v35, %s3409_s17 }
 0x30c   :  { %581 = vrot.lane.b32.xlu0 %v3785_v33, %s3410_s0 }
 0x30e   :  { %583 = vrot.lane.b32.xlu1 %v3788_v35, %s3410_s0 }
 0x310   :  { %569 = vrot.lane.b32.xlu0 %v3785_v33, %s3412_s18 }
 0x312   :  { %571 = vrot.lane.b32.xlu1 %v3788_v35, %s3412_s18 }
 0x314   :  { %557 = vrot.lane.b32.xlu0 %v3785_v33, %s3413_s19 }
 0x316   :  { %559 = vrot.lane.b32.xlu1 %v3788_v35, %s3413_s19 }
 0x318   :  { %545 = vrot.lane.b32.xlu0 %v3785_v33, %s3414_s20 }
 0x31a   :  { %547 = vrot.lane.b32.xlu1 %v3788_v35, %s3414_s20 }
 0x36e   :  { %v632_v2 = vpop.permute.xlu0 %631 }
 0x370   :  { %v634_v36 = vpop.permute.xlu1 %633 }
 0x371   :  { %v635_v37 = vsel %vm222_vm1, %v632_v2, %v634_v36  ;;  %v636_v40 = vsel %vm222_vm1, %v634_v36, %v632_v2 }
 0x372   :  { %v639_v41 = vmul.f32 %v3579_v8, %v635_v37  ;;  %v640_v42 = vmul.f32 %v3584_v9, %v636_v40  ;;  %v620_v43 = vpop.permute.xlu0 %619 }
 0x374   :  { %v622_v44 = vpop.permute.xlu1 %621  ;;  %683 = vmatprep.subr.mxu0 %v640_v42  ;;  %v543_v42 = vld [vmem:[#allocation3 + $0x20] sm:$0xff] }
 0x375   :  { %v623_v45 = vsel %vm208_vm0, %v620_v43, %v622_v44  ;;  %v624_v48 = vsel %vm208_vm0, %v622_v44, %v620_v43  ;;  %684 = vmatpush1.msra.mxu0 %v639_v41 }
 0x376   :  { %v627_v49 = vmul.f32 %v3600_v16, %v623_v45  ;;  %v628_v50 = vmul.f32 %v3589_v12, %v624_v48  ;;  %v608_v51 = vpop.permute.xlu0 %607 }
 0x378   :  { %v610_v52 = vpop.permute.xlu1 %609  ;;  %685 = vmatprep.subr.mxu0 %v628_v50 }
 0x379   :  { %v611_v53 = vsel %vm194_vm2, %v608_v51, %v610_v52  ;;  %v612_v56 = vsel %vm194_vm2, %v610_v52, %v608_v51  ;;  %686 = vmatpush1.msra.mxu0 %v627_v49 }
 0x37a   :  { %v615_v57 = vmul.f32 %v3610_v20, %v611_v53  ;;  %v616_v58 = vmul.f32 %v3615_v21, %v612_v56  ;;  %v596_v59 = vpop.permute.xlu0 %595 }
 0x37c   :  { %v598_v60 = vpop.permute.xlu1 %597  ;;  %687 = vmatprep.subr.mxu0 %v616_v58 }
 0x37d   :  { %v599_v61 = vsel %vm180_vm3, %v596_v59, %v598_v60  ;;  %v600_v4 = vsel %vm180_vm3, %v598_v60, %v596_v59  ;;  %688 = vmatpush1.msra.mxu0 %v615_v57 }
 0x37e   :  { %v603_v6 = vmul.f32 %v3629_v30, %v599_v61  ;;  %v604_v7 = vmul.f32 %v3634_v31, %v600_v4  ;;  %v582_v10 = vpop.permute.xlu0 %581 }
 0x380   :  { %v584_v11 = vpop.permute.xlu1 %583  ;;  %689 = vmatprep.subr.mxu0 %v604_v7 }
 0x381   :  { %v585_v13 = vsel %vm164_vm4, %v582_v10, %v584_v11  ;;  %v586_v14 = vsel %vm164_vm4, %v584_v11, %v582_v10  ;;  %690 = vmatpush1.msra.mxu0 %v603_v6 }
 0x382   :  { %v589_v15 = vmul.f32 %v3646_v38, %v586_v14  ;;  %v590_v17 = vmul.f32 %v3651_v39, %v585_v13  ;;  %v570_v18 = vpop.permute.xlu0 %569  ;;  %691 = vmatprep.subr.mxu0 %v3788_v35 }
 0x383   :  { %692 = vmatpush1.msra.mxu0 %v3785_v33 }
 0x384   :  { %v572_v19 = vpop.permute.xlu1 %571  ;;  %693 = vmatprep.subr.mxu0 %v590_v17 }
 0x385   :  { %v573_v22 = vsel %vm150_vm5, %v570_v18, %v572_v19  ;;  %v574_v23 = vsel %vm150_vm5, %v572_v19, %v570_v18  ;;  %694 = vmatpush1.msra.mxu0 %v589_v15 }
 0x386   :  { %v577_v24 = vmul.f32 %v3664_v46, %v574_v23  ;;  %v578_v25 = vmul.f32 %v3669_v47, %v573_v22  ;;  %v558_v26 = vpop.permute.xlu0 %557 }
 0x388   :  { %v560_v27 = vpop.permute.xlu1 %559  ;;  %695 = vmatprep.subr.mxu0 %v578_v25 }
 0x389   :  { %v561_v28 = vsel %vm136_vm6, %v558_v26, %v560_v27  ;;  %v562_v29 = vsel %vm136_vm6, %v560_v27, %v558_v26  ;;  %696 = vmatpush1.msra.mxu0 %v577_v24 }
 0x38a   :  { %v565_v32 = vmul.f32 %v3682_v54, %v562_v29  ;;  %v566_v34 = vmul.f32 %v3687_v55, %v561_v28  ;;  %v546_v1 = vpop.permute.xlu0 %545 }
 0x38c   :  { %v548_v2 = vpop.permute.xlu1 %547  ;;  %697 = vmatprep.subr.mxu0 %v566_v34 }
 0x38d   :  { %v549_v36 = vsel %vm123_vm7, %v546_v1, %v548_v2  ;;  %v550_v37 = vsel %vm123_vm7, %v548_v2, %v546_v1  ;;  %698 = vmatpush1.msra.mxu0 %v565_v32 }
 0x38e   :  { %v553_v40 = vmul.f32 %v550_v37, %v3699_v62  ;;  %v554_v41 = vmul.f32 %v549_v36, %v3704_v63 }
 0x390   :  { %699 = vmatprep.subr.mxu0 %v554_v41 }
 0x391   :  { %700 = vmatpush1.msra.mxu0 %v553_v40 }
 0x392   :  { %2849 = vmatmul.mubr.msk.f32.vlgmr.msra.gmra.mxu0 %vm252_vm8, %v543_v42  ;;  %1091 = vmatprep.subr.mxu0 %v3405_v0  ;;  %v747_v42 = vld [vmem:[#allocation3 + $0x30] sm:$0xff] }
 0x393   :  { %1092 = vmatpush1.msra.mxu0 %v3405_v0  ;;  %739 = vmatprep.mubr.f32.mxu0 %v3411_v3  ;;  %v338_v0 = vld [vmem:[#allocation3 + $0x18] sm:$0xff] }
 0x394   :  { %2834 = vmatmul.mubr.msk.f32.gmra.mxu1 %vm252_vm8, %v338_v0  ;;  %v1170_v0 = vld [vmem:[#allocation8 + $0x70] sm:$0xff] }
 0x395   :  { %937 = vmatprep.mubr.f32.mxu1 %v3411_v3 }
 0x3b9   :  { %v331_v43 = vpop.f32.mrf.mxu0 }
 0x3bb   :  { %v332_v44 = vpop.f32.mrf.mxu0 }
 0x452   :  { %v735_v45 = vpop.f32.mrf.mxu0 }
 0x453   :  { %v744_v48 = vmax.f32 %v735_v45, 0.0 }
 0x454   :  { %v737_v49 = vpop.f32.mrf.mxu0 }
 0x455   :  { %v745_v50 = vmax.f32 %v737_v49, 0.0  ;;  %835 = vrot.lane.b32.xlu0 %v744_v48, %s3407_s13 }
 0x457   :  { %837 = vrot.lane.b32.xlu1 %v745_v50, %s3407_s13 }
 0x459   :  { %823 = vrot.lane.b32.xlu0 %v744_v48, %s3406_s10 }
 0x45b   :  { %825 = vrot.lane.b32.xlu1 %v745_v50, %s3406_s10 }
 0x45d   :  { %811 = vrot.lane.b32.xlu0 %v744_v48, %s3408_s16 }
 0x45f   :  { %813 = vrot.lane.b32.xlu1 %v745_v50, %s3408_s16 }
 0x461   :  { %799 = vrot.lane.b32.xlu0 %v744_v48, %s3409_s17 }
 0x463   :  { %801 = vrot.lane.b32.xlu1 %v745_v50, %s3409_s17 }
 0x465   :  { %785 = vrot.lane.b32.xlu0 %v744_v48, %s3410_s0 }
 0x467   :  { %787 = vrot.lane.b32.xlu1 %v745_v50, %s3410_s0 }
 0x469   :  { %773 = vrot.lane.b32.xlu0 %v744_v48, %s3412_s18 }
 0x46b   :  { %775 = vrot.lane.b32.xlu1 %v745_v50, %s3412_s18 }
 0x46d   :  { %761 = vrot.lane.b32.xlu0 %v744_v48, %s3413_s19 }
 0x46f   :  { %763 = vrot.lane.b32.xlu1 %v745_v50, %s3413_s19 }
 0x471   :  { %749 = vrot.lane.b32.xlu0 %v744_v48, %s3414_s20 }
 0x473   :  { %751 = vrot.lane.b32.xlu1 %v745_v50, %s3414_s20 }
 0x4c7   :  { %v836_v51 = vpop.permute.xlu0 %835 }
 0x4c9   :  { %v838_v52 = vpop.permute.xlu1 %837 }
 0x4ca   :  { %v839_v53 = vsel %vm222_vm1, %v836_v51, %v838_v52  ;;  %v840_v56 = vsel %vm222_vm1, %v838_v52, %v836_v51  ;;  %v1185_v51 = vld [vmem:[#allocation8 + $0xe8] sm:$0xff] }
 0x4cb   :  { %v843_v57 = vmul.f32 %v3579_v8, %v839_v53  ;;  %v844_v58 = vmul.f32 %v3584_v9, %v840_v56  ;;  %v824_v59 = vpop.permute.xlu0 %823  ;;  %v1169_v52 = vld [vmem:[#allocation8 + $0x68] sm:$0xff]  ;;  %v1184_v53 = vld [vmem:[#allocation8 + $0xe0] sm:$0xff] }
 0x4cc   :  { %v1168_v56 = vld [vmem:[#allocation8 + $0x60] sm:$0xff] }
 0x4cd   :  { %v826_v60 = vpop.permute.xlu1 %825  ;;  %887 = vmatprep.subr.mxu1 %v844_v58  ;;  %v1167_v58 = vld [vmem:[#allocation8 + $0x58] sm:$0xff] }
 0x4ce   :  { %v827_v61 = vsel %vm208_vm0, %v824_v59, %v826_v60  ;;  %v828_v4 = vsel %vm208_vm0, %v826_v60, %v824_v59  ;;  %888 = vmatpush1.msra.mxu1 %v843_v57  ;;  %v1183_v57 = vld [vmem:[#allocation8 + $0xd8] sm:$0xff]  ;;  %v1182_v59 = vld [vmem:[#allocation8 + $0xd0] sm:$0xff] }
 0x4cf   :  { %v831_v6 = vmul.f32 %v3600_v16, %v827_v61  ;;  %v832_v7 = vmul.f32 %v3589_v12, %v828_v4  ;;  %v812_v10 = vpop.permute.xlu0 %811  ;;  %v1166_v60 = vld [vmem:[#allocation8 + $0x50] sm:$0xff]  ;;  %v1181_v61 = vld [vmem:[#allocation8 + $0xc8] sm:$0xff] }
 0x4d0   :  { %v1165_v4 = vld [vmem:[#allocation8 + $0x48] sm:$0xff] }
 0x4d1   :  { %v814_v11 = vpop.permute.xlu1 %813  ;;  %889 = vmatprep.subr.mxu1 %v832_v7  ;;  %v1164_v7 = vld [vmem:[#allocation8 + $0x40] sm:$0xff] }
 0x4d2   :  { %v815_v8 = vsel %vm194_vm2, %v812_v10, %v814_v11  ;;  %v816_v9 = vsel %vm194_vm2, %v814_v11, %v812_v10  ;;  %890 = vmatpush1.msra.mxu1 %v831_v6  ;;  %v1180_v6 = vld [vmem:[#allocation8 + $0xc0] sm:$0xff]  ;;  %v1179_v10 = vld [vmem:[#allocation8 + $0xb8] sm:$0xff] }
 0x4d3   :  { %v819_v13 = vmul.f32 %v3610_v20, %v815_v8  ;;  %v820_v14 = vmul.f32 %v3615_v21, %v816_v9  ;;  %v800_v15 = vpop.permute.xlu0 %799  ;;  %v1163_v11 = vld [vmem:[#allocation8 + $0x38] sm:$0xff]  ;;  %v1178_v8 = vld [vmem:[#allocation8 + $0xb0] sm:$0xff] }
 0x4d4   :  { %v1162_v9 = vld [vmem:[#allocation8 + $0x30] sm:$0xff] }
 0x4d5   :  { %v802_v17 = vpop.permute.xlu1 %801  ;;  %891 = vmatprep.subr.mxu1 %v820_v14  ;;  %v1161_v14 = vld [vmem:[#allocation8 + $0x28] sm:$0xff] }
 0x4d6   :  { %v803_v12 = vsel %vm180_vm3, %v800_v15, %v802_v17  ;;  %v804_v16 = vsel %vm180_vm3, %v802_v17, %v800_v15  ;;  %892 = vmatpush1.msra.mxu1 %v819_v13  ;;  %v1177_v13 = vld [vmem:[#allocation8 + $0xa8] sm:$0xff]  ;;  %v1176_v15 = vld [vmem:[#allocation8 + $0xa0] sm:$0xff] }
 0x4d7   :  { %v807_v18 = vmul.f32 %v3629_v30, %v803_v12  ;;  %v808_v19 = vmul.f32 %v3634_v31, %v804_v16  ;;  %v786_v22 = vpop.permute.xlu0 %785  ;;  %v1160_v17 = vld [vmem:[#allocation8 + $0x20] sm:$0xff]  ;;  %v1175_v12 = vld [vmem:[#allocation8 + $0x98] sm:$0xff] }
 0x4d8   :  { %v1159_v16 = vld [vmem:[#allocation8 + $0x18] sm:$0xff] }
 0x4d9   :  { %v788_v23 = vpop.permute.xlu1 %787  ;;  %893 = vmatprep.subr.mxu1 %v808_v19  ;;  %v1174_v19 = vld [vmem:[#allocation8 + $0x90] sm:$0xff] }
 0x4da   :  { %v789_v20 = vsel %vm164_vm4, %v786_v22, %v788_v23  ;;  %v790_v21 = vsel %vm164_vm4, %v788_v23, %v786_v22  ;;  %894 = vmatpush1.msra.mxu1 %v807_v18  ;;  %v748_v18 = vld [vmem:[#allocation3 + $0x38] sm:$0xff]  ;;  %v1158_v22 = vld [vmem:[#allocation8 + $0x10] sm:$0xff] }
 0x4db   :  { %v793_v24 = vmul.f32 %v3646_v38, %v790_v21  ;;  %v794_v25 = vmul.f32 %v3651_v39, %v789_v20  ;;  %v774_v26 = vpop.permute.xlu0 %773  ;;  %895 = vmatprep.subr.mxu1 %v745_v50  ;;  %v1186_v50 = vld [vmem:[#allocation8 + $0xf0] sm:$0xff]  ;;  %v2880_v21 = vld [vmem:[%s4427_s2 + $0x88] sm:$0xff] }
 0x4dc   :  { %896 = vmatpush1.msra.mxu1 %v744_v48  ;;  %v2879_v20 = vld [vmem:[%s4427_s2 + $0x80] sm:$0xff] }
 0x4dd   :  { %v776_v30 = vpop.permute.xlu1 %775  ;;  %897 = vmatprep.subr.mxu1 %v794_v25 }
 0x4de   :  { %v777_v31 = vsel %vm150_vm5, %v774_v26, %v776_v30  ;;  %v778_v27 = vsel %vm150_vm5, %v776_v30, %v774_v26  ;;  %898 = vmatpush1.msra.mxu1 %v793_v24 }
 0x4df   :  { %v781_v28 = vmul.f32 %v3664_v46, %v778_v27  ;;  %v782_v29 = vmul.f32 %v3669_v47, %v777_v31  ;;  %v762_v32 = vpop.permute.xlu0 %761 }
 0x4e1   :  { %v764_v38 = vpop.permute.xlu1 %763  ;;  %899 = vmatprep.subr.mxu1 %v782_v29  ;;  %v2878_v29 = vld [vmem:[%s4427_s2 + $0x78] sm:$0xff] }
 0x4e2   :  { %v765_v39 = vsel %vm136_vm6, %v762_v32, %v764_v38  ;;  %v766_v34 = vsel %vm136_vm6, %v764_v38, %v762_v32  ;;  %900 = vmatpush1.msra.mxu1 %v781_v28  ;;  %v2877_v28 = vld [vmem:[%s4427_s2 + $0x70] sm:$0xff] }
 0x4e3   :  { %v769_v1 = vmul.f32 %v3682_v54, %v766_v34  ;;  %v770_v2 = vmul.f32 %v3687_v55, %v765_v39  ;;  %v750_v36 = vpop.permute.xlu0 %749  ;;  %v535_v54 = vpop.f32.mrf.mxu1 }
 0x4e5   :  { %v752_v37 = vpop.permute.xlu1 %751  ;;  %901 = vmatprep.subr.mxu1 %v770_v2  ;;  %v536_v55 = vpop.f32.mrf.mxu1 }
 0x4e6   :  { %v753_v46 = vsel %vm123_vm7, %v750_v36, %v752_v37  ;;  %v754_v47 = vsel %vm123_vm7, %v752_v37, %v750_v36  ;;  %902 = vmatpush1.msra.mxu1 %v769_v1  ;;  %v2875_v36 = vld [vmem:[%s4427_s2 + $0x60] sm:$0xff]  ;;  %v2876_v37 = vld [vmem:[%s4427_s2 + $0x68] sm:$0xff]  ;;  %v2873_v55 = vld [vmem:[%s4427_s2 + $0x50] sm:$0xff] }
 0x4e7   :  { %v757_v40 = vmul.f32 %v754_v47, %v3699_v62  ;;  %v758_v41 = vmul.f32 %v753_v46, %v3704_v63  ;;  %v544_v63 = vld [vmem:[#allocation3 + $0x28] sm:$0xff] }
 0x4e8   :  { %2850 = vmatmul.mubr.msk.f32.gmra.mxu0 %vm252_vm8, %v544_v63 }
 0x4e9   :  { %903 = vmatprep.subr.mxu1 %v758_v41  ;;  %1143 = vmatprep.mubr.f32.mxu0 %v3411_v3 }
 0x4ea   :  { %904 = vmatpush1.msra.mxu1 %v757_v40 }
 0x4eb   :  { %2865 = vmatmul.mubr.msk.f32.vlgmr.msra.gmra.mxu1 %vm252_vm8, %v747_v42 }
 0x4ec   :  { %943 = vmatprep.mubr.f32.mxu1 %v3411_v3 }
 0x4ef   :  { %2866 = vmatmul.mubr.msk.f32.gmra.mxu1 %vm252_vm8, %v748_v18 }
 0x5ab   :  { %v939_v43 = vpop.f32.mrf.mxu1 }
 0x5ac   :  { %v948_v44 = vadd.f32 %v939_v43, %v3785_v33  ;;  %v1187_v33 = vld [vmem:[#allocation8 + $0xf8] sm:$0xff]  ;;  %v2874_v43 = vld [vmem:[%s4427_s2 + $0x58] sm:$0xff] }
 0x5ad   :  { %v941_v45 = vpop.f32.mrf.mxu1  ;;  %2900 = vmatprep.subr.mxu1 %v1187_v33 }
 0x5ae   :  { %v3947_v48 = vmax.f32 %v948_v44, 0.0  ;;  %v949_v49 = vadd.f32 %v941_v45, %v3788_v35  ;;  %v1171_v35 = vld [vmem:[#allocation8 + $0x78] sm:$0xff] }
 0x5af   :  { %2901 = vmatpush3.msra.mxu1 %v1171_v35 }
 0x5b0   :  { %1003 = vst [vmem:[#allocation2 + $0x40] sm:$0xff] %v3947_v48  ;;  %v3951_v62 = vmax.f32 %v949_v49, 0.0  ;;  %1041 = vrot.lane.b32.xlu0 %v3947_v48, %s3407_s13  ;;  %2902 = vmatprep.subr.mxu1 %v1186_v50  ;;  %v2871_v50 = vld [vmem:[%s4427_s2 + $0x30] sm:$0xff] }
 0x5b1   :  { %2903 = vmatpush3.msra.mxu1 %v1170_v0  ;;  %v2872_v0 = vld [vmem:[%s4427_s2 + $0x38] sm:$0xff] }
 0x5b2   :  { %1043 = vrot.lane.b32.xlu1 %v3951_v62, %s3407_s13  ;;  %2904 = vmatprep.subr.mxu1 %v1185_v51  ;;  %s3432_s13 = smov 4  }
 0x5b3   :  { %2905 = vmatpush3.msra.mxu1 %v1169_v52 }
 0x5b4   :  { %1029 = vrot.lane.b32.xlu0 %v3947_v48, %s3406_s10  ;;  %2906 = vmatprep.subr.mxu1 %v1184_v53 }
 0x5b5   :  { %2907 = vmatpush3.msra.mxu1 %v1168_v56 }
 0x5b6   :  { %1031 = vrot.lane.b32.xlu1 %v3951_v62, %s3406_s10  ;;  %2908 = vmatprep.subr.mxu1 %v1183_v57  ;;  %s3431_s10 = smov 12  }
 0x5b7   :  { %2909 = vmatpush3.msra.mxu1 %v1167_v58 }
 0x5b8   :  { %1017 = vrot.lane.b32.xlu0 %v3947_v48, %s3408_s16  ;;  %2910 = vmatprep.subr.mxu1 %v1182_v59  ;;  %v2869_v59 = vld [vmem:[%s4427_s2 + $0x20] sm:$0xff] }
 0x5b9   :  { %2911 = vmatpush3.msra.mxu1 %v1166_v60  ;;  %v2870_v60 = vld [vmem:[%s4427_s2 + $0x28] sm:$0xff] }
 0x5ba   :  { %1019 = vrot.lane.b32.xlu1 %v3951_v62, %s3408_s16  ;;  %2912 = vmatprep.subr.mxu1 %v1181_v61 }
 0x5bb   :  { %2913 = vmatpush3.msra.mxu1 %v1165_v4 }
 0x5bc   :  { %1005 = vrot.lane.b32.xlu0 %v3947_v48, %s3409_s17  ;;  %2914 = vmatprep.subr.mxu1 %v1180_v6 }
 0x5bd   :  { %2915 = vmatpush3.msra.mxu1 %v1164_v7 }
 0x5be   :  { %1007 = vrot.lane.b32.xlu1 %v3951_v62, %s3409_s17  ;;  %2916 = vmatprep.subr.mxu1 %v1179_v10 }
 0x5bf   :  { %2917 = vmatpush3.msra.mxu1 %v1163_v11  ;;  %v2867_v11 = vld [vmem:[%s4427_s2 + $0x10] sm:$0xff] }
 0x5c0   :  { %991 = vrot.lane.b32.xlu0 %v3947_v48, %s3410_s0  ;;  %2918 = vmatprep.subr.mxu1 %v1178_v8 }
 0x5c1   :  { %2919 = vmatpush3.msra.mxu1 %v1162_v9 }
 0x5c2   :  { %993 = vrot.lane.b32.xlu1 %v3951_v62, %s3410_s0  ;;  %2920 = vmatprep.subr.mxu1 %v1177_v13 }
 0x5c3   :  { %2921 = vmatpush3.msra.mxu1 %v1161_v14 }
 0x5c4   :  { %979 = vrot.lane.b32.xlu0 %v3947_v48, %s3412_s18  ;;  %2922 = vmatprep.subr.mxu1 %v1176_v15 }
 0x5c5   :  { %2923 = vmatpush3.msra.mxu1 %v1160_v17  ;;  %v961_v17 = vld [vmem:[%s4427_s2] sm:$0xff] }
 0x5c6   :  { %981 = vrot.lane.b32.xlu1 %v3951_v62, %s3412_s18  ;;  %2924 = vmatprep.subr.mxu1 %v1175_v12  ;;  %v962_v12 = vld [vmem:[%s4427_s2 + $0x8] sm:$0xff] }
 0x5c7   :  { %2925 = vmatpush3.msra.mxu1 %v1159_v16 }
 0x5c8   :  { %967 = vrot.lane.b32.xlu0 %v3947_v48, %s3413_s19  ;;  %2926 = vmatprep.subr.mxu1 %v1174_v19 }
 0x5c9   :  { %2927 = vmatpush3.msra.mxu1 %v1158_v22 }
 0x5ca   :  { %969 = vrot.lane.b32.xlu1 %v3951_v62, %s3413_s19 }
 0x5cc   :  { %955 = vrot.lane.b32.xlu0 %v3947_v48, %s3414_s20 }
 0x5ce   :  { %957 = vrot.lane.b32.xlu1 %v3951_v62, %s3414_s20  ;;  %s3433_s20 = smov 13  }
 0x622   :  { %v1042_v23 = vpop.permute.xlu0 %1041 }
 0x624   :  { %v1044_v24 = vpop.permute.xlu1 %1043 }
 0x625   :  { %v1045_v25 = vsel %vm222_vm1, %v1042_v23, %v1044_v24  ;;  %v1046_v26 = vsel %vm222_vm1, %v1044_v24, %v1042_v23  ;;  %v4071_v24 = vld [vmem:[#allocation2 + $0x98] sm:$0xff] }
 0x626   :  { %v1049_v30 = vmul.f32 %v2879_v20, %v1045_v25  ;;  %v1050_v31 = vmul.f32 %v2880_v21, %v1046_v26  ;;  %v1030_v27 = vpop.permute.xlu0 %1029  ;;  %v953_v21 = vld [vmem:[#allocation3 + $0x40] sm:$0xff]  ;;  %v741_v25 = vpop.f32.mrf.mxu0  ;;  %v1173_v26 = vld [vmem:[#allocation8 + $0x88] sm:$0xff] }
 0x627   :  { %2928 = vmatprep.subr.mxu1 %v1173_v26 }
 0x628   :  { %1051 = vst [vmem:[#allocation2 + $0x80] sm:$0xff] %v1049_v30  ;;  %v1032_v32 = vpop.permute.xlu1 %1031  ;;  %1093 = vmatprep.subr.mxu0 %v1050_v31  ;;  %v742_v5 = vpop.f32.mrf.mxu0  ;;  %v1172_v31 = vld [vmem:[#allocation8 + $0x80] sm:$0xff] }
 0x629   :  { %v1033_v38 = vsel %vm208_vm0, %v1030_v27, %v1032_v32  ;;  %v1034_v39 = vsel %vm208_vm0, %v1032_v32, %v1030_v27  ;;  %1094 = vmatpush1.msra.mxu0 %v1049_v30  ;;  %v1157_v30 = vld [vmem:[#allocation8 + $0x8] sm:$0xff]  ;;  %v1156_v27 = vld [vmem:[#allocation8] sm:$0xff] }
 0x62a   :  { %v1037_v34 = vmul.f32 %v2877_v28, %v1033_v38  ;;  %v1038_v1 = vmul.f32 %v2878_v29, %v1034_v39  ;;  %v1018_v2 = vpop.permute.xlu0 %1017  ;;  %2929 = vmatpush3.msra.mxu1 %v1157_v30  ;;  %v945_v28 = vpop.f32.mrf.mxu1  ;;  %v1266_v5 = vld [vmem:[#allocation3 + $0x58] sm:$0xff] }
 0x62b   :  { %2930 = vmatprep.subr.mxu1 %v1172_v31 }
 0x62c   :  { %1039 = vst [vmem:[#allocation2 + $0x70] sm:$0xff] %v1037_v34  ;;  %v1020_v46 = vpop.permute.xlu1 %1019  ;;  %1095 = vmatprep.subr.mxu0 %v1038_v1  ;;  %2931 = vmatpush3.msra.mxu1 %v1156_v27  ;;  %v946_v29 = vpop.f32.mrf.mxu1 }
 0x62d   :  { %v1021_v47 = vsel %vm194_vm2, %v1018_v2, %v1020_v46  ;;  %v1022_v40 = vsel %vm194_vm2, %v1020_v46, %v1018_v2  ;;  %1096 = vmatpush1.msra.mxu0 %v1037_v34  ;;  %3058 = vmatprep.subr.mxu1 %v4071_v24  ;;  %v4084_v46 = vld [vmem:[#allocation5 + $0x30] sm:$0xff] }
 0x62e   :  { %v1025_v41 = vmul.f32 %v2875_v36, %v1021_v47  ;;  %v1026_v42 = vmul.f32 %v2876_v37, %v1022_v40  ;;  %v1006_v54 = vpop.permute.xlu0 %1005  ;;  %v4080_v36 = vld [vmem:[#allocation5 + $0x40] sm:$0xff]  ;;  %v954_v37 = vld [vmem:[#allocation3 + $0x48] sm:$0xff]  ;;  %v4089_v47 = vld [vmem:[#allocation5 + $0x18] sm:$0xff] }
 0x62f   :  { %v4093_v40 = vld [vmem:[#allocation5 + $0x8] sm:$0xff] }
 0x630   :  { %1027 = vst [vmem:[#allocation2 + $0x60] sm:$0xff] %v1025_v41  ;;  %v1008_v44 = vpop.permute.xlu1 %1007  ;;  %1097 = vmatprep.subr.mxu0 %v1026_v42 }
 0x631   :  { %v1009_v45 = vsel %vm180_vm3, %v1006_v54, %v1008_v44  ;;  %v1010_v49 = vsel %vm180_vm3, %v1008_v44, %v1006_v54  ;;  %1098 = vmatpush1.msra.mxu0 %v1025_v41  ;;  %v4099_v54 = vld [vmem:[#allocation5 + $0x38] sm:$0xff]  ;;  %v4111_v44 = vld [vmem:[#allocation5] sm:$0xff] }
 0x632   :  { %v1013_v63 = vmul.f32 %v2873_v55, %v1009_v45  ;;  %v1014_v33 = vmul.f32 %v2874_v43, %v1010_v49  ;;  %v992_v35 = vpop.permute.xlu0 %991  ;;  %v4103_v55 = vld [vmem:[#allocation5 + $0x28] sm:$0xff]  ;;  %v4107_v43 = vld [vmem:[#allocation5 + $0x10] sm:$0xff] }
 0x634   :  { %1015 = vst [vmem:[#allocation2 + $0x50] sm:$0xff] %v1013_v63  ;;  %v994_v51 = vpop.permute.xlu1 %993  ;;  %1099 = vmatprep.subr.mxu0 %v1014_v33 }
 0x635   :  { %v995_v52 = vsel %vm164_vm4, %v992_v35, %v994_v51  ;;  %v996_v53 = vsel %vm164_vm4, %v994_v51, %v992_v35  ;;  %1100 = vmatpush1.msra.mxu0 %v1013_v63 }
 0x636   :  { %v999_v56 = vmul.f32 %v2871_v50, %v996_v53  ;;  %v1000_v57 = vmul.f32 %v2872_v0, %v995_v52  ;;  %v980_v58 = vpop.permute.xlu0 %979  ;;  %1101 = vmatprep.subr.mxu0 %v3951_v62 }
 0x637   :  { %1102 = vmatpush1.msra.mxu0 %v3947_v48  ;;  %v2868_v48 = vld [vmem:[%s4427_s2 + $0x18] sm:$0xff]  ;;  %s3415_s2 = smov 64  }
 0x638   :  { %1001 = vst [vmem:[#allocation2 + $0x30] sm:$0xff] %v999_v56  ;;  %v982_v61 = vpop.permute.xlu1 %981  ;;  %1103 = vmatprep.subr.mxu0 %v1000_v57 }
 0x639   :  { %v983_v4 = vsel %vm150_vm5, %v980_v58, %v982_v61  ;;  %v984_v6 = vsel %vm150_vm5, %v982_v61, %v980_v58  ;;  %1104 = vmatpush1.msra.mxu0 %v999_v56 }
 0x63a   :  { %v987_v62 = vmul.f32 %v2869_v59, %v984_v6  ;;  %v988_v7 = vmul.f32 %v2870_v60, %v983_v4  ;;  %v968_v10 = vpop.permute.xlu0 %967 }
 0x63c   :  { %989 = vst [vmem:[#allocation2 + $0x20] sm:$0xff] %v987_v62  ;;  %v970_v8 = vpop.permute.xlu1 %969  ;;  %1105 = vmatprep.subr.mxu0 %v988_v7  ;;  %v1265_v7 = vld [vmem:[#allocation3 + $0x50] sm:$0xff] }
 0x63d   :  { %v971_v9 = vsel %vm136_vm6, %v968_v10, %v970_v8  ;;  %v972_v13 = vsel %vm136_vm6, %v970_v8, %v968_v10  ;;  %1106 = vmatpush1.msra.mxu0 %v987_v62 }
 0x63e   :  { %v975_v14 = vmul.f32 %v2867_v11, %v972_v13  ;;  %v976_v15 = vmul.f32 %v2868_v48, %v971_v9  ;;  %v956_v16 = vpop.permute.xlu0 %955 }
 0x640   :  { %977 = vst [vmem:[#allocation2 + $0x10] sm:$0xff] %v975_v14  ;;  %v958_v18 = vpop.permute.xlu1 %957  ;;  %1107 = vmatprep.subr.mxu0 %v976_v15 }
 0x641   :  { %v959_v19 = vsel %vm123_vm7, %v956_v16, %v958_v18  ;;  %v960_v22 = vsel %vm123_vm7, %v958_v18, %v956_v16  ;;  %1108 = vmatpush1.msra.mxu0 %v975_v14 }
 0x642   :  { %v963_v23 = vmul.f32 %v961_v17, %v960_v22  ;;  %v964_v20 = vmul.f32 %v962_v12, %v959_v19 }
 0x644   :  { %965 = vst [vmem:[#allocation2] sm:$0xff] %v963_v23  ;;  %1109 = vmatprep.subr.mxu0 %v964_v20 }
 0x645   :  { %1110 = vmatpush1.msra.mxu0 %v963_v23 }
 0x646   :  { %2881 = vmatmul.mubr.msk.f32.vlgmr.msra.gmra.mxu0 %vm252_vm8, %v953_v21  ;;  %3035 = vmatprep.subr.mxu0 %v4071_v24 }
 0x647   :  { %1149 = vmatprep.mubr.f32.mxu0 %v3411_v3  ;;  %3036 = vmatpush3.msra.mxu0 %v4071_v24 }
 0x64a   :  { %2882 = vmatmul.mubr.msk.f32.gmra.mxu0 %vm252_vm8, %v954_v37 }
 0x64b   :  { %3055 = vmatprep.mubr.msk.f32.mxu0 %vm252_vm8, %v1265_v7 }
 0x706   :  { %v1145_v32 = vpop.f32.mrf.mxu0 }
 0x708   :  { %v1147_v38 = vpop.f32.mrf.mxu0 }
 0x709   :  { %1252 = vmatprep.mubr.f32.mxu1 %v1147_v38 }
 0x70a   :  { %1253 = vmatmul.mubr.f32.vlgmr.msra.gmra.mxu1 %v1145_v32  ;;  %v1151_v53 = vpop.f32.mrf.mxu0 }
 0x70b   :  { %3059 = vmatpush3.msra.mxu1 %v4071_v24 }
 0x70c   :  { %v1153_v57 = vpop.f32.mrf.mxu0 }
 0x70d   :  { %1257 = vmatprep.mubr.f32.mxu1 %v1153_v57  ;;  %v1464_v57 = vld [vmem:[#allocation3 + $0x60] sm:$0xff] }
 0x70e   :  { %1258 = vmatmul.mubr.f32.gmra.mxu1 %v1151_v53 }
 0x70f   :  { %3078 = vmatprep.mubr.msk.f32.mxu1 %vm252_vm8, %v1464_v57 }
 0x7ca   :  { %v2932_v39 = vpop.f32.mrf.mxu1 }
 0x7cc   :  { %v2933_v34 = vpop.f32.mrf.mxu1 }
 0x7cd   :  { %v2934_v1 = vadd.f32 %v2933_v34, %v2932_v39 }
 0x7ce   :  { %v2935_v26 = vpop.f32.mrf.mxu1 }
 0x7cf   :  { %v1263_v2 = vmax.f32 %v2934_v1, 0.0 }
 0x7d0   :  { %v2936_v30 = vpop.f32.mrf.mxu1 }
 0x7d1   :  { %1322 = vst.msk [vmem:[#allocation2 + $0x40] sm:$0xff] %vm1284_vm9, %v1263_v2  ;;  %1268 = vrot.lane.b32.xlu0 %v1263_v2, %s3415_s2  ;;  %v2937_v27 = vadd.f32 %v2936_v30, %v2935_v26 }
 0x7d5   :  { %1362 = vrot.lane.b32.xlu0 %v4080_v36, %s3416_s14 }
 0x7d8   :  { %v1375_v22 = vld [vmem:[#allocation2 + $0x40] sm:$0xff] }
 0x7d9   :  { %1338 = vrot.lane.b32.xlu0 %v4084_v46, %s3417_s15 }
 0x7dd   :  { %1313 = vrot.lane.b32.xlu0 %v4089_v47, %s3418_s3 }
 0x7e1   :  { %1289 = vrot.lane.b32.xlu0 %v4093_v40, %s3419_s21 }
 0x843   :  { %v1269_v41 = vpop.permute.xlu0 %1268 }
 0x844   :  { %v1270_v42 = vsel %vm1267_vm10, %v1269_v41, %v1263_v2 }
 0x845   :  { %1271 = vrot.lane.b32.xlu1 %v1270_v42, %s3415_s2 }
 0x847   :  { %v1363_v45 = vpop.permute.xlu0 %1362 }
 0x849   :  { %1350 = vrot.lane.b32.xlu1 %v4099_v54, %s3400_s11 }
 0x84b   :  { %v1339_v49 = vpop.permute.xlu0 %1338 }
 0x84d   :  { %1326 = vrot.lane.b32.xlu1 %v4103_v55, %s3410_s0 }
 0x84f   :  { %v1314_v0 = vpop.permute.xlu0 %1313 }
 0x851   :  { %1301 = vrot.lane.b32.xlu1 %v4107_v43, %s3420_s22 }
 0x853   :  { %v1290_v60 = vpop.permute.xlu0 %1289 }
 0x855   :  { %1276 = vrot.lane.b32.xlu1 %v4111_v44, %s3421_s5 }
 0x8b7   :  { %v1272_v63 = vpop.permute.xlu1 %1271 }
 0x8b8   :  { %v1273_v33 = vsel %vm1267_vm10, %v1272_v63, %v1263_v2 }
 0x8b9   :  { %v1365_v35 = vmul.f32 %v1363_v45, %v1273_v33  ;;  %v1341_v52 = vmul.f32 %v1339_v49, %v1273_v33  ;;  %v1316_v59 = vmul.f32 %v1314_v0, %v1273_v33  ;;  %v1292_v6 = vmul.f32 %v1290_v60, %v1273_v33 }
 0x8bb   :  { %v1351_v50 = vpop.permute.xlu1 %1350  ;;  %1367 = vrot.lane.b32.xlu0 %v1365_v35, %s3422_s23 }
 0x8bc   :  { %v1353_v51 = vmul.f32 %v1351_v50, %v1273_v33 }
 0x8be   :  { %1355 = vrot.lane.b32.xlu1 %v1353_v51, %s3423_s24 }
 0x8bf   :  { %v1327_v56 = vpop.permute.xlu1 %1326  ;;  %1343 = vrot.lane.b32.xlu0 %v1341_v52, %s3424_s25 }
 0x8c0   :  { %v1329_v58 = vmul.f32 %v1327_v56, %v1273_v33 }
 0x8c2   :  { %1331 = vrot.lane.b32.xlu1 %v1329_v58, %s3409_s17 }
 0x8c3   :  { %v1302_v61 = vpop.permute.xlu1 %1301  ;;  %1318 = vrot.lane.b32.xlu0 %v1316_v59, %s3425_s26 }
 0x8c4   :  { %v1304_v4 = vmul.f32 %v1302_v61, %v1273_v33 }
 0x8c6   :  { %1306 = vrot.lane.b32.xlu1 %v1304_v4, %s3426_s27 }
 0x8c7   :  { %v1277_v62 = vpop.permute.xlu1 %1276  ;;  %1294 = vrot.lane.b32.xlu0 %v1292_v6, %s3427_s28 }
 0x8c8   :  { %v1279_v10 = vmul.f32 %v1277_v62, %v1273_v33 }
 0x8ca   :  { %1281 = vrot.lane.b32.xlu1 %v1279_v10, %s3428_s1 }
 0x92d   :  { %v1368_v11 = vpop.permute.xlu0 %1367 }
 0x92e   :  { %1370 = vst.msk [vmem:[#allocation2 + $0x80] sm:$0xff] %vm1284_vm9, %v1368_v11 }
 0x930   :  { %v1356_v48 = vpop.permute.xlu1 %1355 }
 0x931   :  { %1358 = vst.msk [vmem:[#allocation2 + $0x70] sm:$0xff] %vm1284_vm9, %v1356_v48  ;;  %v1344_v8 = vpop.permute.xlu0 %1343 }
 0x932   :  { %1346 = vst.msk [vmem:[#allocation2 + $0x60] sm:$0xff] %vm1284_vm9, %v1344_v8 }
 0x934   :  { %v1332_v9 = vpop.permute.xlu1 %1331 }
 0x935   :  { %1334 = vst.msk [vmem:[#allocation2 + $0x50] sm:$0xff] %vm1284_vm9, %v1332_v9  ;;  %v1319_v13 = vpop.permute.xlu0 %1318  ;;  %v1379_v14 = vld [vmem:[#allocation2 + $0x80] sm:$0xff] }
 0x936   :  { %1321 = vst.msk [vmem:[#allocation2 + $0x30] sm:$0xff] %vm1284_vm9, %v1319_v13  ;;  %3037 = vmatprep.subr.mxu0 %v1379_v14 }
 0x937   :  { %3038 = vmatpush3.msra.mxu0 %v1379_v14 }
 0x938   :  { %v1307_v15 = vpop.permute.xlu1 %1306  ;;  %v1378_v17 = vld [vmem:[#allocation2 + $0x70] sm:$0xff] }
 0x939   :  { %1309 = vst.msk [vmem:[#allocation2 + $0x20] sm:$0xff] %vm1284_vm9, %v1307_v15  ;;  %3039 = vmatprep.subr.mxu0 %v1378_v17  ;;  %v1295_v12 = vpop.permute.xlu0 %1294  ;;  %v1377_v16 = vld [vmem:[#allocation2 + $0x60] sm:$0xff] }
 0x93a   :  { %1297 = vst.msk [vmem:[#allocation2 + $0x10] sm:$0xff] %vm1284_vm9, %v1295_v12  ;;  %3040 = vmatpush3.msra.mxu0 %v1378_v17 }
 0x93b   :  { %3041 = vmatprep.subr.mxu0 %v1377_v16 }
 0x93c   :  { %v1282_v18 = vpop.permute.xlu1 %1281  ;;  %3042 = vmatpush3.msra.mxu0 %v1377_v16  ;;  %v1376_v19 = vld [vmem:[#allocation2 + $0x50] sm:$0xff]  ;;  %v1465_v16 = vld [vmem:[#allocation3 + $0x68] sm:$0xff] }
 0x93d   :  { %1285 = vst.msk [vmem:[#allocation2] sm:$0xff] %vm1284_vm9, %v1282_v18  ;;  %3043 = vmatprep.subr.mxu0 %v1376_v19  ;;  %v1374_v23 = vld [vmem:[#allocation2 + $0x30] sm:$0xff] }
 0x93e   :  { %3044 = vmatpush3.msra.mxu0 %v1376_v19 }
 0x93f   :  { %3045 = vmatprep.subr.mxu0 %v1375_v22 }
 0x940   :  { %3046 = vmatpush3.msra.mxu0 %v1375_v22  ;;  %v1373_v20 = vld [vmem:[#allocation2 + $0x20] sm:$0xff] }
 0x941   :  { %3047 = vmatprep.subr.mxu0 %v1374_v23  ;;  %v1372_v21 = vld [vmem:[#allocation2 + $0x10] sm:$0xff] }
 0x942   :  { %3048 = vmatpush3.msra.mxu0 %v1374_v23 }
 0x943   :  { %3049 = vmatprep.subr.mxu0 %v1373_v20 }
 0x944   :  { %3050 = vmatpush3.msra.mxu0 %v1373_v20  ;;  %v1371_v25 = vld [vmem:[#allocation2] sm:$0xff] }
 0x945   :  { %3051 = vmatprep.subr.mxu0 %v1372_v21 }
 0x946   :  { %3052 = vmatpush3.msra.mxu0 %v1372_v21 }
 0x947   :  { %3053 = vmatprep.subr.mxu0 %v1371_v25 }
 0x948   :  { %3054 = vmatpush3.msra.mxu0 %v1371_v25 }
 0x949   :  { %3056 = vmatmul.mubr.msk.f32.vlgmr.msra.gmra.mxu0 %vm252_vm8, %v1266_v5  ;;  %3081 = vmatprep.subr.mxu0 %v4071_v24 }
 0x94a   :  { %3082 = vmatpush3.msra.mxu0 %v4071_v24 }
 0xa09   :  { %v3057_v31 = vpop.f32.mrf.mxu0 }
 0xa0b   :  { %v1453_v28 = vpop.f32.mrf.mxu0 }
 0xa0c   :  { %v1461_v29 = vadd.f32 %v2937_v27, %v1453_v28 }
 0xa0e   :  { %v4136_v32 = vmax.f32 %v1461_v29, 0.0 }
 0xa10   :  { %1516 = vst.msk [vmem:[#allocation2 + $0x40] sm:$0xff] %vm1284_vm9, %v4136_v32  ;;  %1466 = vrot.lane.b32.xlu0 %v4136_v32, %s3415_s2 }
 0xa14   :  { %1552 = vrot.lane.b32.xlu0 %v4080_v36, %s3416_s14 }
 0xa17   :  { %v1565_v13 = vld [vmem:[#allocation2 + $0x40] sm:$0xff] }
 0xa18   :  { %1530 = vrot.lane.b32.xlu0 %v4084_v46, %s3417_s15 }
 0xa1c   :  { %1507 = vrot.lane.b32.xlu0 %v4089_v47, %s3418_s3 }
 0xa20   :  { %1485 = vrot.lane.b32.xlu0 %v4093_v40, %s3419_s21 }
 0xa82   :  { %v1467_v38 = vpop.permute.xlu0 %1466 }
 0xa83   :  { %v1468_v39 = vsel %vm1267_vm10, %v1467_v38, %v4136_v32 }
 0xa84   :  { %1469 = vrot.lane.b32.xlu1 %v1468_v39, %s3415_s2 }
 0xa86   :  { %v1553_v34 = vpop.permute.xlu0 %1552 }
 0xa88   :  { %1541 = vrot.lane.b32.xlu1 %v4099_v54, %s3400_s11 }
 0xa8a   :  { %v1531_v1 = vpop.permute.xlu0 %1530 }
 0xa8c   :  { %1519 = vrot.lane.b32.xlu1 %v4103_v55, %s3410_s0 }
 0xa8e   :  { %v1508_v45 = vpop.permute.xlu0 %1507 }
 0xa90   :  { %1496 = vrot.lane.b32.xlu1 %v4107_v43, %s3420_s22 }
 0xa92   :  { %v1486_v0 = vpop.permute.xlu0 %1485 }
 0xa94   :  { %1474 = vrot.lane.b32.xlu1 %v4111_v44, %s3421_s5 }
 0xaf6   :  { %v1470_v2 = vpop.permute.xlu1 %1469 }
 0xaf7   :  { %v1471_v37 = vsel %vm1267_vm10, %v1470_v2, %v4136_v32 }
 0xaf8   :  { %v1555_v41 = vmul.f32 %v1553_v34, %v1471_v37  ;;  %v1533_v63 = vmul.f32 %v1531_v1, %v1471_v37  ;;  %v1510_v50 = vmul.f32 %v1508_v45, %v1471_v37  ;;  %v1488_v53 = vmul.f32 %v1486_v0, %v1471_v37  ;;  %v1653_v45 = vld [vmem:[#allocation3 + $0x70] sm:$0xff] }
 0xaf9   :  { %3101 = vmatprep.mubr.msk.f32.mxu0 %vm252_vm8, %v1653_v45 }
 0xafa   :  { %v1542_v42 = vpop.permute.xlu1 %1541  ;;  %1557 = vrot.lane.b32.xlu0 %v1555_v41, %s3422_s23 }
 0xafb   :  { %v1544_v49 = vmul.f32 %v1542_v42, %v1471_v37 }
 0xafd   :  { %1546 = vrot.lane.b32.xlu1 %v1544_v49, %s3423_s24 }
 0xafe   :  { %v1520_v33 = vpop.permute.xlu1 %1519  ;;  %1535 = vrot.lane.b32.xlu0 %v1533_v63, %s3424_s25 }
 0xaff   :  { %v1522_v35 = vmul.f32 %v1520_v33, %v1471_v37 }
 0xb01   :  { %1524 = vrot.lane.b32.xlu1 %v1522_v35, %s3409_s17 }
 0xb02   :  { %v1497_v51 = vpop.permute.xlu1 %1496  ;;  %1512 = vrot.lane.b32.xlu0 %v1510_v50, %s3425_s26 }
 0xb03   :  { %v1499_v52 = vmul.f32 %v1497_v51, %v1471_v37 }
 0xb05   :  { %1501 = vrot.lane.b32.xlu1 %v1499_v52, %s3426_s27 }
 0xb06   :  { %v1475_v56 = vpop.permute.xlu1 %1474  ;;  %1490 = vrot.lane.b32.xlu0 %v1488_v53, %s3427_s28 }
 0xb07   :  { %v1477_v58 = vmul.f32 %v1475_v56, %v1471_v37 }
 0xb09   :  { %1479 = vrot.lane.b32.xlu1 %v1477_v58, %s3428_s1 }
 0xb6c   :  { %v1558_v59 = vpop.permute.xlu0 %1557 }
 0xb6d   :  { %1560 = vst.msk [vmem:[#allocation2 + $0x80] sm:$0xff] %vm1284_vm9, %v1558_v59 }
 0xb6f   :  { %v1547_v60 = vpop.permute.xlu1 %1546 }
 0xb70   :  { %1549 = vst.msk [vmem:[#allocation2 + $0x70] sm:$0xff] %vm1284_vm9, %v1547_v60  ;;  %v1536_v61 = vpop.permute.xlu0 %1535 }
 0xb71   :  { %1538 = vst.msk [vmem:[#allocation2 + $0x60] sm:$0xff] %vm1284_vm9, %v1536_v61 }
 0xb73   :  { %v1525_v4 = vpop.permute.xlu1 %1524 }
 0xb74   :  { %1527 = vst.msk [vmem:[#allocation2 + $0x50] sm:$0xff] %vm1284_vm9, %v1525_v4  ;;  %v1513_v6 = vpop.permute.xlu0 %1512  ;;  %v1569_v62 = vld [vmem:[#allocation2 + $0x80] sm:$0xff] }
 0xb75   :  { %1515 = vst.msk [vmem:[#allocation2 + $0x30] sm:$0xff] %vm1284_vm9, %v1513_v6  ;;  %3060 = vmatprep.subr.mxu1 %v1569_v62 }
 0xb76   :  { %3061 = vmatpush3.msra.mxu1 %v1569_v62 }
 0xb77   :  { %v1502_v7 = vpop.permute.xlu1 %1501  ;;  %v1568_v10 = vld [vmem:[#allocation2 + $0x70] sm:$0xff] }
 0xb78   :  { %1504 = vst.msk [vmem:[#allocation2 + $0x20] sm:$0xff] %vm1284_vm9, %v1502_v7  ;;  %3062 = vmatprep.subr.mxu1 %v1568_v10  ;;  %v1491_v11 = vpop.permute.xlu0 %1490  ;;  %v1567_v48 = vld [vmem:[#allocation2 + $0x60] sm:$0xff]  ;;  %v1654_v7 = vld [vmem:[#allocation3 + $0x78] sm:$0xff] }
 0xb79   :  { %1493 = vst.msk [vmem:[#allocation2 + $0x10] sm:$0xff] %vm1284_vm9, %v1491_v11  ;;  %3063 = vmatpush3.msra.mxu1 %v1568_v10 }
 0xb7a   :  { %3064 = vmatprep.subr.mxu1 %v1567_v48 }
 0xb7b   :  { %v1480_v8 = vpop.permute.xlu1 %1479  ;;  %3065 = vmatpush3.msra.mxu1 %v1567_v48  ;;  %v1566_v9 = vld [vmem:[#allocation2 + $0x50] sm:$0xff] }
 0xb7c   :  { %1482 = vst.msk [vmem:[#allocation2] sm:$0xff] %vm1284_vm9, %v1480_v8  ;;  %3066 = vmatprep.subr.mxu1 %v1566_v9  ;;  %v1564_v14 = vld [vmem:[#allocation2 + $0x30] sm:$0xff] }
 0xb7d   :  { %3067 = vmatpush3.msra.mxu1 %v1566_v9 }
 0xb7e   :  { %3068 = vmatprep.subr.mxu1 %v1565_v13 }
 0xb7f   :  { %3069 = vmatpush3.msra.mxu1 %v1565_v13  ;;  %v1563_v15 = vld [vmem:[#allocation2 + $0x20] sm:$0xff] }
 0xb80   :  { %3070 = vmatprep.subr.mxu1 %v1564_v14  ;;  %v1562_v17 = vld [vmem:[#allocation2 + $0x10] sm:$0xff] }
 0xb81   :  { %3071 = vmatpush3.msra.mxu1 %v1564_v14 }
 0xb82   :  { %3072 = vmatprep.subr.mxu1 %v1563_v15 }
 0xb83   :  { %3073 = vmatpush3.msra.mxu1 %v1563_v15  ;;  %v1561_v12 = vld [vmem:[#allocation2] sm:$0xff] }
 0xb84   :  { %3074 = vmatprep.subr.mxu1 %v1562_v17 }
 0xb85   :  { %3075 = vmatpush3.msra.mxu1 %v1562_v17 }
 0xb86   :  { %3076 = vmatprep.subr.mxu1 %v1561_v12 }
 0xb87   :  { %3077 = vmatpush3.msra.mxu1 %v1561_v12 }
 0xb88   :  { %3079 = vmatmul.mubr.msk.f32.vlgmr.msra.gmra.mxu1 %vm252_vm8, %v1465_v16  ;;  %3104 = vmatprep.subr.mxu1 %v4071_v24 }
 0xb89   :  { %3105 = vmatpush3.msra.mxu1 %v4071_v24 }
 0xc48   :  { %v3080_v18 = vpop.f32.mrf.mxu1 }
 0xc4a   :  { %v1643_v19 = vpop.f32.mrf.mxu1 }
 0xc4b   :  { %v1651_v22 = vmax.f32 %v1643_v19, 0.0 }
 0xc4d   :  { %1705 = vst.msk [vmem:[#allocation2 + $0x40] sm:$0xff] %vm1284_vm9, %v1651_v22  ;;  %1655 = vrot.lane.b32.xlu0 %v1651_v22, %s3415_s2 }
 0xc51   :  { %1741 = vrot.lane.b32.xlu0 %v4080_v36, %s3416_s14 }
 0xc54   :  { %v1754_v60 = vld [vmem:[#allocation2 + $0x40] sm:$0xff] }
 0xc55   :  { %1719 = vrot.lane.b32.xlu0 %v4084_v46, %s3417_s15 }
 0xc59   :  { %1696 = vrot.lane.b32.xlu0 %v4089_v47, %s3418_s3 }
 0xc5d   :  { %1674 = vrot.lane.b32.xlu0 %v4093_v40, %s3419_s21 }
 0xcbf   :  { %v1656_v23 = vpop.permute.xlu0 %1655 }
 0xcc0   :  { %v1657_v20 = vsel %vm1267_vm10, %v1656_v23, %v1651_v22  ;;  %v1843_v23 = vld [vmem:[#allocation3 + $0x80] sm:$0xff] }
 0xcc1   :  { %1658 = vrot.lane.b32.xlu1 %v1657_v20, %s3415_s2  ;;  %3124 = vmatprep.mubr.msk.f32.mxu1 %vm252_vm8, %v1843_v23 }
 0xcc3   :  { %v1742_v21 = vpop.permute.xlu0 %1741 }
 0xcc5   :  { %1730 = vrot.lane.b32.xlu1 %v4099_v54, %s3400_s11 }
 0xcc7   :  { %v1720_v25 = vpop.permute.xlu0 %1719 }
 0xcc9   :  { %1708 = vrot.lane.b32.xlu1 %v4103_v55, %s3410_s0 }
 0xccb   :  { %v1697_v27 = vpop.permute.xlu0 %1696 }
 0xccd   :  { %1685 = vrot.lane.b32.xlu1 %v4107_v43, %s3420_s22 }
 0xccf   :  { %v1675_v1 = vpop.permute.xlu0 %1674 }
 0xcd1   :  { %1663 = vrot.lane.b32.xlu1 %v4111_v44, %s3421_s5 }
 0xd33   :  { %v1659_v5 = vpop.permute.xlu1 %1658 }
 0xd34   :  { %v1660_v26 = vsel %vm1267_vm10, %v1659_v5, %v1651_v22  ;;  %v2036_v5 = vld [vmem:[#allocation10 + $0x28] sm:$0xff] }
 0xd35   :  { %v1744_v30 = vmul.f32 %v1742_v21, %v1660_v26  ;;  %v1722_v29 = vmul.f32 %v1720_v25, %v1660_v26  ;;  %v1699_v34 = vmul.f32 %v1697_v27, %v1660_v26  ;;  %v1677_v41 = vmul.f32 %v1675_v1, %v1660_v26  ;;  %v2038_v21 = vld [vmem:[#allocation10 + $0x38] sm:$0xff]  ;;  %v2037_v25 = vld [vmem:[#allocation10 + $0x30] sm:$0xff] }
 0xd37   :  { %v1731_v31 = vpop.permute.xlu1 %1730  ;;  %1746 = vrot.lane.b32.xlu0 %v1744_v30, %s3422_s23  ;;  %v2034_v30 = vld [vmem:[#allocation10 + $0x18] sm:$0xff] }
 0xd38   :  { %v1733_v28 = vmul.f32 %v1731_v31, %v1660_v26  ;;  %v2033_v31 = vld [vmem:[#allocation10 + $0x10] sm:$0xff] }
 0xd3a   :  { %1735 = vrot.lane.b32.xlu1 %v1733_v28, %s3423_s24 }
 0xd3b   :  { %v1709_v38 = vpop.permute.xlu1 %1708  ;;  %1724 = vrot.lane.b32.xlu0 %v1722_v29, %s3424_s25 }
 0xd3c   :  { %v1711_v39 = vmul.f32 %v1709_v38, %v1660_v26 }
 0xd3e   :  { %1713 = vrot.lane.b32.xlu1 %v1711_v39, %s3409_s17 }
 0xd3f   :  { %v1686_v2 = vpop.permute.xlu1 %1685  ;;  %1701 = vrot.lane.b32.xlu0 %v1699_v34, %s3425_s26 }
 0xd40   :  { %v1688_v37 = vmul.f32 %v1686_v2, %v1660_v26 }
 0xd42   :  { %1690 = vrot.lane.b32.xlu1 %v1688_v37, %s3426_s27 }
 0xd43   :  { %v1664_v42 = vpop.permute.xlu1 %1663  ;;  %1679 = vrot.lane.b32.xlu0 %v1677_v41, %s3427_s28 }
 0xd44   :  { %v1666_v49 = vmul.f32 %v1664_v42, %v1660_v26  ;;  %v2035_v26 = vld [vmem:[#allocation10 + $0x20] sm:$0xff] }
 0xd46   :  { %1668 = vrot.lane.b32.xlu1 %v1666_v49, %s3428_s1 }
 0xda9   :  { %v1747_v63 = vpop.permute.xlu0 %1746 }
 0xdaa   :  { %1749 = vst.msk [vmem:[#allocation2 + $0x80] sm:$0xff] %vm1284_vm9, %v1747_v63 }
 0xdac   :  { %v1736_v33 = vpop.permute.xlu1 %1735 }
 0xdad   :  { %1738 = vst.msk [vmem:[#allocation2 + $0x70] sm:$0xff] %vm1284_vm9, %v1736_v33  ;;  %v1725_v35 = vpop.permute.xlu0 %1724 }
 0xdae   :  { %1727 = vst.msk [vmem:[#allocation2 + $0x60] sm:$0xff] %vm1284_vm9, %v1725_v35 }
 0xdb0   :  { %v1714_v50 = vpop.permute.xlu1 %1713 }
 0xdb1   :  { %1716 = vst.msk [vmem:[#allocation2 + $0x50] sm:$0xff] %vm1284_vm9, %v1714_v50  ;;  %v1702_v0 = vpop.permute.xlu0 %1701  ;;  %v1758_v51 = vld [vmem:[#allocation2 + $0x80] sm:$0xff] }
 0xdb2   :  { %1704 = vst.msk [vmem:[#allocation2 + $0x30] sm:$0xff] %vm1284_vm9, %v1702_v0  ;;  %3083 = vmatprep.subr.mxu0 %v1758_v51  ;;  %v1844_v0 = vld [vmem:[#allocation3 + $0x88] sm:$0xff] }
 0xdb3   :  { %3084 = vmatpush3.msra.mxu0 %v1758_v51  ;;  %v2032_v51 = vld [vmem:[#allocation10 + $0x8] sm:$0xff] }
 0xdb4   :  { %v1691_v52 = vpop.permute.xlu1 %1690  ;;  %v1757_v53 = vld [vmem:[#allocation2 + $0x70] sm:$0xff] }
 0xdb5   :  { %1693 = vst.msk [vmem:[#allocation2 + $0x20] sm:$0xff] %vm1284_vm9, %v1691_v52  ;;  %3085 = vmatprep.subr.mxu0 %v1757_v53  ;;  %v1680_v56 = vpop.permute.xlu0 %1679  ;;  %v1756_v57 = vld [vmem:[#allocation2 + $0x60] sm:$0xff]  ;;  %v2031_v52 = vld [vmem:[#allocation10] sm:$0xff] }
 0xdb6   :  { %1682 = vst.msk [vmem:[#allocation2 + $0x10] sm:$0xff] %vm1284_vm9, %v1680_v56  ;;  %3086 = vmatpush3.msra.mxu0 %v1757_v53 }
 0xdb7   :  { %3087 = vmatprep.subr.mxu0 %v1756_v57 }
 0xdb8   :  { %v1669_v58 = vpop.permute.xlu1 %1668  ;;  %3088 = vmatpush3.msra.mxu0 %v1756_v57  ;;  %v1755_v59 = vld [vmem:[#allocation2 + $0x50] sm:$0xff] }
 0xdb9   :  { %1671 = vst.msk [vmem:[#allocation2] sm:$0xff] %vm1284_vm9, %v1669_v58  ;;  %3089 = vmatprep.subr.mxu0 %v1755_v59  ;;  %v1753_v61 = vld [vmem:[#allocation2 + $0x30] sm:$0xff] }
 0xdba   :  { %3090 = vmatpush3.msra.mxu0 %v1755_v59 }
 0xdbb   :  { %3091 = vmatprep.subr.mxu0 %v1754_v60 }
 0xdbc   :  { %3092 = vmatpush3.msra.mxu0 %v1754_v60  ;;  %v1752_v4 = vld [vmem:[#allocation2 + $0x20] sm:$0xff]  ;;  %v4272_v60 = vld [vmem:[#allocation7 + $0x40] sm:$0xff] }
 0xdbd   :  { %3093 = vmatprep.subr.mxu0 %v1753_v61  ;;  %v1751_v6 = vld [vmem:[#allocation2 + $0x10] sm:$0xff] }
 0xdbe   :  { %3094 = vmatpush3.msra.mxu0 %v1753_v61  ;;  %v4276_v61 = vld [vmem:[#allocation7 + $0x30] sm:$0xff] }
 0xdbf   :  { %3095 = vmatprep.subr.mxu0 %v1752_v4 }
 0xdc0   :  { %3096 = vmatpush3.msra.mxu0 %v1752_v4  ;;  %v1750_v62 = vld [vmem:[#allocation2] sm:$0xff]  ;;  %v4284_v4 = vld [vmem:[#allocation7 + $0x8] sm:$0xff] }
 0xdc1   :  { %3097 = vmatprep.subr.mxu0 %v1751_v6 }
 0xdc2   :  { %3098 = vmatpush3.msra.mxu0 %v1751_v6 }
 0xdc3   :  { %3099 = vmatprep.subr.mxu0 %v1750_v62 }
 0xdc4   :  { %3100 = vmatpush3.msra.mxu0 %v1750_v62 }
 0xdc5   :  { %3102 = vmatmul.mubr.msk.f32.vlgmr.msra.gmra.mxu0 %vm252_vm8, %v1654_v7  ;;  %3127 = vmatprep.subr.mxu0 %v2038_v21  ;;  %v4290_v7 = vld [vmem:[#allocation7 + $0x38] sm:$0xff] }
 0xdc6   :  { %3128 = vmatpush3.msra.mxu0 %v2038_v21 }
 0xdc7   :  { %3129 = vmatprep.subr.mxu0 %v2037_v25 }
 0xdc8   :  { %3130 = vmatpush3.msra.mxu0 %v2037_v25 }
 0xdc9   :  { %3131 = vmatprep.subr.mxu0 %v2036_v5 }
 0xdca   :  { %3132 = vmatpush3.msra.mxu0 %v2036_v5 }
 0xdcb   :  { %3133 = vmatprep.subr.mxu0 %v2035_v26 }
 0xdcc   :  { %3134 = vmatpush3.msra.mxu0 %v2035_v26 }
 0xdcd   :  { %3135 = vmatprep.subr.mxu0 %v2034_v30 }
 0xdce   :  { %3136 = vmatpush3.msra.mxu0 %v2034_v30 }
 0xdcf   :  { %3137 = vmatprep.subr.mxu0 %v2033_v31 }
 0xdd0   :  { %3138 = vmatpush3.msra.mxu0 %v2033_v31 }
 0xdd1   :  { %3139 = vmatprep.subr.mxu0 %v2032_v51 }
 0xdd2   :  { %3140 = vmatpush3.msra.mxu0 %v2032_v51 }
 0xdd3   :  { %3141 = vmatprep.subr.mxu0 %v2031_v52 }
 0xdd4   :  { %3142 = vmatpush3.msra.mxu0 %v2031_v52 }
 0xdd5   :  { %3169 = vmatprep.subr.mxu0 %v4071_v24 }
 0xe85   :  { %v3103_v10 = vpop.f32.mrf.mxu0 }
 0xe86   :  { %v4294_v10 = vld [vmem:[#allocation7 + $0x28] sm:$0xff] }
 0xe87   :  { %v1832_v11 = vpop.f32.mrf.mxu0 }
 0xe88   :  { %v1840_v48 = vadd.f32 %v1832_v11, %v4136_v32  ;;  %v4298_v11 = vld [vmem:[#allocation7 + $0x10] sm:$0xff] }
 0xe8a   :  { %v1841_v8 = vmax.f32 %v1840_v48, 0.0  ;;  %v4302_v48 = vld [vmem:[#allocation7] sm:$0xff] }
 0xe8c   :  { %1895 = vst.msk [vmem:[#allocation2 + $0x40] sm:$0xff] %vm1284_vm9, %v1841_v8  ;;  %1845 = vrot.lane.b32.xlu0 %v1841_v8, %s3415_s2 }
 0xe90   :  { %1931 = vrot.lane.b32.xlu0 %v4080_v36, %s3416_s14 }
 0xe93   :  { %v1944_v49 = vld [vmem:[#allocation2 + $0x40] sm:$0xff] }
 0xe94   :  { %1909 = vrot.lane.b32.xlu0 %v4084_v46, %s3417_s15 }
 0xe98   :  { %1886 = vrot.lane.b32.xlu0 %v4089_v47, %s3418_s3 }
 0xe9c   :  { %1864 = vrot.lane.b32.xlu0 %v4093_v40, %s3419_s21 }
 0xefe   :  { %v1846_v9 = vpop.permute.xlu0 %1845 }
 0xeff   :  { %v1847_v32 = vsel %vm1267_vm10, %v1846_v9, %v1841_v8 }
 0xf00   :  { %1848 = vrot.lane.b32.xlu1 %v1847_v32, %s3415_s2  ;;  %s3440_s2 = smov 117  }
 0xf02   :  { %v1932_v36 = vpop.permute.xlu0 %1931 }
 0xf04   :  { %1920 = vrot.lane.b32.xlu1 %v4099_v54, %s3400_s11  ;;  %s3429_s11 = smov 5  }
 0xf06   :  { %v1910_v46 = vpop.permute.xlu0 %1909 }
 0xf08   :  { %1898 = vrot.lane.b32.xlu1 %v4103_v55, %s3410_s0 }
 0xf0a   :  { %v1887_v15 = vpop.permute.xlu0 %1886 }
 0xf0c   :  { %1875 = vrot.lane.b32.xlu1 %v4107_v43, %s3420_s22 }
 0xf10   :  { %1853 = vrot.lane.b32.xlu1 %v4111_v44, %s3421_s5  ;;  %v1865_v44 = vpop.permute.xlu0 %1864 }
 0xf72   :  { %v1849_v47 = vpop.permute.xlu1 %1848 }
 0xf73   :  { %v1850_v40 = vsel %vm1267_vm10, %v1849_v47, %v1841_v8 }
 0xf74   :  { %v1934_v13 = vmul.f32 %v1932_v36, %v1850_v40  ;;  %v1912_v17 = vmul.f32 %v1910_v46, %v1850_v40  ;;  %v1889_v12 = vmul.f32 %v1887_v15, %v1850_v40  ;;  %v1867_v19 = vmul.f32 %v1865_v44, %v1850_v40 }
 0xf76   :  { %v1921_v14 = vpop.permute.xlu1 %1920  ;;  %1936 = vrot.lane.b32.xlu0 %v1934_v13, %s3422_s23 }
 0xf77   :  { %v1923_v54 = vmul.f32 %v1921_v14, %v1850_v40 }
 0xf79   :  { %1925 = vrot.lane.b32.xlu1 %v1923_v54, %s3423_s24 }
 0xf7a   :  { %v1899_v55 = vpop.permute.xlu1 %1898  ;;  %1914 = vrot.lane.b32.xlu0 %v1912_v17, %s3424_s25 }
 0xf7b   :  { %v1901_v43 = vmul.f32 %v1899_v55, %v1850_v40 }
 0xf7d   :  { %1903 = vrot.lane.b32.xlu1 %v1901_v43, %s3409_s17 }
 0xf7e   :  { %v1876_v16 = vpop.permute.xlu1 %1875  ;;  %1891 = vrot.lane.b32.xlu0 %v1889_v12, %s3425_s26 }
 0xf7f   :  { %v1878_v18 = vmul.f32 %v1876_v16, %v1850_v40 }
 0xf81   :  { %1880 = vrot.lane.b32.xlu1 %v1878_v18, %s3426_s27  ;;  %v2122_v18 = vld [vmem:[#allocation3 + $0x90] sm:$0xff] }
 0xf82   :  { %v1854_v22 = vpop.permute.xlu1 %1853  ;;  %1869 = vrot.lane.b32.xlu0 %v1867_v19, %s3427_s28 }
 0xf83   :  { %v1856_v20 = vmul.f32 %v1854_v22, %v1850_v40 }
 0xf85   :  { %1858 = vrot.lane.b32.xlu1 %v1856_v20, %s3428_s1 }
 0xfe8   :  { %v1937_v27 = vpop.permute.xlu0 %1936 }
 0xfe9   :  { %1939 = vst.msk [vmem:[#allocation2 + $0x80] sm:$0xff] %vm1284_vm9, %v1937_v27 }
 0xfeb   :  { %v1926_v28 = vpop.permute.xlu1 %1925 }
 0xfec   :  { %1928 = vst.msk [vmem:[#allocation2 + $0x70] sm:$0xff] %vm1284_vm9, %v1926_v28  ;;  %v1915_v29 = vpop.permute.xlu0 %1914 }
 0xfed   :  { %1917 = vst.msk [vmem:[#allocation2 + $0x60] sm:$0xff] %vm1284_vm9, %v1915_v29 }
 0xfef   :  { %v1904_v38 = vpop.permute.xlu1 %1903 }
 0xff0   :  { %1906 = vst.msk [vmem:[#allocation2 + $0x50] sm:$0xff] %vm1284_vm9, %v1904_v38  ;;  %v1892_v39 = vpop.permute.xlu0 %1891  ;;  %v1948_v34 = vld [vmem:[#allocation2 + $0x80] sm:$0xff] }
 0xff1   :  { %1894 = vst.msk [vmem:[#allocation2 + $0x30] sm:$0xff] %vm1284_vm9, %v1892_v39  ;;  %3106 = vmatprep.subr.mxu1 %v1948_v34 }
 0xff2   :  { %3107 = vmatpush3.msra.mxu1 %v1948_v34 }
 0xff3   :  { %v1881_v1 = vpop.permute.xlu1 %1880  ;;  %v1947_v2 = vld [vmem:[#allocation2 + $0x70] sm:$0xff] }
 0xff4   :  { %1883 = vst.msk [vmem:[#allocation2 + $0x20] sm:$0xff] %vm1284_vm9, %v1881_v1  ;;  %3108 = vmatprep.subr.mxu1 %v1947_v2  ;;  %v1870_v37 = vpop.permute.xlu0 %1869  ;;  %v1946_v41 = vld [vmem:[#allocation2 + $0x60] sm:$0xff] }
 0xff5   :  { %1872 = vst.msk [vmem:[#allocation2 + $0x10] sm:$0xff] %vm1284_vm9, %v1870_v37  ;;  %3109 = vmatpush3.msra.mxu1 %v1947_v2  ;;  %v2123_v37 = vld [vmem:[#allocation3 + $0x98] sm:$0xff] }
 0xff6   :  { %3110 = vmatprep.subr.mxu1 %v1946_v41 }
 0xff7   :  { %v1859_v42 = vpop.permute.xlu1 %1858  ;;  %3111 = vmatpush3.msra.mxu1 %v1946_v41  ;;  %v1945_v45 = vld [vmem:[#allocation2 + $0x50] sm:$0xff]  ;;  %v3268_v41 = vld [vmem:[#allocation2 + $0x98] sm:$0xff] }
 0xff8   :  { %1861 = vst.msk [vmem:[#allocation2] sm:$0xff] %vm1284_vm9, %v1859_v42  ;;  %3112 = vmatprep.subr.mxu1 %v1945_v45  ;;  %v1943_v63 = vld [vmem:[#allocation2 + $0x30] sm:$0xff] }
 0xff9   :  { %3113 = vmatpush3.msra.mxu1 %v1945_v45 }
 0xffa   :  { %3114 = vmatprep.subr.mxu1 %v1944_v49 }
 0xffb   :  { %3115 = vmatpush3.msra.mxu1 %v1944_v49  ;;  %v1942_v33 = vld [vmem:[#allocation2 + $0x20] sm:$0xff] }
 0xffc   :  { %3116 = vmatprep.subr.mxu1 %v1943_v63  ;;  %v1941_v35 = vld [vmem:[#allocation2 + $0x10] sm:$0xff] }
 0xffd   :  { %3117 = vmatpush3.msra.mxu1 %v1943_v63 }
 0xffe   :  { %3118 = vmatprep.subr.mxu1 %v1942_v33 }
 0xfff   :  { %3119 = vmatpush3.msra.mxu1 %v1942_v33  ;;  %v1940_v50 = vld [vmem:[#allocation2] sm:$0xff] }
0x1000   :  { %3120 = vmatprep.subr.mxu1 %v1941_v35 }
0x1001   :  { %3121 = vmatpush3.msra.mxu1 %v1941_v35 }
0x1002   :  { %3122 = vmatprep.subr.mxu1 %v1940_v50 }
0x1003   :  { %3123 = vmatpush3.msra.mxu1 %v1940_v50 }
0x1004   :  { %3125 = vmatmul.mubr.msk.f32.vlgmr.msra.gmra.mxu1 %vm252_vm8, %v1844_v0  ;;  %3146 = vmatprep.subr.mxu1 %v4071_v24 }
0x1005   :  { %3147 = vmatpush3.msra.mxu1 %v4071_v24  ;;  %3166 = vmatprep.mubr.msk.f32.mxu1 %vm252_vm8, %v2122_v18 }
0x10c4   :  { %v3126_v53 = vpop.f32.mrf.mxu1 }
0x10c6   :  { %v2022_v56 = vpop.f32.mrf.mxu1 }
0x10c7   :  { %3143 = vmatprep.mubr.msk.f32.mxu0 %vm1284_vm9, %v2022_v56 }
0x10c8   :  { %3144 = vmatmul.mubr.msk.f32.vlgmr.msra.gmra.mxu0 %vm1284_vm9, %v3126_v53 }
0x10c9   :  { %3170 = vmatpush3.msra.mxu0 %v4071_v24  ;;  %v4280_v24 = vld [vmem:[#allocation7 + $0x18] sm:$0xff] }
0x1188   :  { %v4268_v57 = vpop.f32.mrf.mxu0 }
0x118a   :  { %v2111_v58 = vpop.f32.mrf.mxu0 }
0x118b   :  { %v2120_v59 = vmax.f32 %v2111_v58, 0.0 }
0x118d   :  { %2179 = vst.msk [vmem:[#allocation2 + $0x40] sm:$0xff] %vm2141_vm11, %v2120_v59  ;;  %2125 = vrot.lane.b32.xlu0 %v2120_v59, %s3413_s19 }
0x1191   :  { %2219 = vrot.lane.b32.xlu0 %v4272_v60, %s3429_s11 }
0x1194   :  { %v2232_v38 = vld [vmem:[#allocation2 + $0x40] sm:$0xff] }
0x1195   :  { %2195 = vrot.lane.b32.xlu0 %v4276_v61, %s3430_s29 }
0x1199   :  { %2170 = vrot.lane.b32.xlu0 %v4280_v24, %s3412_s18 }
0x119d   :  { %2146 = vrot.lane.b32.xlu0 %v4284_v4, %s3431_s10 }
0x11ff   :  { %v2126_v6 = vpop.permute.xlu0 %2125 }
0x1200   :  { %v2127_v62 = vsel %vm2124_vm12, %v2126_v6, %v2120_v59 }
0x1201   :  { %2128 = vrot.lane.b32.xlu1 %v2127_v62, %s3413_s19 }
0x1203   :  { %v2220_v8 = vpop.permute.xlu0 %2219 }
0x1205   :  { %2207 = vrot.lane.b32.xlu1 %v4290_v7, %s3432_s13 }
0x1207   :  { %v2196_v9 = vpop.permute.xlu0 %2195 }
0x1209   :  { %2183 = vrot.lane.b32.xlu1 %v4294_v10, %s3410_s0 }
0x120b   :  { %v2171_v40 = vpop.permute.xlu0 %2170 }
0x120d   :  { %2158 = vrot.lane.b32.xlu1 %v4298_v11, %s3433_s20 }
0x120f   :  { %v2147_v55 = vpop.permute.xlu0 %2146 }
0x1211   :  { %2133 = vrot.lane.b32.xlu1 %v4302_v48, %s3434_s30 }
0x1273   :  { %v2129_v32 = vpop.permute.xlu1 %2128 }
0x1274   :  { %v2130_v36 = vsel %vm2124_vm12, %v2129_v32, %v2120_v59 }
0x1275   :  { %v2222_v46 = vmul.f32 %v2220_v8, %v2130_v36  ;;  %v2198_v14 = vmul.f32 %v2196_v9, %v2130_v36  ;;  %v2173_v17 = vmul.f32 %v2171_v40, %v2130_v36  ;;  %v2149_v44 = vmul.f32 %v2147_v55, %v2130_v36  ;;  %v2321_v40 = vld [vmem:[#allocation3 + $0xa0] sm:$0xff] }
0x1276   :  { %3189 = vmatprep.mubr.msk.f32.mxu0 %vm252_vm8, %v2321_v40 }
0x1277   :  { %v2208_v47 = vpop.permute.xlu1 %2207  ;;  %2224 = vrot.lane.b32.xlu0 %v2222_v46, %s3435_s4 }
0x1278   :  { %v2210_v13 = vmul.f32 %v2208_v47, %v2130_v36 }
0x127a   :  { %2212 = vrot.lane.b32.xlu1 %v2210_v13, %s3436_s9 }
0x127b   :  { %v2184_v15 = vpop.permute.xlu1 %2183  ;;  %2200 = vrot.lane.b32.xlu0 %v2198_v14, %s3437_s12 }
0x127c   :  { %v2186_v54 = vmul.f32 %v2184_v15, %v2130_v36 }
0x127e   :  { %2188 = vrot.lane.b32.xlu1 %v2186_v54, %s3409_s17 }
0x127f   :  { %v2159_v43 = vpop.permute.xlu1 %2158  ;;  %2175 = vrot.lane.b32.xlu0 %v2173_v17, %s3408_s16 }
0x1280   :  { %v2161_v12 = vmul.f32 %v2159_v43, %v2130_v36 }
0x1282   :  { %2163 = vrot.lane.b32.xlu1 %v2161_v12, %s3438_s6 }
0x1283   :  { %v2134_v16 = vpop.permute.xlu1 %2133  ;;  %2151 = vrot.lane.b32.xlu0 %v2149_v44, %s3439_s7 }
0x1284   :  { %v2136_v19 = vmul.f32 %v2134_v16, %v2130_v36 }
0x1286   :  { %2138 = vrot.lane.b32.xlu1 %v2136_v19, %s3440_s2 }
0x12e9   :  { %v2225_v22 = vpop.permute.xlu0 %2224 }
0x12ea   :  { %2227 = vst.msk [vmem:[#allocation2 + $0x80] sm:$0xff] %vm2141_vm11, %v2225_v22 }
0x12ec   :  { %v2213_v23 = vpop.permute.xlu1 %2212 }
0x12ed   :  { %2215 = vst.msk [vmem:[#allocation2 + $0x70] sm:$0xff] %vm2141_vm11, %v2213_v23  ;;  %v2201_v20 = vpop.permute.xlu0 %2200 }
0x12ee   :  { %2203 = vst.msk [vmem:[#allocation2 + $0x60] sm:$0xff] %vm2141_vm11, %v2201_v20 }
0x12f0   :  { %v2189_v21 = vpop.permute.xlu1 %2188 }
0x12f1   :  { %2191 = vst.msk [vmem:[#allocation2 + $0x50] sm:$0xff] %vm2141_vm11, %v2189_v21  ;;  %v2176_v25 = vpop.permute.xlu0 %2175  ;;  %v2236_v5 = vld [vmem:[#allocation2 + $0x80] sm:$0xff] }
0x12f2   :  { %2178 = vst.msk [vmem:[#allocation2 + $0x30] sm:$0xff] %vm2141_vm11, %v2176_v25  ;;  %3148 = vmatprep.subr.mxu1 %v2236_v5 }
0x12f3   :  { %3149 = vmatpush3.msra.mxu1 %v2236_v5 }
0x12f4   :  { %v2164_v26 = vpop.permute.xlu1 %2163  ;;  %v2235_v30 = vld [vmem:[#allocation2 + $0x70] sm:$0xff] }
0x12f5   :  { %2166 = vst.msk [vmem:[#allocation2 + $0x20] sm:$0xff] %vm2141_vm11, %v2164_v26  ;;  %3150 = vmatprep.subr.mxu1 %v2235_v30  ;;  %v2152_v31 = vpop.permute.xlu0 %2151  ;;  %v2234_v27 = vld [vmem:[#allocation2 + $0x60] sm:$0xff]  ;;  %v2322_v26 = vld [vmem:[#allocation3 + $0xa8] sm:$0xff] }
0x12f6   :  { %2154 = vst.msk [vmem:[#allocation2 + $0x10] sm:$0xff] %vm2141_vm11, %v2152_v31  ;;  %3151 = vmatpush3.msra.mxu1 %v2235_v30 }
0x12f7   :  { %3152 = vmatprep.subr.mxu1 %v2234_v27 }
0x12f8   :  { %v2139_v28 = vpop.permute.xlu1 %2138  ;;  %3153 = vmatpush3.msra.mxu1 %v2234_v27  ;;  %v2233_v29 = vld [vmem:[#allocation2 + $0x50] sm:$0xff] }
0x12f9   :  { %2142 = vst.msk [vmem:[#allocation2] sm:$0xff] %vm2141_vm11, %v2139_v28  ;;  %3154 = vmatprep.subr.mxu1 %v2233_v29  ;;  %v2231_v39 = vld [vmem:[#allocation2 + $0x30] sm:$0xff] }
0x12fa   :  { %3155 = vmatpush3.msra.mxu1 %v2233_v29 }
0x12fb   :  { %3156 = vmatprep.subr.mxu1 %v2232_v38 }
0x12fc   :  { %3157 = vmatpush3.msra.mxu1 %v2232_v38  ;;  %v2230_v34 = vld [vmem:[#allocation2 + $0x20] sm:$0xff] }
0x12fd   :  { %3158 = vmatprep.subr.mxu1 %v2231_v39  ;;  %v2229_v1 = vld [vmem:[#allocation2 + $0x10] sm:$0xff] }
0x12fe   :  { %3159 = vmatpush3.msra.mxu1 %v2231_v39 }
0x12ff   :  { %3160 = vmatprep.subr.mxu1 %v2230_v34 }
0x1300   :  { %3161 = vmatpush3.msra.mxu1 %v2230_v34  ;;  %v2228_v2 = vld [vmem:[#allocation2] sm:$0xff] }
0x1301   :  { %3162 = vmatprep.subr.mxu1 %v2229_v1 }
0x1302   :  { %3163 = vmatpush3.msra.mxu1 %v2229_v1 }
0x1303   :  { %3164 = vmatprep.subr.mxu1 %v2228_v2 }
0x1304   :  { %3165 = vmatpush3.msra.mxu1 %v2228_v2 }
0x1305   :  { %3167 = vmatmul.mubr.msk.f32.vlgmr.msra.gmra.mxu1 %vm252_vm8, %v2123_v37  ;;  %3192 = vmatprep.subr.mxu1 %v3268_v41 }
0x1306   :  { %3193 = vmatpush3.msra.mxu1 %v3268_v41 }
0x13c5   :  { %v3168_v42 = vpop.f32.mrf.mxu1 }
0x13c7   :  { %v2310_v45 = vpop.f32.mrf.mxu1 }
0x13c8   :  { %v2318_v49 = vadd.f32 %v4268_v57, %v2310_v45 }
0x13ca   :  { %v4326_v63 = vmax.f32 %v2318_v49, 0.0  ;;  %v2510_v49 = vld [vmem:[#allocation3 + $0xb0] sm:$0xff] }
0x13cb   :  { %3212 = vmatprep.mubr.msk.f32.mxu1 %vm252_vm8, %v2510_v49 }
0x13cc   :  { %2373 = vst.msk [vmem:[#allocation2 + $0x40] sm:$0xff] %vm2141_vm11, %v4326_v63  ;;  %2323 = vrot.lane.b32.xlu0 %v4326_v63, %s3413_s19 }
0x13d0   :  { %2409 = vrot.lane.b32.xlu0 %v4272_v60, %s3429_s11 }
0x13d3   :  { %v2422_v23 = vld [vmem:[#allocation2 + $0x40] sm:$0xff] }
0x13d4   :  { %2387 = vrot.lane.b32.xlu0 %v4276_v61, %s3430_s29 }
0x13d8   :  { %2364 = vrot.lane.b32.xlu0 %v4280_v24, %s3412_s18 }
0x13dc   :  { %2342 = vrot.lane.b32.xlu0 %v4284_v4, %s3431_s10 }
0x143e   :  { %v2324_v33 = vpop.permute.xlu0 %2323 }
0x143f   :  { %v2325_v35 = vsel %vm2124_vm12, %v2324_v33, %v4326_v63 }
0x1440   :  { %2326 = vrot.lane.b32.xlu1 %v2325_v35, %s3413_s19 }
0x1442   :  { %v2410_v50 = vpop.permute.xlu0 %2409 }
0x1444   :  { %2398 = vrot.lane.b32.xlu1 %v4290_v7, %s3432_s13 }
0x1446   :  { %v2388_v0 = vpop.permute.xlu0 %2387 }
0x1448   :  { %2376 = vrot.lane.b32.xlu1 %v4294_v10, %s3410_s0 }
0x144a   :  { %v2365_v57 = vpop.permute.xlu0 %2364 }
0x144c   :  { %2353 = vrot.lane.b32.xlu1 %v4298_v11, %s3433_s20 }
0x144e   :  { %v2343_v9 = vpop.permute.xlu0 %2342 }
0x1450   :  { %2331 = vrot.lane.b32.xlu1 %v4302_v48, %s3434_s30 }
0x14b2   :  { %v2327_v51 = vpop.permute.xlu1 %2326 }
0x14b3   :  { %v2328_v52 = vsel %vm2124_vm12, %v2327_v51, %v4326_v63 }
0x14b4   :  { %v2412_v53 = vmul.f32 %v2410_v50, %v2328_v52  ;;  %v2390_v59 = vmul.f32 %v2388_v0, %v2328_v52  ;;  %v2367_v8 = vmul.f32 %v2365_v57, %v2328_v52  ;;  %v2345_v46 = vmul.f32 %v2343_v9, %v2328_v52 }
0x14b6   :  { %v2399_v56 = vpop.permute.xlu1 %2398  ;;  %2414 = vrot.lane.b32.xlu0 %v2412_v53, %s3435_s4 }
0x14b7   :  { %v2401_v58 = vmul.f32 %v2399_v56, %v2328_v52 }
0x14b9   :  { %2403 = vrot.lane.b32.xlu1 %v2401_v58, %s3436_s9 }
0x14ba   :  { %v2377_v6 = vpop.permute.xlu1 %2376  ;;  %2392 = vrot.lane.b32.xlu0 %v2390_v59, %s3437_s12 }
0x14bb   :  { %v2379_v62 = vmul.f32 %v2377_v6, %v2328_v52 }
0x14bd   :  { %2381 = vrot.lane.b32.xlu1 %v2379_v62, %s3409_s17 }
0x14be   :  { %v2354_v32 = vpop.permute.xlu1 %2353  ;;  %2369 = vrot.lane.b32.xlu0 %v2367_v8, %s3408_s16 }
0x14bf   :  { %v2356_v36 = vmul.f32 %v2354_v32, %v2328_v52 }
0x14c1   :  { %2358 = vrot.lane.b32.xlu1 %v2356_v36, %s3438_s6 }
0x14c2   :  { %v2332_v47 = vpop.permute.xlu1 %2331  ;;  %2347 = vrot.lane.b32.xlu0 %v2345_v46, %s3439_s7 }
0x14c3   :  { %v2334_v13 = vmul.f32 %v2332_v47, %v2328_v52  ;;  %v2511_v47 = vld [vmem:[#allocation3 + $0xb8] sm:$0xff] }
0x14c5   :  { %2336 = vrot.lane.b32.xlu1 %v2334_v13, %s3440_s2 }
0x1528   :  { %v2415_v14 = vpop.permute.xlu0 %2414 }
0x1529   :  { %2417 = vst.msk [vmem:[#allocation2 + $0x80] sm:$0xff] %vm2141_vm11, %v2415_v14 }
0x152b   :  { %v2404_v15 = vpop.permute.xlu1 %2403 }
0x152c   :  { %2406 = vst.msk [vmem:[#allocation2 + $0x70] sm:$0xff] %vm2141_vm11, %v2404_v15  ;;  %v2393_v54 = vpop.permute.xlu0 %2392 }
0x152d   :  { %2395 = vst.msk [vmem:[#allocation2 + $0x60] sm:$0xff] %vm2141_vm11, %v2393_v54 }
0x152f   :  { %v2382_v17 = vpop.permute.xlu1 %2381 }
0x1530   :  { %2384 = vst.msk [vmem:[#allocation2 + $0x50] sm:$0xff] %vm2141_vm11, %v2382_v17  ;;  %v2370_v55 = vpop.permute.xlu0 %2369  ;;  %v2426_v43 = vld [vmem:[#allocation2 + $0x80] sm:$0xff] }
0x1531   :  { %2372 = vst.msk [vmem:[#allocation2 + $0x30] sm:$0xff] %vm2141_vm11, %v2370_v55  ;;  %3171 = vmatprep.subr.mxu0 %v2426_v43  ;;  %v2719_v55 = vld [vmem:[#allocation11 + $0x8] sm:$0xff] }
0x1532   :  { %3172 = vmatpush3.msra.mxu0 %v2426_v43  ;;  %v2718_v43 = vld [vmem:[#allocation11] sm:$0xff] }
0x1533   :  { %v2359_v12 = vpop.permute.xlu1 %2358  ;;  %v2425_v44 = vld [vmem:[#allocation2 + $0x70] sm:$0xff] }
0x1534   :  { %2361 = vst.msk [vmem:[#allocation2 + $0x20] sm:$0xff] %vm2141_vm11, %v2359_v12  ;;  %3173 = vmatprep.subr.mxu0 %v2425_v44  ;;  %v2348_v16 = vpop.permute.xlu0 %2347  ;;  %v2424_v18 = vld [vmem:[#allocation2 + $0x60] sm:$0xff] }
0x1535   :  { %2350 = vst.msk [vmem:[#allocation2 + $0x10] sm:$0xff] %vm2141_vm11, %v2348_v16  ;;  %3174 = vmatpush3.msra.mxu0 %v2425_v44 }
0x1536   :  { %3175 = vmatprep.subr.mxu0 %v2424_v18 }
0x1537   :  { %v2337_v19 = vpop.permute.xlu1 %2336  ;;  %3176 = vmatpush3.msra.mxu0 %v2424_v18  ;;  %v2423_v22 = vld [vmem:[#allocation2 + $0x50] sm:$0xff] }
0x1538   :  { %2339 = vst.msk [vmem:[#allocation2] sm:$0xff] %vm2141_vm11, %v2337_v19  ;;  %3177 = vmatprep.subr.mxu0 %v2423_v22  ;;  %v2421_v20 = vld [vmem:[#allocation2 + $0x30] sm:$0xff] }
0x1539   :  { %3178 = vmatpush3.msra.mxu0 %v2423_v22 }
0x153a   :  { %3179 = vmatprep.subr.mxu0 %v2422_v23 }
0x153b   :  { %3180 = vmatpush3.msra.mxu0 %v2422_v23  ;;  %v2420_v21 = vld [vmem:[#allocation2 + $0x20] sm:$0xff] }
0x153c   :  { %3181 = vmatprep.subr.mxu0 %v2421_v20  ;;  %v2419_v25 = vld [vmem:[#allocation2 + $0x10] sm:$0xff] }
0x153d   :  { %3182 = vmatpush3.msra.mxu0 %v2421_v20 }
0x153e   :  { %3183 = vmatprep.subr.mxu0 %v2420_v21 }
0x153f   :  { %3184 = vmatpush3.msra.mxu0 %v2420_v21  ;;  %v2418_v5 = vld [vmem:[#allocation2] sm:$0xff] }
0x1540   :  { %3185 = vmatprep.subr.mxu0 %v2419_v25 }
0x1541   :  { %3186 = vmatpush3.msra.mxu0 %v2419_v25 }
0x1542   :  { %3187 = vmatprep.subr.mxu0 %v2418_v5 }
0x1543   :  { %3188 = vmatpush3.msra.mxu0 %v2418_v5 }
0x1544   :  { %3190 = vmatmul.mubr.msk.f32.vlgmr.msra.gmra.mxu0 %vm252_vm8, %v2322_v26  ;;  %3215 = vmatprep.subr.mxu0 %v3411_v3 }
0x1545   :  { %3216 = vmatpush3.msra.mxu0 %v2719_v55  ;;  %3219 = vmatprep.mubr.msk.f32.mxu0 %vm3441_vm13, %v3411_v3 }
0x1546   :  { %3217 = vmatprep.subr.mxu0 %v3411_v3 }
0x1547   :  { %3218 = vmatpush3.msra.mxu0 %v2718_v43 }
0x1604   :  { %v3191_v30 = vpop.f32.mrf.mxu0 }
0x1606   :  { %v2500_v31 = vpop.f32.mrf.mxu0 }
0x1607   :  { %v2508_v27 = vmax.f32 %v2500_v31, 0.0 }
0x1609   :  { %2562 = vst.msk [vmem:[#allocation2 + $0x40] sm:$0xff] %vm2141_vm11, %v2508_v27  ;;  %2512 = vrot.lane.b32.xlu0 %v2508_v27, %s3413_s19 }
0x160d   :  { %2598 = vrot.lane.b32.xlu0 %v4272_v60, %s3429_s11 }
0x1610   :  { %v2611_v8 = vld [vmem:[#allocation2 + $0x40] sm:$0xff] }
0x1611   :  { %2576 = vrot.lane.b32.xlu0 %v4276_v61, %s3430_s29 }
0x1615   :  { %2553 = vrot.lane.b32.xlu0 %v4280_v24, %s3412_s18 }
0x1619   :  { %2531 = vrot.lane.b32.xlu0 %v4284_v4, %s3431_s10 }
0x167b   :  { %v2513_v28 = vpop.permute.xlu0 %2512 }
0x167c   :  { %v2514_v29 = vsel %vm2124_vm12, %v2513_v28, %v2508_v27 }
0x167d   :  { %2515 = vrot.lane.b32.xlu1 %v2514_v29, %s3413_s19 }
0x167f   :  { %v2599_v60 = vpop.permute.xlu0 %2598 }
0x1681   :  { %2587 = vrot.lane.b32.xlu1 %v4290_v7, %s3432_s13 }
0x1683   :  { %v2577_v61 = vpop.permute.xlu0 %2576 }
0x1685   :  { %2565 = vrot.lane.b32.xlu1 %v4294_v10, %s3410_s0 }
0x1687   :  { %v2554_v34 = vpop.permute.xlu0 %2553 }
0x1689   :  { %2542 = vrot.lane.b32.xlu1 %v4298_v11, %s3433_s20 }
0x168d   :  { %2520 = vrot.lane.b32.xlu1 %v4302_v48, %s3434_s30  ;;  %v2532_v48 = vpop.permute.xlu0 %2531 }
0x16ef   :  { %v2516_v24 = vpop.permute.xlu1 %2515 }
0x16f0   :  { %v2517_v4 = vsel %vm2124_vm12, %v2516_v24, %v2508_v27 }
0x16f1   :  { %v2601_v38 = vmul.f32 %v2599_v60, %v2517_v4  ;;  %v2579_v1 = vmul.f32 %v2577_v61, %v2517_v4  ;;  %v2556_v2 = vmul.f32 %v2554_v34, %v2517_v4  ;;  %v2534_v42 = vmul.f32 %v2532_v48, %v2517_v4 }
0x16f3   :  { %v2588_v39 = vpop.permute.xlu1 %2587  ;;  %2603 = vrot.lane.b32.xlu0 %v2601_v38, %s3435_s4 }
0x16f4   :  { %v2590_v7 = vmul.f32 %v2588_v39, %v2517_v4 }
0x16f6   :  { %2592 = vrot.lane.b32.xlu1 %v2590_v7, %s3436_s9 }
0x16f7   :  { %v2566_v10 = vpop.permute.xlu1 %2565  ;;  %2581 = vrot.lane.b32.xlu0 %v2579_v1, %s3437_s12 }
0x16f8   :  { %v2568_v11 = vmul.f32 %v2566_v10, %v2517_v4 }
0x16fa   :  { %2570 = vrot.lane.b32.xlu1 %v2568_v11, %s3409_s17 }
0x16fb   :  { %v2543_v37 = vpop.permute.xlu1 %2542  ;;  %2558 = vrot.lane.b32.xlu0 %v2556_v2, %s3408_s16 }
0x16fc   :  { %v2545_v41 = vmul.f32 %v2543_v37, %v2517_v4 }
0x16fe   :  { %2547 = vrot.lane.b32.xlu1 %v2545_v41, %s3438_s6 }
0x16ff   :  { %v2521_v45 = vpop.permute.xlu1 %2520  ;;  %2536 = vrot.lane.b32.xlu0 %v2534_v42, %s3439_s7 }
0x1700   :  { %v2523_v33 = vmul.f32 %v2521_v45, %v2517_v4 }
0x1702   :  { %2525 = vrot.lane.b32.xlu1 %v2523_v33, %s3440_s2 }
0x1765   :  { %v2604_v35 = vpop.permute.xlu0 %2603 }
0x1766   :  { %2606 = vst.msk [vmem:[#allocation2 + $0x80] sm:$0xff] %vm2141_vm11, %v2604_v35 }
0x1768   :  { %v2593_v50 = vpop.permute.xlu1 %2592 }
0x1769   :  { %2595 = vst.msk [vmem:[#allocation2 + $0x70] sm:$0xff] %vm2141_vm11, %v2593_v50  ;;  %v2582_v0 = vpop.permute.xlu0 %2581 }
0x176a   :  { %2584 = vst.msk [vmem:[#allocation2 + $0x60] sm:$0xff] %vm2141_vm11, %v2582_v0 }
0x176c   :  { %v2571_v51 = vpop.permute.xlu1 %2570 }
0x176d   :  { %2573 = vst.msk [vmem:[#allocation2 + $0x50] sm:$0xff] %vm2141_vm11, %v2571_v51  ;;  %v2559_v52 = vpop.permute.xlu0 %2558  ;;  %v2615_v53 = vld [vmem:[#allocation2 + $0x80] sm:$0xff] }
0x176e   :  { %2561 = vst.msk [vmem:[#allocation2 + $0x30] sm:$0xff] %vm2141_vm11, %v2559_v52  ;;  %3194 = vmatprep.subr.mxu1 %v2615_v53 }
0x176f   :  { %3195 = vmatpush3.msra.mxu1 %v2615_v53 }
0x1770   :  { %v2548_v56 = vpop.permute.xlu1 %2547  ;;  %v2614_v57 = vld [vmem:[#allocation2 + $0x70] sm:$0xff] }
0x1771   :  { %2550 = vst.msk [vmem:[#allocation2 + $0x20] sm:$0xff] %vm2141_vm11, %v2548_v56  ;;  %3196 = vmatprep.subr.mxu1 %v2614_v57  ;;  %v2537_v58 = vpop.permute.xlu0 %2536  ;;  %v2613_v59 = vld [vmem:[#allocation2 + $0x60] sm:$0xff] }
0x1772   :  { %2539 = vst.msk [vmem:[#allocation2 + $0x10] sm:$0xff] %vm2141_vm11, %v2537_v58  ;;  %3197 = vmatpush3.msra.mxu1 %v2614_v57 }
0x1773   :  { %3198 = vmatprep.subr.mxu1 %v2613_v59 }
0x1774   :  { %v2526_v6 = vpop.permute.xlu1 %2525  ;;  %3199 = vmatpush3.msra.mxu1 %v2613_v59  ;;  %v2612_v62 = vld [vmem:[#allocation2 + $0x50] sm:$0xff] }
0x1775   :  { %2528 = vst.msk [vmem:[#allocation2] sm:$0xff] %vm2141_vm11, %v2526_v6  ;;  %3200 = vmatprep.subr.mxu1 %v2612_v62  ;;  %v2610_v9 = vld [vmem:[#allocation2 + $0x30] sm:$0xff] }
0x1776   :  { %3201 = vmatpush3.msra.mxu1 %v2612_v62 }
0x1777   :  { %3202 = vmatprep.subr.mxu1 %v2611_v8 }
0x1778   :  { %3203 = vmatpush3.msra.mxu1 %v2611_v8  ;;  %v2609_v32 = vld [vmem:[#allocation2 + $0x20] sm:$0xff] }
0x1779   :  { %3204 = vmatprep.subr.mxu1 %v2610_v9  ;;  %v2608_v36 = vld [vmem:[#allocation2 + $0x10] sm:$0xff] }
0x177a   :  { %3205 = vmatpush3.msra.mxu1 %v2610_v9 }
0x177b   :  { %3206 = vmatprep.subr.mxu1 %v2609_v32 }
0x177c   :  { %3207 = vmatpush3.msra.mxu1 %v2609_v32  ;;  %v2607_v46 = vld [vmem:[#allocation2] sm:$0xff] }
0x177d   :  { %3208 = vmatprep.subr.mxu1 %v2608_v36 }
0x177e   :  { %3209 = vmatpush3.msra.mxu1 %v2608_v36 }
0x177f   :  { %3210 = vmatprep.subr.mxu1 %v2607_v46 }
0x1780   :  { %3211 = vmatpush3.msra.mxu1 %v2607_v46 }
0x1781   :  { %3213 = vmatmul.mubr.msk.f32.vlgmr.msra.gmra.mxu1 %vm252_vm8, %v2511_v47 }
0x1841   :  { %v3214_v40 = vpop.f32.mrf.mxu1 }
0x1843   :  { %v2689_v13 = vpop.f32.mrf.mxu1 }
0x1844   :  { %v2697_v14 = vadd.f32 %v2689_v13, %v4326_v63 }
0x1846   :  { %v2698_v15 = vmax.f32 %v2697_v14, 0.0 }
0x1848   :  { %2699 = vrot.lane.b32.xlu0 %v2698_v15, %s3413_s19 }
0x18ba   :  { %v2700_v54 = vpop.permute.xlu0 %2699 }
0x18bb   :  { %v2701_v17 = vsel %vm2124_vm12, %v2700_v54, %v2698_v15 }
0x18bc   :  { %2702 = vrot.lane.b32.xlu1 %v2701_v17, %s3413_s19 }
0x192e   :  { %v2703_v12 = vpop.permute.xlu1 %2702 }
0x192f   :  { %v2704_v63 = vsel %vm2124_vm12, %v2703_v12, %v2698_v15 }
0x1930   :  { %2710 = vrot.lane.b32.xlu1 %v2704_v63, %s3436_s9  ;;  %2706 = vrot.lane.b32.xlu0 %v2704_v63, %s3409_s17 }
0x1934   :  { %2714 = vrot.lane.b32.xlu0 %v2704_v63, %s3435_s4 }
0x19a2   :  { %v2707_v44 = vpop.permute.xlu0 %2706  ;;  %v2711_v18 = vpop.permute.xlu1 %2710 }
0x19a3   :  { %v2709_v16 = vmax.f32 %v2698_v15, %v2707_v44 }
0x19a5   :  { %v2713_v19 = vmax.f32 %v2709_v16, %v2711_v18 }
0x19a6   :  { %v2715_v22 = vpop.permute.xlu0 %2714 }
0x19a7   :  { %v2717_v23 = vmax.f32 %v2713_v19, %v2715_v22 }
0x19a9   :  { %3220 = vmatmul.mubr.msk.f32.vlgmr.msra.gmra.mxu0 %vm2141_vm11, %v2717_v23 }
0x1a69   :  { %v2789_v20 = vpop.f32.mrf.mxu0 }
0x1a6a   :  { %2794 = vst.msk [vmem:[%s4433_s8] sm:$0xff] %vm2793_vm14, %v2789_v20 }
0x1a6b   :  { %v3221_v3 = vpop.f32.mrf.mxu0 }
0x1a6c   :  { %2799 = vsyncpa [#allocation4], 1 }
0x1a6d   :  { %2800 = vsyncpa [#allocation6], 1 }
0x1a6e   :  { %2801 = vsyncpa [#allocation9], 1 }
0x1a6f   :  { %2802 = vsyncpa [#allocation12], 1 }

</bundles_post_ra>
